<compile_context>
chip_gen: v5e
topology: v5e:2x2
jax: 0.10.0
libtpu: 0.0.40
codegen_flags: <defaults>
</compile_context>

<pallas_src>
import functools
import jax
import jax.numpy as jnp
from jax.experimental import pallas as pl
from jax.experimental.pallas import tpu as pltpu


def _rep0(k):
    # constant block index -> array stays VMEM-resident across the E-tile grid
    return (0, 0)


# ------------------------- kernels -------------------------

def _edge_encoder_kernel(el_ref, temb_ref, w0_ref, b0_ref, w1_ref, b1_ref, ea_ref):
    # edge_attr = (MLP(edge_length)) * Embedding(edge_type), fully fused for one E-tile.
    # Layer 0 is Linear(1 -> H): a K=1 matmul == broadcast multiply -> keep it on the VPU.
    d0 = jnp.maximum(el_ref[...] * w0_ref[...] + b0_ref[...], 0.0)          # [Et,1]*[1,H] -> [Et,H]
    d1 = jnp.dot(d0.astype(jnp.bfloat16), w1_ref[...],
                 preferred_element_type=jnp.float32) + b1_ref[...]
    ea_ref[...] = (d1 * temb_ref[...]).astype(ea_ref.dtype)


def _node_embed_kernel(z_ref, w_ref, b_ref, h_ref):
    # h0 = node_emb @ W + b  (tiny, runs once; kept f32)
    h_ref[...] = jnp.dot(z_ref[...], w_ref[...],
                         preferred_element_type=jnp.float32) + b_ref[...]


def _gcl_layer_kernel(row_e_ref, col_e_ref, row_n_ref, h_ref, ea_ref,
                      ew0_ref, eb0_ref, ew1_ref, eb1_ref,
                      nw0_ref, nb0_ref, nw1_ref, nb1_ref,
                      hout_ref, agg_ref):
    k = pl.program_id(0)
    Et = ea_ref.shape[0]
    N, H = h_ref.shape

    @pl.when(k == 0)
    def _():
        agg_ref[...] = jnp.zeros_like(agg_ref)

    h = h_ref[...]                                    # [N, H] f32, VMEM-resident
    h_bf = h.astype(jnp.bfloat16)

    # In-kernel gather of h[row], h[col] for this edge tile via one-hot matmul (MXU).
    # Padded edges carry row id = -1 -> one-hot row is all zeros -> gathers zeros.
    lane_n = jax.lax.broadcasted_iota(jnp.int32, (Et, N), 1)
    oh_row = (lane_n == row_e_ref[...]).astype(jnp.float32).astype(jnp.bfloat16)   # [Et, N]
    oh_col = (lane_n == col_e_ref[...]).astype(jnp.float32).astype(jnp.bfloat16)
    hr = jnp.dot(oh_row, h_bf, preferred_element_type=jnp.float32)                 # [Et, H]
    hc = jnp.dot(oh_col, h_bf, preferred_element_type=jnp.float32)

    # Edge MLP layer 0 without materializing concat([hr, hc, ea]): use W0's HxH row blocks.
    w0a = ew0_ref[0:H, :]
    w0b = ew0_ref[H:2 * H, :]
    w0c = ew0_ref[2 * H:3 * H, :]
    ea_bf = ea_ref[...].astype(jnp.bfloat16)
    m = (jnp.dot(hr.astype(jnp.bfloat16), w0a, preferred_element_type=jnp.float32)
         + jnp.dot(hc.astype(jnp.bfloat16), w0b, preferred_element_type=jnp.float32)
         + jnp.dot(ea_bf, w0c, preferred_element_type=jnp.float32)
         + eb0_ref[...])
    m = jnp.maximum(m, 0.0)
    m = jnp.dot(m.astype(jnp.bfloat16), ew1_ref[...],
                preferred_element_type=jnp.float32) + eb1_ref[...]
    m = jnp.maximum(m, 0.0)                                                         # [Et, H]

    # Tiled segment-sum (scatter-add) into the resident accumulator; one-hot kept f32.
    node_iota = jax.lax.broadcasted_iota(jnp.int32, (N, Et), 0)
    oh_seg = (node_iota == row_n_ref[...]).astype(jnp.float32)                      # [N, Et]
    agg_ref[...] += jnp.dot(oh_seg, m, preferred_element_type=jnp.float32)

    # Node MLP + residual once all E-tiles have been accumulated.
    @pl.when(k == pl.num_programs(0) - 1)
    def _():
        agg = agg_ref[...]
        nw0a = nw0_ref[0:H, :]
        nw0b = nw0_ref[H:2 * H, :]
        dh = (jnp.dot(h_bf, nw0a, preferred_element_type=jnp.float32)
              + jnp.dot(agg.astype(jnp.bfloat16), nw0b, preferred_element_type=jnp.float32)
              + nb0_ref[...])
        dh = jnp.maximum(dh, 0.0)
        dh = jnp.dot(dh.astype(jnp.bfloat16), nw1_ref[...],
                     preferred_element_type=jnp.float32) + nb1_ref[...]
        hout_ref[...] = h + dh


def _grad_geom_kernel(row_e_ref, col_e_ref, row_n_ref, h_ref, ea_ref, pos_ref, el_ref,
                      w0_ref, b0_ref, w1_ref, b1_ref, w2_ref, b2_ref,
                      out_ref, agg_ref, *, inv_norm):
    # Fused: assemble_node_pair_feature_1 + grad_local_dist_mlp + dd_dr/trans + scatter-add
    # + pos update.  edge_inv / pos gathers / trans never leave VMEM.
    k = pl.program_id(0)
    Et = ea_ref.shape[0]
    N, H = h_ref.shape

    @pl.when(k == 0)
    def _():
        agg_ref[...] = jnp.zeros_like(agg_ref)

    lane_n = jax.lax.broadcasted_iota(jnp.int32, (Et, N), 1)
    m_row = (lane_n == row_e_ref[...]).astype(jnp.float32)       # [Et, N]
    m_col = (lane_n == col_e_ref[...]).astype(jnp.float32)

    h_bf = h_ref[...].astype(jnp.bfloat16)
    hr = jnp.dot(m_row.astype(jnp.bfloat16), h_bf, preferred_element_type=jnp.float32)
    hc = jnp.dot(m_col.astype(jnp.bfloat16), h_bf, preferred_element_type=jnp.float32)

    # grad_local_dist_mlp (3H -> H -> H/2 -> 1), no concat: W0 row blocks.
    w0a = w0_ref[0:H, :]
    w0b = w0_ref[H:2 * H, :]
    w0c = w0_ref[2 * H:3 * H, :]
    ea_bf = ea_ref[...].astype(jnp.bfloat16)
    y = (jnp.dot(hr.astype(jnp.bfloat16), w0a, preferred_element_type=jnp.float32)
         + jnp.dot(hc.astype(jnp.bfloat16), w0b, preferred_element_type=jnp.float32)
         + jnp.dot(ea_bf, w0c, preferred_element_type=jnp.float32)
         + b0_ref[...])
    y = jnp.maximum(y, 0.0)
    y = jnp.dot(y.astype(jnp.bfloat16), w1_ref[...],
                preferred_element_type=jnp.float32) + b1_ref[...]
    y = jnp.maximum(y, 0.0)                                        # [Et, H/2]
    # Final Linear(H/2 -> 1) as VPU multiply + lane reduction (avoids a 1-lane MXU output).
    edge_inv = jnp.sum(y * w2_ref[...], axis=-1, keepdims=True) + b2_ref[...]   # [Et, 1]

    # Geometry: gather positions in f32 (exact one-hot select), reciprocal on the EUP.
    pos_f = pos_ref[...]
    pr = jnp.dot(m_row, pos_f, preferred_element_type=jnp.float32)              # [Et, 3]
    pc = jnp.dot(m_col, pos_f, preferred_element_type=jnp.float32)
    inv_len = pl.reciprocal(jnp.maximum(el_ref[...], 1e-12), approx=True)       # [Et, 1]
    trans = (pr - pc) * inv_len * edge_inv                                      # [Et, 3]

    node_iota = jax.lax.broadcasted_iota(jnp.int32, (N, Et), 0)
    oh_seg = (node_iota == row_n_ref[...]).astype(jnp.float32)                  # [N, Et]
    agg_ref[...] += jnp.dot(oh_seg, trans, preferred_element_type=jnp.float32)

    @pl.when(k == pl.num_programs(0) - 1)
    def _():
        out_ref[...] = (pos_ref[...] + agg_ref[...] * inv_norm).astype(out_ref.dtype)


# ------------------------- pallas_call wrappers -------------------------

def edge_encoder(edge_length_p, t_emb, params, e_tile):
    E_pad, H = t_emb.shape
    n_et = E_pad // e_tile
    return pl.pallas_call(
        _edge_encoder_kernel,
        out_shape=jax.ShapeDtypeStruct((E_pad, H), jnp.float32),
        grid=(n_et,),
        in_specs=[
            pl.BlockSpec((e_tile, 1), lambda k: (k, 0)),
            pl.BlockSpec((e_tile, H), lambda k: (k, 0)),
            pl.BlockSpec((1, H), _rep0),
            pl.BlockSpec((1, H), _rep0),
            pl.BlockSpec((H, H), _rep0),
            pl.BlockSpec((1, H), _rep0),
        ],
        out_specs=pl.BlockSpec((e_tile, H), lambda k: (k, 0)),
        compiler_params=pltpu.CompilerParams(dimension_semantics=("parallel",)),
    )(edge_length_p, t_emb, params['ee_w0'], params['ee_b0'],
      params['ee_w1'], params['ee_b1'])


def node_embed(node_emb, params):
    N = node_emb.shape[0]
    H = params['emb_w'].shape[1]
    vmem = pl.BlockSpec(memory_space=pltpu.MemorySpace.VMEM)
    return pl.pallas_call(
        _node_embed_kernel,
        out_shape=jax.ShapeDtypeStruct((N, H), jnp.float32),
        in_specs=[vmem, vmem, vmem],
        out_specs=vmem,
    )(node_emb, params['emb_w'], params['emb_b'])


def gcl_layer(h, edge_attr, row_e, col_e, row_n, params, l, e_tile):
    N, H = h.shape
    E_pad = edge_attr.shape[0]
    n_et = E_pad // e_tile
    p = params
    return pl.pallas_call(
        _gcl_layer_kernel,
        out_shape=jax.ShapeDtypeStruct((N, H), jnp.float32),
        grid=(n_et,),
        in_specs=[
            pl.BlockSpec((e_tile, 1), lambda k: (k, 0)),     # row ids (edge-major)
            pl.BlockSpec((e_tile, 1), lambda k: (k, 0)),     # col ids (edge-major)
            pl.BlockSpec((1, e_tile), lambda k: (0, k)),     # row ids (scatter layout)
            pl.BlockSpec((N, H), _rep0),                     # h, resident across E-tiles
            pl.BlockSpec((e_tile, H), lambda k: (k, 0)),     # edge_attr tile
            pl.BlockSpec((3 * H, H), _rep0),                 # edge-MLP W0 (3 row blocks)
            pl.BlockSpec((1, H), _rep0),
            pl.BlockSpec((H, H), _rep0),
            pl.BlockSpec((1, H), _rep0),
            pl.BlockSpec((2 * H, H), _rep0),                 # node-MLP W0 (2 row blocks)
            pl.BlockSpec((1, H), _rep0),
            pl.BlockSpec((H, H), _rep0),
            pl.BlockSpec((1, H), _rep0),
        ],
        out_specs=pl.BlockSpec((N, H), _rep0),
        scratch_shapes=[pltpu.VMEM((N, H), jnp.float32)],
        compiler_params=pltpu.CompilerParams(dimension_semantics=("arbitrary",)),
    )(row_e, col_e, row_n, h, edge_attr,
      p[f'gcl{l}_e_w0'], p[f'gcl{l}_e_b0'], p[f'gcl{l}_e_w1'], p[f'gcl{l}_e_b1'],
      p[f'gcl{l}_n_w0'], p[f'gcl{l}_n_b0'], p[f'gcl{l}_n_w1'], p[f'gcl{l}_n_b1'])


def grad_and_geom(node_attr, edge_attr, pos, row_e, col_e, row_n, edge_length_p, params, e_tile):
    N, H = node_attr.shape
    E_pad = edge_attr.shape[0]
    n_et = E_pad // e_tile
    Hh = H // 2
    return pl.pallas_call(
        functools.partial(_grad_geom_kernel, inv_norm=1.0 / 100.0),
        out_shape=jax.ShapeDtypeStruct((N, 3), jnp.float32),
        grid=(n_et,),
        in_specs=[
            pl.BlockSpec((e_tile, 1), lambda k: (k, 0)),
            pl.BlockSpec((e_tile, 1), lambda k: (k, 0)),
            pl.BlockSpec((1, e_tile), lambda k: (0, k)),
            pl.BlockSpec((N, H), _rep0),                     # node_attr, resident
            pl.BlockSpec((e_tile, H), lambda k: (k, 0)),     # edge_attr tile
            pl.BlockSpec((N, 3), _rep0),                     # pos, resident
            pl.BlockSpec((e_tile, 1), lambda k: (k, 0)),     # edge_length tile
            pl.BlockSpec((3 * H, H), _rep0),
            pl.BlockSpec((1, H), _rep0),
            pl.BlockSpec((H, Hh), _rep0),
            pl.BlockSpec((1, Hh), _rep0),
            pl.BlockSpec((1, Hh), _rep0),                    # final layer weight, [1, H/2]
            pl.BlockSpec((1, 1), _rep0),
        ],
        out_specs=pl.BlockSpec((N, 3), _rep0),
        scratch_shapes=[pltpu.VMEM((N, 3), jnp.float32)],
        compiler_params=pltpu.CompilerParams(dimension_semantics=("arbitrary",)),
    )(row_e, col_e, row_n, node_attr, edge_attr, pos, edge_length_p,
      params['mlp_w0'], params['mlp_b0'], params['mlp_w1'], params['mlp_b1'],
      params['mlp_w2'], params['mlp_b2'])


# ------------------------- parameters -------------------------

def init_params(key, H, C, num_convs, num_edge_types=100):
    keys = iter(jax.random.split(key, 64))

    def w(shape, scale=0.1, dtype=jnp.bfloat16):
        return (scale * jax.random.normal(next(keys), shape, jnp.float32)).astype(dtype)

    def b(d):
        return jnp.zeros((1, d), jnp.float32)

    p = {}
    # edge encoder: MLP(1 -> [H, H]) * Embedding(num_edge_types, H)
    p['ee_w0'], p['ee_b0'] = w((1, H), dtype=jnp.float32), b(H)   # used on VPU, keep f32
    p['ee_w1'], p['ee_b1'] = w((H, H)), b(H)                      # MXU -> bf16 storage
    p['ee_emb'] = w((num_edge_types, H), 1.0, jnp.float32)
    # node embedding Linear(C -> H)
    p['emb_w'], p['emb_b'] = w((C, H), dtype=jnp.float32), b(H)
    # GCL layers: edge MLP(3H -> H -> H), node MLP(2H -> H -> H), residual
    for l in range(num_convs):
        p[f'gcl{l}_e_w0'], p[f'gcl{l}_e_b0'] = w((3 * H, H)), b(H)
        p[f'gcl{l}_e_w1'], p[f'gcl{l}_e_b1'] = w((H, H)), b(H)
        p[f'gcl{l}_n_w0'], p[f'gcl{l}_n_b0'] = w((2 * H, H)), b(H)
        p[f'gcl{l}_n_w1'], p[f'gcl{l}_n_b1'] = w((H, H)), b(H)
    # grad_local_dist_mlp: 3H -> H -> H//2 -> 1; final layer stored as [1, H//2] (VPU + reduce)
    p['mlp_w0'], p['mlp_b0'] = w((3 * H, H)), b(H)
    p['mlp_w1'], p['mlp_b1'] = w((H, H // 2)), b(H // 2)
    p['mlp_w2'], p['mlp_b2'] = w((1, H // 2), dtype=jnp.float32), b(1)
    return p


# ------------------------- forward -------------------------

def edm_block_forward(params, node_emb, pos, edge_index, edge_type, edge_length,
                      num_convs, e_tile=128):
    # e_tile must be a multiple of 128 (lane-dim BlockSpec constraint for the [1, E] id array).
    N = pos.shape[0]
    row = edge_index[0].astype(jnp.int32)
    col = edge_index[1].astype(jnp.int32)
    E = row.shape[0]
    n_et = pl.cdiv(E, e_tile)
    E_pad = n_et * e_tile
    pad = E_pad - E

    # Pad edges to a multiple of the E-tile; padded edges get row id = -1 so the in-kernel
    # one-hot gather/scatter contributes exactly zero for them.
    row_p = jnp.pad(row, (0, pad), constant_values=-1)
    col_p = jnp.pad(col, (0, pad), constant_values=0)
    etype_p = jnp.pad(edge_type.astype(jnp.int32), (0, pad), constant_values=0)
    elen_p = jnp.pad(edge_length, ((0, pad), (0, 0)), constant_values=1.0)
    row_e = row_p[:, None]          # [E_pad, 1]  edge-major
    col_e = col_p[:, None]
    row_n = row_p[None, :]          # [1, E_pad]  scatter layout

    # glue: edge-type embedding lookup (data-dependent gather from a small table)
    t_emb = jnp.take(params['ee_emb'], etype_p, axis=0)                   # [E_pad, H]

    # --- edge_encoder_local (fused) ---
    edge_attr = edge_encoder(elen_p, t_emb, params, e_tile)               # [E_pad, H]

    # --- encoder_local: node embedding + fused GCL layers ---
    h = node_embed(node_emb, params)                                      # [N, H]
    for l in range(num_convs):
        h = gcl_layer(h, edge_attr, row_e, col_e, row_n, params, l, e_tile)

    # --- pair features + grad_local_dist_mlp + geometric update (fused) ---
    return grad_and_geom(h, edge_attr, pos, row_e, col_e, row_n, elen_p, params, e_tile)


# ------------------------- pure-JAX reference -------------------------

def reference_forward(params, node_emb, pos, edge_index, edge_type, edge_length, num_convs):
    f32 = lambda a: a.astype(jnp.float32)
    row, col = edge_index[0], edge_index[1]
    N = pos.shape[0]
    d = jnp.maximum(edge_length * f32(params['ee_w0']) + params['ee_b0'], 0.0)
    d = d @ f32(params['ee_w1']) + params['ee_b1']
    edge_attr = d * params['ee_emb'][edge_type]
    h = node_emb @ f32(params['emb_w']) + params['emb_b']
    for l in range(num_convs):
        m_in = jnp.concatenate([h[row], h[col], edge_attr], axis=1)
        m = jnp.maximum(m_in @ f32(params[f'gcl{l}_e_w0']) + params[f'gcl{l}_e_b0'], 0.0)
        m = jnp.maximum(m @ f32(params[f'gcl{l}_e_w1']) + params[f'gcl{l}_e_b1'], 0.0)
        agg = jnp.zeros((N, m.shape[1]), jnp.float32).at[row].add(m)
        n_in = jnp.concatenate([h, agg], axis=1)
        dh = jnp.maximum(n_in @ f32(params[f'gcl{l}_n_w0']) + params[f'gcl{l}_n_b0'], 0.0)
        dh = dh @ f32(params[f'gcl{l}_n_w1']) + params[f'gcl{l}_n_b1']
        h = h + dh
    h_pair = jnp.concatenate([h[row], h[col], edge_attr], axis=1)
    y = jnp.maximum(h_pair @ f32(params['mlp_w0']) + params['mlp_b0'], 0.0)
    y = jnp.maximum(y @ f32(params['mlp_w1']) + params['mlp_b1'], 0.0)
    edge_inv = jnp.sum(y * params['mlp_w2'], axis=-1, keepdims=True) + params['mlp_b2']
    dd_dr = (pos[row] - pos[col]) / edge_length
    trans = dd_dr * edge_inv
    agg = jnp.zeros((N, 3), jnp.float32).at[row].add(trans) / 100.0
    return pos + agg


# ------------------------- main -------------------------

if __name__ == "__main__":
    # nodes, edges (deliberately not a multiple of the E-tile), hidden, eigvec channels
    N, E, H, C = 64, 250, 128, 4
    num_convs = 2
    E_TILE = 128

    key = jax.random.PRNGKey(0)
    k1, k2, k3, k4, kp = jax.random.split(key, 5)
    node_emb = jax.random.normal(k1, (N, C), jnp.float32)
    pos = jax.random.normal(k2, (N, 3), jnp.float32)
    edge_index = jax.random.randint(k3, (2, E), 0, N, dtype=jnp.int32)
    edge_type = jax.random.randint(k4, (E,), 0, 8, dtype=jnp.int32)
    edge_length = jnp.linalg.norm(pos[edge_index[0]] - pos[edge_index[1]],
                                  axis=-1, keepdims=True) + 1e-3            # [E, 1]

    params = init_params(kp, H, C, num_convs)

    fwd = jax.jit(functools.partial(edm_block_forward, num_convs=num_convs, e_tile=E_TILE))
    out = fwd(params, node_emb, pos, edge_index, edge_type, edge_length)
    jax.block_until_ready(out)

    ref = reference_forward(params, node_emb, pos, edge_index, edge_type, edge_length, num_convs)
    err = float(jnp.max(jnp.abs(out - ref)))

    assert out.shape == (N, 3) and out.dtype == jnp.float32
    assert err < 5e-2, f"mismatch vs reference: max abs err = {err}"
    print("KERNEL_OK")
</pallas_src>

<mosaic_0001>
module attributes {stable_mosaic.version = 11 : i64} {
  func.func @_edge_encoder_kernel(%arg0: i32, %arg1: memref<128x1xf32, #tpu.memory_space<vmem>>, %arg2: memref<128x128xf32, #tpu.memory_space<vmem>>, %arg3: memref<1x128xf32, #tpu.memory_space<vmem>>, %arg4: memref<1x128xf32, #tpu.memory_space<vmem>>, %arg5: memref<128x128xbf16, #tpu.memory_space<vmem>>, %arg6: memref<1x128xf32, #tpu.memory_space<vmem>>, %arg7: memref<128x128xf32, #tpu.memory_space<vmem>>) attributes {dimension_semantics = [#tpu.dimension_semantics<parallel>], iteration_bounds = array<i64: 2>, scalar_prefetch = 0 : i64, scratch_operands = 0 : i64, tpu.core_type = #tpu.core_type<tc>, window_params = [{transform_indices = @transform_0, window_bounds = array<i64: 128, 1>}, {transform_indices = @transform_1, window_bounds = array<i64: 128, 128>}, {pipeline_mode = #tpu.pipeline_mode<synchronous>, transform_indices = @transform_2, window_bounds = array<i64: 1, 128>}, {pipeline_mode = #tpu.pipeline_mode<synchronous>, transform_indices = @transform_3, window_bounds = array<i64: 1, 128>}, {pipeline_mode = #tpu.pipeline_mode<synchronous>, transform_indices = @transform_4, window_bounds = array<i64: 128, 128>}, {pipeline_mode = #tpu.pipeline_mode<synchronous>, transform_indices = @transform_5, window_bounds = array<i64: 1, 128>}, {transform_indices = @transform_6, window_bounds = array<i64: 128, 128>}]} {
    %c0 = arith.constant 0 : index
    %c0_0 = arith.constant 0 : index
    %0 = vector.load %arg1[%c0, %c0_0] : memref<128x1xf32, #tpu.memory_space<vmem>>, vector<128x1xf32>
    %c0_1 = arith.constant 0 : index
    %c0_2 = arith.constant 0 : index
    %1 = vector.load %arg3[%c0_1, %c0_2] : memref<1x128xf32, #tpu.memory_space<vmem>>, vector<1x128xf32>
    %2 = vector.broadcast %0 : vector<128x1xf32> to vector<128x128xf32>
    %3 = vector.broadcast %1 : vector<1x128xf32> to vector<128x128xf32>
    %4 = arith.mulf %2, %3 : vector<128x128xf32>
    %c0_3 = arith.constant 0 : index
    %c0_4 = arith.constant 0 : index
    %5 = vector.load %arg4[%c0_3, %c0_4] : memref<1x128xf32, #tpu.memory_space<vmem>>, vector<1x128xf32>
    %6 = vector.broadcast %5 : vector<1x128xf32> to vector<128x128xf32>
    %7 = arith.addf %4, %6 : vector<128x128xf32>
    %cst = arith.constant 0.000000e+00 : f32
    %8 = vector.broadcast %cst : f32 to vector<128x128xf32>
    %9 = arith.maximumf %7, %8 : vector<128x128xf32>
    %10 = arith.truncf %9 : vector<128x128xf32> to vector<128x128xbf16>
    %c0_5 = arith.constant 0 : index
    %c0_6 = arith.constant 0 : index
    %11 = vector.load %arg5[%c0_5, %c0_6] : memref<128x128xbf16, #tpu.memory_space<vmem>>, vector<128x128xbf16>
    %cst_7 = arith.constant dense<0.000000e+00> : vector<128x128xf32>
    %12 = tpu.matmul %10, %11, %cst_7 {dimension_numbers = #tpu.dot_dimension_numbers<[1], [0], [0], [1], [0, 0, 1, 1], [], []>} : vector<128x128xbf16>, vector<128x128xbf16>, vector<128x128xf32> -> vector<128x128xf32>
    %c0_8 = arith.constant 0 : index
    %c0_9 = arith.constant 0 : index
    %13 = vector.load %arg6[%c0_8, %c0_9] : memref<1x128xf32, #tpu.memory_space<vmem>>, vector<1x128xf32>
    %14 = vector.broadcast %13 : vector<1x128xf32> to vector<128x128xf32>
    %15 = arith.addf %12, %14 : vector<128x128xf32>
    %c0_10 = arith.constant 0 : index
    %c0_11 = arith.constant 0 : index
    %16 = vector.load %arg2[%c0_10, %c0_11] : memref<128x128xf32, #tpu.memory_space<vmem>>, vector<128x128xf32>
    %17 = arith.mulf %15, %16 : vector<128x128xf32>
    %c0_12 = arith.constant 0 : index
    %c0_13 = arith.constant 0 : index
    %18 = vector.load %arg7[%c0_12, %c0_13] : memref<128x128xf32, #tpu.memory_space<vmem>>, vector<128x128xf32>
    tpu.vector_store %arg7[%c0_12, %c0_13], %17 {strides = array<i32>} : memref<128x128xf32, #tpu.memory_space<vmem>>, vector<128x128xf32>,
    return
  }
  func.func @transform_0(%arg0: i32) -> (i32, i32) {
    %c0_i32 = arith.constant 0 : i32
    %c0_i32_0 = arith.constant 0 : i32
    return %arg0, %c0_i32 : i32, i32
  }
  func.func @transform_1(%arg0: i32) -> (i32, i32) {
    %c0_i32 = arith.constant 0 : i32
    %c0_i32_0 = arith.constant 0 : i32
    return %arg0, %c0_i32 : i32, i32
  }
  func.func @transform_2(%arg0: i32) -> (i32, i32) {
    %c0_i32 = arith.constant 0 : i32
    %c0_i32_0 = arith.constant 0 : i32
    %c0_i32_1 = arith.constant 0 : i32
    return %c0_i32, %c0_i32_0 : i32, i32
  }
  func.func @transform_3(%arg0: i32) -> (i32, i32) {
    %c0_i32 = arith.constant 0 : i32
    %c0_i32_0 = arith.constant 0 : i32
    %c0_i32_1 = arith.constant 0 : i32
    return %c0_i32, %c0_i32_0 : i32, i32
  }
  func.func @transform_4(%arg0: i32) -> (i32, i32) {
    %c0_i32 = arith.constant 0 : i32
    %c0_i32_0 = arith.constant 0 : i32
    %c0_i32_1 = arith.constant 0 : i32
    return %c0_i32, %c0_i32_0 : i32, i32
  }
  func.func @transform_5(%arg0: i32) -> (i32, i32) {
    %c0_i32 = arith.constant 0 : i32
    %c0_i32_0 = arith.constant 0 : i32
    %c0_i32_1 = arith.constant 0 : i32
    return %c0_i32, %c0_i32_0 : i32, i32
  }
  func.func @transform_6(%arg0: i32) -> (i32, i32) {
    %c0_i32 = arith.constant 0 : i32
    %c0_i32_0 = arith.constant 0 : i32
    return %arg0, %c0_i32 : i32, i32
  }
}

module attributes {stable_mosaic.version = 11 : i64} {
  func.func @_node_embed_kernel(%arg0: memref<64x4xf32, #tpu.memory_space<vmem>>, %arg1: memref<4x128xf32, #tpu.memory_space<vmem>>, %arg2: memref<1x128xf32, #tpu.memory_space<vmem>>, %arg3: memref<64x128xf32, #tpu.memory_space<vmem>>) attributes {dimension_semantics = [], scalar_prefetch = 0 : i64, scratch_operands = 0 : i64, tpu.core_type = #tpu.core_type<tc>} {
    %c0 = arith.constant 0 : index
    %c0_0 = arith.constant 0 : index
    %0 = vector.load %arg0[%c0, %c0_0] : memref<64x4xf32, #tpu.memory_space<vmem>>, vector<64x4xf32>
    %c0_1 = arith.constant 0 : index
    %c0_2 = arith.constant 0 : index
    %1 = vector.load %arg1[%c0_1, %c0_2] : memref<4x128xf32, #tpu.memory_space<vmem>>, vector<4x128xf32>
    %cst = arith.constant dense<0.000000e+00> : vector<64x128xf32>
    %2 = tpu.matmul %0, %1, %cst {dimension_numbers = #tpu.dot_dimension_numbers<[1], [0], [0], [1], [0, 0, 1, 1], [], []>} : vector<64x4xf32>, vector<4x128xf32>, vector<64x128xf32> -> vector<64x128xf32>
    %c0_3 = arith.constant 0 : index
    %c0_4 = arith.constant 0 : index
    %3 = vector.load %arg2[%c0_3, %c0_4] : memref<1x128xf32, #tpu.memory_space<vmem>>, vector<1x128xf32>
    %4 = vector.broadcast %3 : vector<1x128xf32> to vector<64x128xf32>
    %5 = arith.addf %2, %4 : vector<64x128xf32>
    %c0_5 = arith.constant 0 : index
    %c0_6 = arith.constant 0 : index
    %6 = vector.load %arg3[%c0_5, %c0_6] : memref<64x128xf32, #tpu.memory_space<vmem>>, vector<64x128xf32>
    tpu.vector_store %arg3[%c0_5, %c0_6], %5 {strides = array<i32>} : memref<64x128xf32, #tpu.memory_space<vmem>>, vector<64x128xf32>,
    return
  }
}

module attributes {stable_mosaic.version = 11 : i64} {
  func.func @_gcl_layer_kernel(%arg0: i32, %arg1: memref<128x1xi32, #tpu.memory_space<vmem>>, %arg2: memref<128x1xi32, #tpu.memory_space<vmem>>, %arg3: memref<1x128xi32, #tpu.memory_space<vmem>>, %arg4: memref<64x128xf32, #tpu.memory_space<vmem>>, %arg5: memref<128x128xf32, #tpu.memory_space<vmem>>, %arg6: memref<384x128xbf16, #tpu.memory_space<vmem>>, %arg7: memref<1x128xf32, #tpu.memory_space<vmem>>, %arg8: memref<128x128xbf16, #tpu.memory_space<vmem>>, %arg9: memref<1x128xf32, #tpu.memory_space<vmem>>, %arg10: memref<256x128xbf16, #tpu.memory_space<vmem>>, %arg11: memref<1x128xf32, #tpu.memory_space<vmem>>, %arg12: memref<128x128xbf16, #tpu.memory_space<vmem>>, %arg13: memref<1x128xf32, #tpu.memory_space<vmem>>, %arg14: memref<64x128xf32, #tpu.memory_space<vmem>>, %arg15: memref<64x128xf32, #tpu.memory_space<vmem>>) attributes {dimension_semantics = [#tpu.dimension_semantics<arbitrary>], iteration_bounds = array<i64: 2>, scalar_prefetch = 0 : i64, scratch_operands = 1 : i64, tpu.core_type = #tpu.core_type<tc>, window_params = [{transform_indices = @transform_0, window_bounds = array<i64: 128, 1>}, {transform_indices = @transform_1, window_bounds = array<i64: 128, 1>}, {transform_indices = @transform_2, window_bounds = array<i64: 1, 128>}, {pipeline_mode = #tpu.pipeline_mode<synchronous>, transform_indices = @transform_3, window_bounds = array<i64: 64, 128>}, {transform_indices = @transform_4, window_bounds = array<i64: 128, 128>}, {pipeline_mode = #tpu.pipeline_mode<synchronous>, transform_indices = @transform_5, window_bounds = array<i64: 384, 128>}, {pipeline_mode = #tpu.pipeline_mode<synchronous>, transform_indices = @transform_6, window_bounds = array<i64: 1, 128>}, {pipeline_mode = #tpu.pipeline_mode<synchronous>, transform_indices = @transform_7, window_bounds = array<i64: 128, 128>}, {pipeline_mode = #tpu.pipeline_mode<synchronous>, transform_indices = @transform_8, window_bounds = array<i64: 1, 128>}, {pipeline_mode = #tpu.pipeline_mode<synchronous>, transform_indices = @transform_9, window_bounds = array<i64: 256, 128>}, {pipeline_mode = #tpu.pipeline_mode<synchronous>, transform_indices = @transform_10, window_bounds = array<i64: 1, 128>}, {pipeline_mode = #tpu.pipeline_mode<synchronous>, transform_indices = @transform_11, window_bounds = array<i64: 128, 128>}, {pipeline_mode = #tpu.pipeline_mode<synchronous>, transform_indices = @transform_12, window_bounds = array<i64: 1, 128>}, {pipeline_mode = #tpu.pipeline_mode<synchronous>, transform_indices = @transform_13, window_bounds = array<i64: 64, 128>}]} {
    %c0_i32 = arith.constant 0 : i32
    %0 = arith.cmpi eq, %arg0, %c0_i32 : i32
    %1 = arith.extui %0 : i1 to i32
    %c0_i32_0 = arith.constant 0 : i32
    %2 = arith.cmpi ne, %1, %c0_i32_0 : i32
    scf.if %2 {
      %cst_33 = arith.constant 0.000000e+00 : f32
      %58 = vector.broadcast %cst_33 : f32 to vector<64x128xf32>
      %c0_34 = arith.constant 0 : index
      %c0_35 = arith.constant 0 : index
      %59 = vector.load %arg15[%c0_34, %c0_35] : memref<64x128xf32, #tpu.memory_space<vmem>>, vector<64x128xf32>
      tpu.vector_store %arg15[%c0_34, %c0_35], %58 {strides = array<i32>} : memref<64x128xf32, #tpu.memory_space<vmem>>, vector<64x128xf32>,
    } else {
    }
    %c0 = arith.constant 0 : index
    %c0_1 = arith.constant 0 : index
    %3 = vector.load %arg4[%c0, %c0_1] : memref<64x128xf32, #tpu.memory_space<vmem>>, vector<64x128xf32>
    %4 = arith.truncf %3 : vector<64x128xf32> to vector<64x128xbf16>
    %5 = tpu.iota {dimensions = array<i32: 1>} : vector<128x64xi32>
    %c0_2 = arith.constant 0 : index
    %c0_3 = arith.constant 0 : index
    %6 = vector.load %arg1[%c0_2, %c0_3] : memref<128x1xi32, #tpu.memory_space<vmem>>, vector<128x1xi32>
    %7 = vector.broadcast %6 : vector<128x1xi32> to vector<128x64xi32>
    %8 = arith.cmpi eq, %5, %7 : vector<128x64xi32>
    %9 = arith.extui %8 : vector<128x64xi1> to vector<128x64xi32>
    %10 = arith.sitofp %9 : vector<128x64xi32> to vector<128x64xf32>
    %11 = arith.truncf %10 : vector<128x64xf32> to vector<128x64xbf16>
    %c0_4 = arith.constant 0 : index
    %c0_5 = arith.constant 0 : index
    %12 = vector.load %arg2[%c0_4, %c0_5] : memref<128x1xi32, #tpu.memory_space<vmem>>, vector<128x1xi32>
    %13 = vector.broadcast %12 : vector<128x1xi32> to vector<128x64xi32>
    %14 = arith.cmpi eq, %5, %13 : vector<128x64xi32>
    %15 = arith.extui %14 : vector<128x64xi1> to vector<128x64xi32>
    %16 = arith.sitofp %15 : vector<128x64xi32> to vector<128x64xf32>
    %17 = arith.truncf %16 : vector<128x64xf32> to vector<128x64xbf16>
    %cst = arith.constant dense<0.000000e+00> : vector<128x128xf32>
    %18 = tpu.matmul %11, %4, %cst {dimension_numbers = #tpu.dot_dimension_numbers<[1], [0], [0], [1], [0, 0, 1, 1], [], []>} : vector<128x64xbf16>, vector<64x128xbf16>, vector<128x128xf32> -> vector<128x128xf32>
    %cst_6 = arith.constant dense<0.000000e+00> : vector<128x128xf32>
    %19 = tpu.matmul %17, %4, %cst_6 {dimension_numbers = #tpu.dot_dimension_numbers<[1], [0], [0], [1], [0, 0, 1, 1], [], []>} : vector<128x64xbf16>, vector<64x128xbf16>, vector<128x128xf32> -> vector<128x128xf32>
    %c0_7 = arith.constant 0 : index
    %c0_8 = arith.constant 0 : index
    %20 = vector.load %arg6[%c0_7, %c0_8] : memref<384x128xbf16, #tpu.memory_space<vmem>>, vector<128x128xbf16>
    %c128 = arith.constant 128 : index
    %c0_9 = arith.constant 0 : index
    %21 = vector.load %arg6[%c128, %c0_9] : memref<384x128xbf16, #tpu.memory_space<vmem>>, vector<128x128xbf16>
    %c256 = arith.constant 256 : index
    %c0_10 = arith.constant 0 : index
    %22 = vector.load %arg6[%c256, %c0_10] : memref<384x128xbf16, #tpu.memory_space<vmem>>, vector<128x128xbf16>
    %c0_11 = arith.constant 0 : index
    %c0_12 = arith.constant 0 : index
    %23 = vector.load %arg5[%c0_11, %c0_12] : memref<128x128xf32, #tpu.memory_space<vmem>>, vector<128x128xf32>
    %24 = arith.truncf %23 : vector<128x128xf32> to vector<128x128xbf16>
    %25 = arith.truncf %18 : vector<128x128xf32> to vector<128x128xbf16>
    %cst_13 = arith.constant dense<0.000000e+00> : vector<128x128xf32>
    %26 = tpu.matmul %25, %20, %cst_13 {dimension_numbers = #tpu.dot_dimension_numbers<[1], [0], [0], [1], [0, 0, 1, 1], [], []>} : vector<128x128xbf16>, vector<128x128xbf16>, vector<128x128xf32> -> vector<128x128xf32>
    %27 = arith.truncf %19 : vector<128x128xf32> to vector<128x128xbf16>
    %cst_14 = arith.constant dense<0.000000e+00> : vector<128x128xf32>
    %28 = tpu.matmul %27, %21, %cst_14 {dimension_numbers = #tpu.dot_dimension_numbers<[1], [0], [0], [1], [0, 0, 1, 1], [], []>} : vector<128x128xbf16>, vector<128x128xbf16>, vector<128x128xf32> -> vector<128x128xf32>
    %29 = arith.addf %26, %28 : vector<128x128xf32>
    %cst_15 = arith.constant dense<0.000000e+00> : vector<128x128xf32>
    %30 = tpu.matmul %24, %22, %cst_15 {dimension_numbers = #tpu.dot_dimension_numbers<[1], [0], [0], [1], [0, 0, 1, 1], [], []>} : vector<128x128xbf16>, vector<128x128xbf16>, vector<128x128xf32> -> vector<128x128xf32>
    %31 = arith.addf %29, %30 : vector<128x128xf32>
    %c0_16 = arith.constant 0 : index
    %c0_17 = arith.constant 0 : index
    %32 = vector.load %arg7[%c0_16, %c0_17] : memref<1x128xf32, #tpu.memory_space<vmem>>, vector<1x128xf32>
    %33 = vector.broadcast %32 : vector<1x128xf32> to vector<128x128xf32>
    %34 = arith.addf %31, %33 : vector<128x128xf32>
    %cst_18 = arith.constant 0.000000e+00 : f32
    %35 = vector.broadcast %cst_18 : f32 to vector<128x128xf32>
    %36 = arith.maximumf %34, %35 : vector<128x128xf32>
    %37 = arith.truncf %36 : vector<128x128xf32> to vector<128x128xbf16>
    %c0_19 = arith.constant 0 : index
    %c0_20 = arith.constant 0 : index
    %38 = vector.load %arg8[%c0_19, %c0_20] : memref<128x128xbf16, #tpu.memory_space<vmem>>, vector<128x128xbf16>
    %cst_21 = arith.constant dense<0.000000e+00> : vector<128x128xf32>
    %39 = tpu.matmul %37, %38, %cst_21 {dimension_numbers = #tpu.dot_dimension_numbers<[1], [0], [0], [1], [0, 0, 1, 1], [], []>} : vector<128x128xbf16>, vector<128x128xbf16>, vector<128x128xf32> -> vector<128x128xf32>
    %c0_22 = arith.constant 0 : index
    %c0_23 = arith.constant 0 : index
    %40 = vector.load %arg9[%c0_22, %c0_23] : memref<1x128xf32, #tpu.memory_space<vmem>>, vector<1x128xf32>
    %41 = vector.broadcast %40 : vector<1x128xf32> to vector<128x128xf32>
    %42 = arith.addf %39, %41 : vector<128x128xf32>
    %cst_24 = arith.constant 0.000000e+00 : f32
    %43 = vector.broadcast %cst_24 : f32 to vector<128x128xf32>
    %44 = arith.maximumf %42, %43 : vector<128x128xf32>
    %45 = tpu.iota {dimensions = array<i32: 0>} : vector<64x128xi32>
    %c0_25 = arith.constant 0 : index
    %c0_26 = arith.constant 0 : index
    %46 = vector.load %arg3[%c0_25, %c0_26] : memref<1x128xi32, #tpu.memory_space<vmem>>, vector<1x128xi32>
    %47 = vector.broadcast %46 : vector<1x128xi32> to vector<64x128xi32>
    %48 = arith.cmpi eq, %45, %47 : vector<64x128xi32>
    %49 = arith.extui %48 : vector<64x128xi1> to vector<64x128xi32>
    %50 = arith.sitofp %49 : vector<64x128xi32> to vector<64x128xf32>
    %c0_27 = arith.constant 0 : index
    %c0_28 = arith.constant 0 : index
    %51 = vector.load %arg15[%c0_27, %c0_28] : memref<64x128xf32, #tpu.memory_space<vmem>>, vector<64x128xf32>
    %cst_29 = arith.constant dense<0.000000e+00> : vector<64x128xf32>
    %52 = tpu.matmul %50, %44, %cst_29 {dimension_numbers = #tpu.dot_dimension_numbers<[1], [0], [0], [1], [0, 0, 1, 1], [], []>} : vector<64x128xf32>, vector<128x128xf32>, vector<64x128xf32> -> vector<64x128xf32>
    %53 = arith.addf %51, %52 : vector<64x128xf32>
    %c0_30 = arith.constant 0 : index
    %c0_31 = arith.constant 0 : index
    %54 = vector.load %arg15[%c0_30, %c0_31] : memref<64x128xf32, #tpu.memory_space<vmem>>, vector<64x128xf32>
    tpu.vector_store %arg15[%c0_30, %c0_31], %53 {strides = array<i32>} : memref<64x128xf32, #tpu.memory_space<vmem>>, vector<64x128xf32>,
    %c1_i32 = arith.constant 1 : i32
    %55 = arith.cmpi eq, %arg0, %c1_i32 : i32
    %56 = arith.extui %55 : i1 to i32
    %c0_i32_32 = arith.constant 0 : i32
    %57 = arith.cmpi ne, %56, %c0_i32_32 : i32
    scf.if %57 {
      %c0_33 = arith.constant 0 : index
      %c0_34 = arith.constant 0 : index
      %58 = vector.load %arg15[%c0_33, %c0_34] : memref<64x128xf32, #tpu.memory_space<vmem>>, vector<64x128xf32>
      %c0_35 = arith.constant 0 : index
      %c0_36 = arith.constant 0 : index
      %59 = vector.load %arg10[%c0_35, %c0_36] : memref<256x128xbf16, #tpu.memory_space<vmem>>, vector<128x128xbf16>
      %c128_37 = arith.constant 128 : index
      %c0_38 = arith.constant 0 : index
      %60 = vector.load %arg10[%c128_37, %c0_38] : memref<256x128xbf16, #tpu.memory_space<vmem>>, vector<128x128xbf16>
      %cst_39 = arith.constant dense<0.000000e+00> : vector<64x128xf32>
      %61 = tpu.matmul %4, %59, %cst_39 {dimension_numbers = #tpu.dot_dimension_numbers<[1], [0], [0], [1], [0, 0, 1, 1], [], []>} : vector<64x128xbf16>, vector<128x128xbf16>, vector<64x128xf32> -> vector<64x128xf32>
      %62 = arith.truncf %58 : vector<64x128xf32> to vector<64x128xbf16>
      %cst_40 = arith.constant dense<0.000000e+00> : vector<64x128xf32>
      %63 = tpu.matmul %62, %60, %cst_40 {dimension_numbers = #tpu.dot_dimension_numbers<[1], [0], [0], [1], [0, 0, 1, 1], [], []>} : vector<64x128xbf16>, vector<128x128xbf16>, vector<64x128xf32> -> vector<64x128xf32>
      %64 = arith.addf %61, %63 : vector<64x128xf32>
      %c0_41 = arith.constant 0 : index
      %c0_42 = arith.constant 0 : index
      %65 = vector.load %arg11[%c0_41, %c0_42] : memref<1x128xf32, #tpu.memory_space<vmem>>, vector<1x128xf32>
      %66 = vector.broadcast %65 : vector<1x128xf32> to vector<64x128xf32>
      %67 = arith.addf %64, %66 : vector<64x128xf32>
      %cst_43 = arith.constant 0.000000e+00 : f32
      %68 = vector.broadcast %cst_43 : f32 to vector<64x128xf32>
      %69 = arith.maximumf %67, %68 : vector<64x128xf32>
      %70 = arith.truncf %69 : vector<64x128xf32> to vector<64x128xbf16>
      %c0_44 = arith.constant 0 : index
      %c0_45 = arith.constant 0 : index
      %71 = vector.load %arg12[%c0_44, %c0_45] : memref<128x128xbf16, #tpu.memory_space<vmem>>, vector<128x128xbf16>
      %cst_46 = arith.constant dense<0.000000e+00> : vector<64x128xf32>
      %72 = tpu.matmul %70, %71, %cst_46 {dimension_numbers = #tpu.dot_dimension_numbers<[1], [0], [0], [1], [0, 0, 1, 1], [], []>} : vector<64x128xbf16>, vector<128x128xbf16>, vector<64x128xf32> -> vector<64x128xf32>
      %c0_47 = arith.constant 0 : index
      %c0_48 = arith.constant 0 : index
      %73 = vector.load %arg13[%c0_47, %c0_48] : memref<1x128xf32, #tpu.memory_space<vmem>>, vector<1x128xf32>
      %74 = vector.broadcast %73 : vector<1x128xf32> to vector<64x128xf32>
      %75 = arith.addf %72, %74 : vector<64x128xf32>
      %76 = arith.addf %3, %75 : vector<64x128xf32>
      %c0_49 = arith.constant 0 : index
      %c0_50 = arith.constant 0 : index
      %77 = vector.load %arg14[%c0_49, %c0_50] : memref<64x128xf32, #tpu.memory_space<vmem>>, vector<64x128xf32>
      tpu.vector_store %arg14[%c0_49, %c0_50], %76 {strides = array<i32>} : memref<64x128xf32, #tpu.memory_space<vmem>>, vector<64x128xf32>,
    } else {
    }
    return
  }
  func.func @transform_0(%arg0: i32) -> (i32, i32) {
    %c0_i32 = arith.constant 0 : i32
    %c0_i32_0 = arith.constant 0 : i32
    return %arg0, %c0_i32 : i32, i32
  }
  func.func @transform_1(%arg0: i32) -> (i32, i32) {
    %c0_i32 = arith.constant 0 : i32
    %c0_i32_0 = arith.constant 0 : i32
    return %arg0, %c0_i32 : i32, i32
  }
  func.func @transform_2(%arg0: i32) -> (i32, i32) {
    %c0_i32 = arith.constant 0 : i32
    %c0_i32_0 = arith.constant 0 : i32
    return %c0_i32, %arg0 : i32, i32
  }
  func.func @transform_3(%arg0: i32) -> (i32, i32) {
    %c0_i32 = arith.constant 0 : i32
    %c0_i32_0 = arith.constant 0 : i32
    %c0_i32_1 = arith.constant 0 : i32
    return %c0_i32, %c0_i32_0 : i32, i32
  }
  func.func @transform_4(%arg0: i32) -> (i32, i32) {
    %c0_i32 = arith.constant 0 : i32
    %c0_i32_0 = arith.constant 0 : i32
    return %arg0, %c0_i32 : i32, i32
  }
  func.func @transform_5(%arg0: i32) -> (i32, i32) {
    %c0_i32 = arith.constant 0 : i32
    %c0_i32_0 = arith.constant 0 : i32
    %c0_i32_1 = arith.constant 0 : i32
    return %c0_i32, %c0_i32_0 : i32, i32
  }
  func.func @transform_6(%arg0: i32) -> (i32, i32) {
    %c0_i32 = arith.constant 0 : i32
    %c0_i32_0 = arith.constant 0 : i32
    %c0_i32_1 = arith.constant 0 : i32
    return %c0_i32, %c0_i32_0 : i32, i32
  }
  func.func @transform_7(%arg0: i32) -> (i32, i32) {
    %c0_i32 = arith.constant 0 : i32
    %c0_i32_0 = arith.constant 0 : i32
    %c0_i32_1 = arith.constant 0 : i32
    return %c0_i32, %c0_i32_0 : i32, i32
  }
  func.func @transform_8(%arg0: i32) -> (i32, i32) {
    %c0_i32 = arith.constant 0 : i32
    %c0_i32_0 = arith.constant 0 : i32
    %c0_i32_1 = arith.constant 0 : i32
    return %c0_i32, %c0_i32_0 : i32, i32
  }
  func.func @transform_9(%arg0: i32) -> (i32, i32) {
    %c0_i32 = arith.constant 0 : i32
    %c0_i32_0 = arith.constant 0 : i32
    %c0_i32_1 = arith.constant 0 : i32
    return %c0_i32, %c0_i32_0 : i32, i32
  }
  func.func @transform_10(%arg0: i32) -> (i32, i32) {
    %c0_i32 = arith.constant 0 : i32
    %c0_i32_0 = arith.constant 0 : i32
    %c0_i32_1 = arith.constant 0 : i32
    return %c0_i32, %c0_i32_0 : i32, i32
  }
  func.func @transform_11(%arg0: i32) -> (i32, i32) {
    %c0_i32 = arith.constant 0 : i32
    %c0_i32_0 = arith.constant 0 : i32
    %c0_i32_1 = arith.constant 0 : i32
    return %c0_i32, %c0_i32_0 : i32, i32
  }
  func.func @transform_12(%arg0: i32) -> (i32, i32) {
    %c0_i32 = arith.constant 0 : i32
    %c0_i32_0 = arith.constant 0 : i32
    %c0_i32_1 = arith.constant 0 : i32
    return %c0_i32, %c0_i32_0 : i32, i32
  }
  func.func @transform_13(%arg0: i32) -> (i32, i32) {
    %c0_i32 = arith.constant 0 : i32
    %c0_i32_0 = arith.constant 0 : i32
    %c0_i32_1 = arith.constant 0 : i32
    return %c0_i32, %c0_i32_0 : i32, i32
  }
}

module attributes {stable_mosaic.version = 11 : i64} {
  func.func @_grad_geom_kernel(%arg0: i32, %arg1: memref<128x1xi32, #tpu.memory_space<vmem>>, %arg2: memref<128x1xi32, #tpu.memory_space<vmem>>, %arg3: memref<1x128xi32, #tpu.memory_space<vmem>>, %arg4: memref<64x128xf32, #tpu.memory_space<vmem>>, %arg5: memref<128x128xf32, #tpu.memory_space<vmem>>, %arg6: memref<64x3xf32, #tpu.memory_space<vmem>>, %arg7: memref<128x1xf32, #tpu.memory_space<vmem>>, %arg8: memref<384x128xbf16, #tpu.memory_space<vmem>>, %arg9: memref<1x128xf32, #tpu.memory_space<vmem>>, %arg10: memref<128x64xbf16, #tpu.memory_space<vmem>>, %arg11: memref<1x64xf32, #tpu.memory_space<vmem>>, %arg12: memref<1x64xf32, #tpu.memory_space<vmem>>, %arg13: memref<1x1xf32, #tpu.memory_space<vmem>>, %arg14: memref<64x3xf32, #tpu.memory_space<vmem>>, %arg15: memref<64x3xf32, #tpu.memory_space<vmem>>) attributes {dimension_semantics = [#tpu.dimension_semantics<arbitrary>], iteration_bounds = array<i64: 2>, scalar_prefetch = 0 : i64, scratch_operands = 1 : i64, tpu.core_type = #tpu.core_type<tc>, window_params = [{transform_indices = @transform_0, window_bounds = array<i64: 128, 1>}, {transform_indices = @transform_1, window_bounds = array<i64: 128, 1>}, {transform_indices = @transform_2, window_bounds = array<i64: 1, 128>}, {pipeline_mode = #tpu.pipeline_mode<synchronous>, transform_indices = @transform_3, window_bounds = array<i64: 64, 128>}, {transform_indices = @transform_4, window_bounds = array<i64: 128, 128>}, {pipeline_mode = #tpu.pipeline_mode<synchronous>, transform_indices = @transform_5, window_bounds = array<i64: 64, 3>}, {transform_indices = @transform_6, window_bounds = array<i64: 128, 1>}, {pipeline_mode = #tpu.pipeline_mode<synchronous>, transform_indices = @transform_7, window_bounds = array<i64: 384, 128>}, {pipeline_mode = #tpu.pipeline_mode<synchronous>, transform_indices = @transform_8, window_bounds = array<i64: 1, 128>}, {pipeline_mode = #tpu.pipeline_mode<synchronous>, transform_indices = @transform_9, window_bounds = array<i64: 128, 64>}, {pipeline_mode = #tpu.pipeline_mode<synchronous>, transform_indices = @transform_10, window_bounds = array<i64: 1, 64>}, {pipeline_mode = #tpu.pipeline_mode<synchronous>, transform_indices = @transform_11, window_bounds = array<i64: 1, 64>}, {pipeline_mode = #tpu.pipeline_mode<synchronous>, transform_indices = @transform_12, window_bounds = array<i64: 1, 1>}, {pipeline_mode = #tpu.pipeline_mode<synchronous>, transform_indices = @transform_13, window_bounds = array<i64: 64, 3>}]} {
    %c0_i32 = arith.constant 0 : i32
    %0 = arith.cmpi eq, %arg0, %c0_i32 : i32
    %1 = arith.extui %0 : i1 to i32
    %c0_i32_0 = arith.constant 0 : i32
    %2 = arith.cmpi ne, %1, %c0_i32_0 : i32
    scf.if %2 {
      %cst_45 = arith.constant 0.000000e+00 : f32
      %78 = vector.broadcast %cst_45 : f32 to vector<64x3xf32>
      %c0_46 = arith.constant 0 : index
      %c0_47 = arith.constant 0 : index
      %79 = vector.load %arg15[%c0_46, %c0_47] : memref<64x3xf32, #tpu.memory_space<vmem>>, vector<64x3xf32>
      tpu.vector_store %arg15[%c0_46, %c0_47], %78 {strides = array<i32>} : memref<64x3xf32, #tpu.memory_space<vmem>>, vector<64x3xf32>,
    } else {
    }
    %3 = tpu.iota {dimensions = array<i32: 1>} : vector<128x64xi32>
    %c0 = arith.constant 0 : index
    %c0_1 = arith.constant 0 : index
    %4 = vector.load %arg1[%c0, %c0_1] : memref<128x1xi32, #tpu.memory_space<vmem>>, vector<128x1xi32>
    %5 = vector.broadcast %4 : vector<128x1xi32> to vector<128x64xi32>
    %6 = arith.cmpi eq, %3, %5 : vector<128x64xi32>
    %7 = arith.extui %6 : vector<128x64xi1> to vector<128x64xi32>
    %8 = arith.sitofp %7 : vector<128x64xi32> to vector<128x64xf32>
    %c0_2 = arith.constant 0 : index
    %c0_3 = arith.constant 0 : index
    %9 = vector.load %arg2[%c0_2, %c0_3] : memref<128x1xi32, #tpu.memory_space<vmem>>, vector<128x1xi32>
    %10 = vector.broadcast %9 : vector<128x1xi32> to vector<128x64xi32>
    %11 = arith.cmpi eq, %3, %10 : vector<128x64xi32>
    %12 = arith.extui %11 : vector<128x64xi1> to vector<128x64xi32>
    %13 = arith.sitofp %12 : vector<128x64xi32> to vector<128x64xf32>
    %c0_4 = arith.constant 0 : index
    %c0_5 = arith.constant 0 : index
    %14 = vector.load %arg4[%c0_4, %c0_5] : memref<64x128xf32, #tpu.memory_space<vmem>>, vector<64x128xf32>
    %15 = arith.truncf %14 : vector<64x128xf32> to vector<64x128xbf16>
    %16 = arith.truncf %8 : vector<128x64xf32> to vector<128x64xbf16>
    %cst = arith.constant dense<0.000000e+00> : vector<128x128xf32>
    %17 = tpu.matmul %16, %15, %cst {dimension_numbers = #tpu.dot_dimension_numbers<[1], [0], [0], [1], [0, 0, 1, 1], [], []>} : vector<128x64xbf16>, vector<64x128xbf16>, vector<128x128xf32> -> vector<128x128xf32>
    %18 = arith.truncf %13 : vector<128x64xf32> to vector<128x64xbf16>
    %cst_6 = arith.constant dense<0.000000e+00> : vector<128x128xf32>
    %19 = tpu.matmul %18, %15, %cst_6 {dimension_numbers = #tpu.dot_dimension_numbers<[1], [0], [0], [1], [0, 0, 1, 1], [], []>} : vector<128x64xbf16>, vector<64x128xbf16>, vector<128x128xf32> -> vector<128x128xf32>
    %c0_7 = arith.constant 0 : index
    %c0_8 = arith.constant 0 : index
    %20 = vector.load %arg8[%c0_7, %c0_8] : memref<384x128xbf16, #tpu.memory_space<vmem>>, vector<128x128xbf16>
    %c128 = arith.constant 128 : index
    %c0_9 = arith.constant 0 : index
    %21 = vector.load %arg8[%c128, %c0_9] : memref<384x128xbf16, #tpu.memory_space<vmem>>, vector<128x128xbf16>
    %c256 = arith.constant 256 : index
    %c0_10 = arith.constant 0 : index
    %22 = vector.load %arg8[%c256, %c0_10] : memref<384x128xbf16, #tpu.memory_space<vmem>>, vector<128x128xbf16>
    %c0_11 = arith.constant 0 : index
    %c0_12 = arith.constant 0 : index
    %23 = vector.load %arg5[%c0_11, %c0_12] : memref<128x128xf32, #tpu.memory_space<vmem>>, vector<128x128xf32>
    %24 = arith.truncf %23 : vector<128x128xf32> to vector<128x128xbf16>
    %25 = arith.truncf %17 : vector<128x128xf32> to vector<128x128xbf16>
    %cst_13 = arith.constant dense<0.000000e+00> : vector<128x128xf32>
    %26 = tpu.matmul %25, %20, %cst_13 {dimension_numbers = #tpu.dot_dimension_numbers<[1], [0], [0], [1], [0, 0, 1, 1], [], []>} : vector<128x128xbf16>, vector<128x128xbf16>, vector<128x128xf32> -> vector<128x128xf32>
    %27 = arith.truncf %19 : vector<128x128xf32> to vector<128x128xbf16>
    %cst_14 = arith.constant dense<0.000000e+00> : vector<128x128xf32>
    %28 = tpu.matmul %27, %21, %cst_14 {dimension_numbers = #tpu.dot_dimension_numbers<[1], [0], [0], [1], [0, 0, 1, 1], [], []>} : vector<128x128xbf16>, vector<128x128xbf16>, vector<128x128xf32> -> vector<128x128xf32>
    %29 = arith.addf %26, %28 : vector<128x128xf32>
    %cst_15 = arith.constant dense<0.000000e+00> : vector<128x128xf32>
    %30 = tpu.matmul %24, %22, %cst_15 {dimension_numbers = #tpu.dot_dimension_numbers<[1], [0], [0], [1], [0, 0, 1, 1], [], []>} : vector<128x128xbf16>, vector<128x128xbf16>, vector<128x128xf32> -> vector<128x128xf32>
    %31 = arith.addf %29, %30 : vector<128x128xf32>
    %c0_16 = arith.constant 0 : index
    %c0_17 = arith.constant 0 : index
    %32 = vector.load %arg9[%c0_16, %c0_17] : memref<1x128xf32, #tpu.memory_space<vmem>>, vector<1x128xf32>
    %33 = vector.broadcast %32 : vector<1x128xf32> to vector<128x128xf32>
    %34 = arith.addf %31, %33 : vector<128x128xf32>
    %cst_18 = arith.constant 0.000000e+00 : f32
    %35 = vector.broadcast %cst_18 : f32 to vector<128x128xf32>
    %36 = arith.maximumf %34, %35 : vector<128x128xf32>
    %37 = arith.truncf %36 : vector<128x128xf32> to vector<128x128xbf16>
    %c0_19 = arith.constant 0 : index
    %c0_20 = arith.constant 0 : index
    %38 = vector.load %arg10[%c0_19, %c0_20] : memref<128x64xbf16, #tpu.memory_space<vmem>>, vector<128x64xbf16>
    %cst_21 = arith.constant dense<0.000000e+00> : vector<128x64xf32>
    %39 = tpu.matmul %37, %38, %cst_21 {dimension_numbers = #tpu.dot_dimension_numbers<[1], [0], [0], [1], [0, 0, 1, 1], [], []>} : vector<128x128xbf16>, vector<128x64xbf16>, vector<128x64xf32> -> vector<128x64xf32>
    %c0_22 = arith.constant 0 : index
    %c0_23 = arith.constant 0 : index
    %40 = vector.load %arg11[%c0_22, %c0_23] : memref<1x64xf32, #tpu.memory_space<vmem>>, vector<1x64xf32>
    %41 = vector.broadcast %40 : vector<1x64xf32> to vector<128x64xf32>
    %42 = arith.addf %39, %41 : vector<128x64xf32>
    %cst_24 = arith.constant 0.000000e+00 : f32
    %43 = vector.broadcast %cst_24 : f32 to vector<128x64xf32>
    %44 = arith.maximumf %42, %43 : vector<128x64xf32>
    %c0_25 = arith.constant 0 : index
    %c0_26 = arith.constant 0 : index
    %45 = vector.load %arg12[%c0_25, %c0_26] : memref<1x64xf32, #tpu.memory_space<vmem>>, vector<1x64xf32>
    %46 = vector.broadcast %45 : vector<1x64xf32> to vector<128x64xf32>
    %47 = arith.mulf %44, %46 : vector<128x64xf32>
    %cst_27 = arith.constant dense<0.000000e+00> : vector<128xf32>
    %48 = vector.multi_reduction <add>, %47, %cst_27 [1] : vector<128x64xf32> to vector<128xf32>
    %49 = vector.shape_cast %48 : vector<128xf32> to vector<128x1xf32>
    %c0_28 = arith.constant 0 : index
    %c0_29 = arith.constant 0 : index
    %50 = vector.load %arg13[%c0_28, %c0_29] : memref<1x1xf32, #tpu.memory_space<vmem>>, vector<1x1xf32>
    %51 = vector.broadcast %50 : vector<1x1xf32> to vector<128x1xf32>
    %52 = arith.addf %49, %51 : vector<128x1xf32>
    %c0_30 = arith.constant 0 : index
    %c0_31 = arith.constant 0 : index
    %53 = vector.load %arg6[%c0_30, %c0_31] : memref<64x3xf32, #tpu.memory_space<vmem>>, vector<64x3xf32>
    %cst_32 = arith.constant dense<0.000000e+00> : vector<128x3xf32>
    %54 = tpu.matmul %8, %53, %cst_32 {dimension_numbers = #tpu.dot_dimension_numbers<[1], [0], [0], [1], [0, 0, 1, 1], [], []>} : vector<128x64xf32>, vector<64x3xf32>, vector<128x3xf32> -> vector<128x3xf32>
    %cst_33 = arith.constant dense<0.000000e+00> : vector<128x3xf32>
    %55 = tpu.matmul %13, %53, %cst_33 {dimension_numbers = #tpu.dot_dimension_numbers<[1], [0], [0], [1], [0, 0, 1, 1], [], []>} : vector<128x64xf32>, vector<64x3xf32>, vector<128x3xf32> -> vector<128x3xf32>
    %c0_34 = arith.constant 0 : index
    %c0_35 = arith.constant 0 : index
    %56 = vector.load %arg7[%c0_34, %c0_35] : memref<128x1xf32, #tpu.memory_space<vmem>>, vector<128x1xf32>
    %cst_36 = arith.constant 9.99999996E-13 : f32
    %57 = vector.broadcast %cst_36 : f32 to vector<128x1xf32>
    %58 = arith.maximumf %56, %57 : vector<128x1xf32>
    %59 = tpu.reciprocal %58 {approx = true} : vector<128x1xf32> -> vector<128x1xf32>
    %60 = arith.subf %54, %55 : vector<128x3xf32>
    %61 = vector.broadcast %59 : vector<128x1xf32> to vector<128x3xf32>
    %62 = arith.mulf %60, %61 : vector<128x3xf32>
    %63 = vector.broadcast %52 : vector<128x1xf32> to vector<128x3xf32>
    %64 = arith.mulf %62, %63 : vector<128x3xf32>
    %65 = tpu.iota {dimensions = array<i32: 0>} : vector<64x128xi32>
    %c0_37 = arith.constant 0 : index
    %c0_38 = arith.constant 0 : index
    %66 = vector.load %arg3[%c0_37, %c0_38] : memref<1x128xi32, #tpu.memory_space<vmem>>, vector<1x128xi32>
    %67 = vector.broadcast %66 : vector<1x128xi32> to vector<64x128xi32>
    %68 = arith.cmpi eq, %65, %67 : vector<64x128xi32>
    %69 = arith.extui %68 : vector<64x128xi1> to vector<64x128xi32>
    %70 = arith.sitofp %69 : vector<64x128xi32> to vector<64x128xf32>
    %c0_39 = arith.constant 0 : index
    %c0_40 = arith.constant 0 : index
    %71 = vector.load %arg15[%c0_39, %c0_40] : memref<64x3xf32, #tpu.memory_space<vmem>>, vector<64x3xf32>
    %cst_41 = arith.constant dense<0.000000e+00> : vector<64x3xf32>
    %72 = tpu.matmul %70, %64, %cst_41 {dimension_numbers = #tpu.dot_dimension_numbers<[1], [0], [0], [1], [0, 0, 1, 1], [], []>} : vector<64x128xf32>, vector<128x3xf32>, vector<64x3xf32> -> vector<64x3xf32>
    %73 = arith.addf %71, %72 : vector<64x3xf32>
    %c0_42 = arith.constant 0 : index
    %c0_43 = arith.constant 0 : index
    %74 = vector.load %arg15[%c0_42, %c0_43] : memref<64x3xf32, #tpu.memory_space<vmem>>, vector<64x3xf32>
    tpu.vector_store %arg15[%c0_42, %c0_43], %73 {strides = array<i32>} : memref<64x3xf32, #tpu.memory_space<vmem>>, vector<64x3xf32>,
    %c1_i32 = arith.constant 1 : i32
    %75 = arith.cmpi eq, %arg0, %c1_i32 : i32
    %76 = arith.extui %75 : i1 to i32
    %c0_i32_44 = arith.constant 0 : i32
    %77 = arith.cmpi ne, %76, %c0_i32_44 : i32
    scf.if %77 {
      %c0_45 = arith.constant 0 : index
      %c0_46 = arith.constant 0 : index
      %78 = vector.load %arg6[%c0_45, %c0_46] : memref<64x3xf32, #tpu.memory_space<vmem>>, vector<64x3xf32>
      %c0_47 = arith.constant 0 : index
      %c0_48 = arith.constant 0 : index
      %79 = vector.load %arg15[%c0_47, %c0_48] : memref<64x3xf32, #tpu.memory_space<vmem>>, vector<64x3xf32>
      %cst_49 = arith.constant 0.00999999977 : f32
      %80 = vector.broadcast %cst_49 : f32 to vector<64x3xf32>
      %81 = arith.mulf %79, %80 : vector<64x3xf32>
      %82 = arith.addf %78, %81 : vector<64x3xf32>
      %c0_50 = arith.constant 0 : index
      %c0_51 = arith.constant 0 : index
      %83 = vector.load %arg14[%c0_50, %c0_51] : memref<64x3xf32, #tpu.memory_space<vmem>>, vector<64x3xf32>
      tpu.vector_store %arg14[%c0_50, %c0_51], %82 {strides = array<i32>} : memref<64x3xf32, #tpu.memory_space<vmem>>, vector<64x3xf32>,
    } else {
    }
    return
  }
  func.func @transform_0(%arg0: i32) -> (i32, i32) {
    %c0_i32 = arith.constant 0 : i32
    %c0_i32_0 = arith.constant 0 : i32
    return %arg0, %c0_i32 : i32, i32
  }
  func.func @transform_1(%arg0: i32) -> (i32, i32) {
    %c0_i32 = arith.constant 0 : i32
    %c0_i32_0 = arith.constant 0 : i32
    return %arg0, %c0_i32 : i32, i32
  }
  func.func @transform_2(%arg0: i32) -> (i32, i32) {
    %c0_i32 = arith.constant 0 : i32
    %c0_i32_0 = arith.constant 0 : i32
    return %c0_i32, %arg0 : i32, i32
  }
  func.func @transform_3(%arg0: i32) -> (i32, i32) {
    %c0_i32 = arith.constant 0 : i32
    %c0_i32_0 = arith.constant 0 : i32
    %c0_i32_1 = arith.constant 0 : i32
    return %c0_i32, %c0_i32_0 : i32, i32
  }
  func.func @transform_4(%arg0: i32) -> (i32, i32) {
    %c0_i32 = arith.constant 0 : i32
    %c0_i32_0 = arith.constant 0 : i32
    return %arg0, %c0_i32 : i32, i32
  }
  func.func @transform_5(%arg0: i32) -> (i32, i32) {
    %c0_i32 = arith.constant 0 : i32
    %c0_i32_0 = arith.constant 0 : i32
    %c0_i32_1 = arith.constant 0 : i32
    return %c0_i32, %c0_i32_0 : i32, i32
  }
  func.func @transform_6(%arg0: i32) -> (i32, i32) {
    %c0_i32 = arith.constant 0 : i32
    %c0_i32_0 = arith.constant 0 : i32
    return %arg0, %c0_i32 : i32, i32
  }
  func.func @transform_7(%arg0: i32) -> (i32, i32) {
    %c0_i32 = arith.constant 0 : i32
    %c0_i32_0 = arith.constant 0 : i32
    %c0_i32_1 = arith.constant 0 : i32
    return %c0_i32, %c0_i32_0 : i32, i32
  }
  func.func @transform_8(%arg0: i32) -> (i32, i32) {
    %c0_i32 = arith.constant 0 : i32
    %c0_i32_0 = arith.constant 0 : i32
    %c0_i32_1 = arith.constant 0 : i32
    return %c0_i32, %c0_i32_0 : i32, i32
  }
  func.func @transform_9(%arg0: i32) -> (i32, i32) {
    %c0_i32 = arith.constant 0 : i32
    %c0_i32_0 = arith.constant 0 : i32
    %c0_i32_1 = arith.constant 0 : i32
    return %c0_i32, %c0_i32_0 : i32, i32
  }
  func.func @transform_10(%arg0: i32) -> (i32, i32) {
    %c0_i32 = arith.constant 0 : i32
    %c0_i32_0 = arith.constant 0 : i32
    %c0_i32_1 = arith.constant 0 : i32
    return %c0_i32, %c0_i32_0 : i32, i32
  }
  func.func @transform_11(%arg0: i32) -> (i32, i32) {
    %c0_i32 = arith.constant 0 : i32
    %c0_i32_0 = arith.constant 0 : i32
    %c0_i32_1 = arith.constant 0 : i32
    return %c0_i32, %c0_i32_0 : i32, i32
  }
  func.func @transform_12(%arg0: i32) -> (i32, i32) {
    %c0_i32 = arith.constant 0 : i32
    %c0_i32_0 = arith.constant 0 : i32
    %c0_i32_1 = arith.constant 0 : i32
    return %c0_i32, %c0_i32_0 : i32, i32
  }
  func.func @transform_13(%arg0: i32) -> (i32, i32) {
    %c0_i32 = arith.constant 0 : i32
    %c0_i32_0 = arith.constant 0 : i32
    %c0_i32_1 = arith.constant 0 : i32
    return %c0_i32, %c0_i32_0 : i32, i32
  }
}

</mosaic_0001>

<bundles_post_ra>
// kernel: edm_block_forward.6
= control target key start
LH: loop header
LB: loop body
LE: loop exit
PB: predicated region body
PF: predicated region fallthrough
CT: control target
= control target key end

     0   :  { %vm52_vm0 = vcmask 1043456   ;;  %vm27_vm1 = vcmask 31744   ;;  %s204_s1 = inlined_call_operand.vmem [shape: f32[4,128], index: 1, kind: input, shape index: {}]   ;;  %s205_s0 = inlined_call_operand.vmem [shape: f32[64,4], index: 0, kind: input, shape index: {}]   ;;  %s206_s2 = inlined_call_operand.vmem [shape: f32[1,128], index: 2, kind: input, shape index: {}]   ;;  %s207_s3 = inlined_call_operand.vmem [shape: f32[64,128], index: 3, kind: output, shape index: {}]  }
   0x1   :  { %v22_v0 = vld [vmem:[%s204_s1] sm:$0xf]  ;;  %v20_v2 = vld [vmem:[%s205_s0 + $0x30] sm:$0xff]  ;;  %v19_v5 = vld [vmem:[%s205_s0 + $0x28] sm:$0xff] }
   0x2   :  { %v18_v1 = vld [vmem:[%s205_s0 + $0x20] sm:$0xff]  ;;  %119 = vmatpush.msk.msra.mxu2 %vm52_vm0, %v22_v0  ;;  %120 = vmatpush.msk.msra.mxu3 %vm52_vm0, %v22_v0  ;;  %v16_v4 = vld [vmem:[%s205_s0 + $0x10] sm:$0xff]  ;;  %v21_v6 = vld [vmem:[%s205_s0 + $0x38] sm:$0xff] }
   0x3   :  { %v14_v3 = vld [vmem:[%s205_s0] sm:$0xff]  ;;  %114 = vmatmul.msk.f32.vlgmr.msra.gmra.mxu2 %vm27_vm1, %v18_v1  ;;  %116 = vmatmul.msk.f32.vlgmr.msra.gmra.mxu3 %vm27_vm1, %v20_v2  ;;  %v15_v7 = vld [vmem:[%s205_s0 + $0x8] sm:$0xff]  ;;  %v17_v8 = vld [vmem:[%s205_s0 + $0x18] sm:$0xff] }
   0x4   :  { %109 = vmatpush.msk.msra.mxu0 %vm52_vm0, %v22_v0  ;;  %118 = vmatpush.msk.msra.mxu1 %vm52_vm0, %v22_v0  ;;  %v121_v9 = vld [vmem:[%s206_s2] ss:$0 sm:$0xff] }
   0x5   :  { %110 = vmatmul.msk.f32.vlgmr.msra.gmra.mxu0 %vm27_vm1, %v14_v3  ;;  %112 = vmatmul.msk.f32.vlgmr.msra.gmra.mxu1 %vm27_vm1, %v16_v4 }
   0xb   :  { %115 = vmatmul.msk.f32.gmra.mxu2 %vm27_vm1, %v19_v5  ;;  %117 = vmatmul.msk.f32.gmra.mxu3 %vm27_vm1, %v21_v6 }
   0xd   :  { %111 = vmatmul.msk.f32.gmra.mxu0 %vm27_vm1, %v15_v7  ;;  %113 = vmatmul.msk.f32.gmra.mxu1 %vm27_vm1, %v17_v8 }
  0x82   :  { %v73_v10 = vpop.f32.mrf.mxu0  ;;  %v79_v11 = vpop.f32.mrf.mxu1 }
  0x83   :  { %v74_v12 = vadd.f32 %v121_v9, %v73_v10  ;;  %v80_v13 = vadd.f32 %v121_v9, %v79_v11 }
  0x85   :  { %97 = vst [vmem:[%s207_s3] sm:$0xff] %v74_v12 }
  0x86   :  { %99 = vst [vmem:[%s207_s3 + $0x10] sm:$0xff] %v80_v13  ;;  %v85_v14 = vpop.f32.mrf.mxu2  ;;  %v91_v15 = vpop.f32.mrf.mxu3 }
  0x87   :  { %v86_v16 = vadd.f32 %v121_v9, %v85_v14  ;;  %v92_v17 = vadd.f32 %v121_v9, %v91_v15 }
  0x89   :  { %101 = vst [vmem:[%s207_s3 + $0x20] sm:$0xff] %v86_v16 }
  0x8a   :  { %103 = vst [vmem:[%s207_s3 + $0x30] sm:$0xff] %v92_v17  ;;  %v76_v18 = vpop.f32.mrf.mxu0  ;;  %v82_v19 = vpop.f32.mrf.mxu1 }
  0x8b   :  { %v77_v20 = vadd.f32 %v121_v9, %v76_v18  ;;  %v83_v21 = vadd.f32 %v121_v9, %v82_v19 }
  0x8d   :  { %98 = vst [vmem:[%s207_s3 + $0x8] sm:$0xff] %v77_v20 }
  0x8e   :  { %100 = vst [vmem:[%s207_s3 + $0x18] sm:$0xff] %v83_v21  ;;  %v88_v22 = vpop.f32.mrf.mxu2  ;;  %v94_v23 = vpop.f32.mrf.mxu3 }
  0x8f   :  { %v89_v24 = vadd.f32 %v121_v9, %v88_v22  ;;  %v95_v25 = vadd.f32 %v121_v9, %v94_v23 }
  0x91   :  { %102 = vst [vmem:[%s207_s3 + $0x28] sm:$0xff] %v89_v24 }
  0x92   :  { %104 = vst [vmem:[%s207_s3 + $0x38] sm:$0xff] %v95_v25 }

// kernel: edm_block_forward.5
= control target key start
LH: loop header
LB: loop body
LE: loop exit
PB: predicated region body
PF: predicated region fallthrough
CT: control target
= control target key end

     0   :  { %s806_s21 = smov 0   ;;  %s972_s0 = inlined_call_operand.vmem [shape: f32[256,1], index: 0, kind: input, shape index: {}]   ;;  %s973_s1 = inlined_call_operand.vmem [shape: f32[256,128], index: 1, kind: input, shape index: {}]   ;;  %s974_s2 = inlined_call_operand.vmem [shape: f32[1,128], index: 2, kind: input, shape index: {}]   ;;  %s975_s3 = inlined_call_operand.vmem [shape: f32[1,128], index: 3, kind: input, shape index: {}]   ;;  %s976_s4 = inlined_call_operand.vmem [shape: bf16[128,128], index: 4, kind: input, shape index: {}]   ;;  %s977_s5 = inlined_call_operand.vmem [shape: f32[1,128], index: 5, kind: input, shape index: {}]   ;;  %s978_s6 = inlined_call_operand.vmem [shape: f32[256,128], index: 6, kind: output, shape index: {}]  }
   0x1 LB: > { %s670_s22 = sadd.s32 4294967295, %s768_s21   ;;  %p674_p0 = scmp.ge.s32.totalorder %s768_s21, 1  ;;  %s768_s21 = sphi %s806_s21, %s16_s21  }
   0x2   : > { %p224_p1 = scmp.lt.s32.totalorder %s768_s21, 3 }
   0x4   : > { %p225_p2 = pnand %p674_p0, %p224_p1 }
   0x5   : > { %s675_s23 = sshll.u32 (!%p225_p2), %s670_s22, 4 }
   0x6   : > { %228 = sbr.rel (%p225_p2) target bundleno = 318 (0x13e), region = 44  ;;  %p260_p3 = scmp.lt.s32.totalorder (!%p225_p2), %s675_s23, 31 }
   0xb   : > { %v770_v0 = vmov 0   ;;  %s980_s23 = smov (!%p260_p3, %s675_s23), 31  ;;  %v722_v17 = vld [vmem:[%s976_s4 + $0x38] sm:$0xff]  ;;  %v721_v18 = vld [vmem:[%s976_s4 + $0x30] sm:$0xff]  ;;  %v720_v19 = vld [vmem:[%s976_s4 + $0x28] sm:$0xff] }
   0xc   : > { %758 = vset.pattern.permute.xlu2 %v770_v0  ;;  %757 = vset.pattern.permute.xlu1 %v770_v0  ;;  %s814_s24 = sshll.u32 %s980_s23, 3  ;;  %v719_v20 = vld [vmem:[%s976_s4 + $0x20] sm:$0xff]  ;;  %v718_v21 = vld [vmem:[%s976_s4 + $0x18] sm:$0xff]  ;;  %v717_v22 = vld [vmem:[%s976_s4 + $0x10] sm:$0xff] }
   0xd   : > { %756 = vset.pattern.permute.xlu0 %v770_v0  ;;  %s820_s27 = scalar_lea.vmem %s972_s0, %s814_s24  ;;  %505 = vmatpush.bf16.msra.mxu0 %v722_v17  ;;  %v716_v23 = vld [vmem:[%s976_s4 + $0x8] sm:$0xff]  ;;  %v715_v24 = vld [vmem:[%s976_s4] sm:$0xff]  ;;  %s908_s28 = scalar_lea.vmem %s973_s1, %s814_s24 }
   0xe   : > { %v289_v1 = vld [vmem:[%s820_s27 + $0x60] sm:$0xff]  ;;  %v290_v4 = vld [vmem:[%s820_s27 + $0x68] sm:$0xff]  ;;  %v287_v9 = vld [vmem:[%s820_s27 + $0x50] sm:$0xff]  ;;  %724 = vmatpush.bf16.msra.mxu2 %v722_v17  ;;  %725 = vmatpush.bf16.msra.mxu3 %v722_v17  ;;  %s921_s9 = scalar_lea.vmem %s978_s6, %s814_s24 }
   0xf   : > { %v285_v2 = vld [vmem:[%s820_s27 + $0x40] sm:$0xff]  ;;  %356 = vperm.xlu1 %757, %v289_v1   ;;  %v286_v5 = vld [vmem:[%s820_s27 + $0x48] sm:$0xff]  ;;  %v291_v10 = vld [vmem:[%s820_s27 + $0x70] sm:$0xff]  ;;  %723 = vmatpush.bf16.msra.mxu1 %v722_v17 }
  0x10   : > { %v277_v3 = vld [vmem:[%s820_s27] sm:$0xff]  ;;  %336 = vperm.xlu0 %756, %v285_v2   ;;  %v278_v6 = vld [vmem:[%s820_s27 + $0x8] sm:$0xff]  ;;  %v288_v11 = vld [vmem:[%s820_s27 + $0x58] sm:$0xff] }
  0x11   : > { %296 = vperm.xlu2 %758, %v277_v3   ;;  %v282_v7 = vld [vmem:[%s820_s27 + $0x28] sm:$0xff]  ;;  %v281_v8 = vld [vmem:[%s820_s27 + $0x20] sm:$0xff]  ;;  %v292_v12 = vld [vmem:[%s820_s27 + $0x78] sm:$0xff]  ;;  %506 = vmatpush.bf16.msra.mxu0 %v721_v18 }
  0x12   : > { %v280_v13 = vld [vmem:[%s820_s27 + $0x18] sm:$0xff]  ;;  %v279_v14 = vld [vmem:[%s820_s27 + $0x10] sm:$0xff]  ;;  %727 = vmatpush.bf16.msra.mxu2 %v721_v18  ;;  %728 = vmatpush.bf16.msra.mxu3 %v721_v18  ;;  %v865_v25 = vld [vmem:[%s974_s2] ss:$0 sm:$0xff] }
  0x13   : > { %v283_v15 = vld [vmem:[%s820_s27 + $0x30] sm:$0xff]  ;;  %v284_v16 = vld [vmem:[%s820_s27 + $0x38] sm:$0xff]  ;;  %726 = vmatpush.bf16.msra.mxu1 %v721_v18  ;;  %v870_v27 = vld [vmem:[%s975_s3] ss:$0 sm:$0xff] }
  0x15   : > { %507 = vmatpush.bf16.msra.mxu0 %v720_v19 }
  0x16   : > { %730 = vmatpush.bf16.msra.mxu2 %v720_v19  ;;  %731 = vmatpush.bf16.msra.mxu3 %v720_v19 }
  0x17   : > { %361 = vperm.xlu1 %757, %v290_v4   ;;  %729 = vmatpush.bf16.msra.mxu1 %v720_v19 }
  0x18   : > { %341 = vperm.xlu0 %756, %v286_v5  }
  0x19   : > { %301 = vperm.xlu2 %758, %v278_v6   ;;  %508 = vmatpush.bf16.msra.mxu0 %v719_v20 }
  0x1a   : > { %733 = vmatpush.bf16.msra.mxu2 %v719_v20  ;;  %734 = vmatpush.bf16.msra.mxu3 %v719_v20 }
  0x1b   : > { %732 = vmatpush.bf16.msra.mxu1 %v719_v20 }
  0x1d   : > { %509 = vmatpush.bf16.msra.mxu0 %v718_v21 }
  0x1e   : > { %736 = vmatpush.bf16.msra.mxu2 %v718_v21  ;;  %737 = vmatpush.bf16.msra.mxu3 %v718_v21 }
  0x1f   : > { %321 = vperm.xlu1 %757, %v282_v7   ;;  %735 = vmatpush.bf16.msra.mxu1 %v718_v21 }
  0x20   : > { %316 = vperm.xlu0 %756, %v281_v8  }
  0x21   : > { %346 = vperm.xlu2 %758, %v287_v9   ;;  %510 = vmatpush.bf16.msra.mxu0 %v717_v22 }
  0x22   : > { %739 = vmatpush.bf16.msra.mxu2 %v717_v22  ;;  %740 = vmatpush.bf16.msra.mxu3 %v717_v22 }
  0x23   : > { %738 = vmatpush.bf16.msra.mxu1 %v717_v22 }
  0x25   : > { %511 = vmatpush.bf16.msra.mxu0 %v716_v23 }
  0x26   : > { %742 = vmatpush.bf16.msra.mxu2 %v716_v23  ;;  %743 = vmatpush.bf16.msra.mxu3 %v716_v23 }
  0x27   : > { %366 = vperm.xlu1 %757, %v291_v10   ;;  %741 = vmatpush.bf16.msra.mxu1 %v716_v23 }
  0x28   : > { %351 = vperm.xlu0 %756, %v288_v11  }
  0x29   : > { %371 = vperm.xlu2 %758, %v292_v12   ;;  %512 = vmatpush.bf16.msra.mxu0 %v715_v24 }
  0x2a   : > { %745 = vmatpush.bf16.msra.mxu2 %v715_v24  ;;  %746 = vmatpush.bf16.msra.mxu3 %v715_v24 }
  0x2b   : > { %744 = vmatpush.bf16.msra.mxu1 %v715_v24 }
  0x2f   : > { %311 = vperm.xlu1 %757, %v280_v13  }
  0x30   : > { %306 = vperm.xlu0 %756, %v279_v14  }
  0x31   : > { %326 = vperm.xlu2 %758, %v283_v15  }
  0x38   : > { %331 = vperm.xlu0 %756, %v284_v16  }
  0x6b   : > { %v297_v26 = vpop.permute.xlu2 %296 }
  0x6c   : > { %v377_v28 = vmul.f32 %v865_v25, %v297_v26 }
  0x6e   : > { %v397_v29 = vadd.f32 %v870_v27, %v377_v28 }
  0x70   : > { %v413_v32 = vmax.f32 %v397_v29, 0.0 }
  0x73   : > { %v302_v30 = vpop.permute.xlu2 %301 }
  0x74   : > { %v378_v31 = vmul.f32 %v865_v25, %v302_v30 }
  0x76   : > { %v398_v33 = vadd.f32 %v870_v27, %v378_v31 }
  0x78   : > { %v414_v34 = vmax.f32 %v398_v33, 0.0 }
  0x7a   : > { %v429_v35 = vpack.c.bf16 %v414_v34, %v413_v32 }
  0x7b   : > { %v347_v46 = vpop.permute.xlu2 %346 }
  0x7c   : > { %513 = vmatmul.bf16.vlgmr.msra.gmra.mxu0 %v429_v35  ;;  %v387_v62 = vmul.f32 %v865_v25, %v347_v46 }
  0x7e   : > { %v407_v5 = vadd.f32 %v870_v27, %v387_v62 }
  0x80   : > { %v423_v11 = vmax.f32 %v407_v5, 0.0  ;;  %v564_v5 = vld [vmem:[%s908_s28 + $0x50] sm:$0xff] }
  0x81   : > { %v357_v36 = vpop.permute.xlu1 %356 }
  0x82   : > { %v337_v37 = vpop.permute.xlu0 %336  ;;  %v389_v38 = vmul.f32 %v865_v25, %v357_v36 }
  0x83   : > { %v385_v39 = vmul.f32 %v865_v25, %v337_v37  ;;  %v372_v61 = vpop.permute.xlu2 %371 }
  0x84   : > { %v409_v40 = vadd.f32 %v870_v27, %v389_v38  ;;  %v392_v63 = vmul.f32 %v865_v25, %v372_v61 }
  0x85   : > { %v405_v43 = vadd.f32 %v870_v27, %v385_v39 }
  0x86   : > { %v425_v47 = vmax.f32 %v409_v40, 0.0  ;;  %v412_v6 = vadd.f32 %v870_v27, %v392_v63  ;;  %v559_v63 = vld [vmem:[%s908_s28 + $0x28] sm:$0xff] }
  0x87   : > { %v421_v50 = vmax.f32 %v405_v43, 0.0 }
  0x88   : > { %v428_v12 = vmax.f32 %v412_v6, 0.0 }
  0x89   : > { %v362_v41 = vpop.permute.xlu1 %361 }
  0x8a   : > { %v342_v42 = vpop.permute.xlu0 %341  ;;  %v390_v44 = vmul.f32 %v865_v25, %v362_v41  ;;  %v555_v41 = vld [vmem:[%s908_s28 + $0x8] sm:$0xff] }
  0x8b   : > { %v386_v45 = vmul.f32 %v865_v25, %v342_v42  ;;  %v327_v21 = vpop.permute.xlu2 %326 }
  0x8c   : > { %v410_v48 = vadd.f32 %v870_v27, %v390_v44  ;;  %v383_v24 = vmul.f32 %v865_v25, %v327_v21 }
  0x8d   : > { %v406_v49 = vadd.f32 %v870_v27, %v386_v45  ;;  %v562_v45 = vld [vmem:[%s908_s28 + $0x40] sm:$0xff] }
  0x8e   : > { %v426_v51 = vmax.f32 %v410_v48, 0.0  ;;  %v403_v31 = vadd.f32 %v870_v27, %v383_v24 }
  0x8f   : > { %v422_v52 = vmax.f32 %v406_v49, 0.0 }
  0x90   : > { %v435_v54 = vpack.c.bf16 %v426_v51, %v425_v47  ;;  %v419_v34 = vmax.f32 %v403_v31, 0.0  ;;  %v566_v47 = vld [vmem:[%s908_s28 + $0x60] sm:$0xff] }
  0x91   : > { %v433_v53 = vpack.c.bf16 %v422_v52, %v421_v50  ;;  %v322_v55 = vpop.permute.xlu1 %321  ;;  %v558_v51 = vld [vmem:[%s908_s28 + $0x20] sm:$0xff] }
  0x92   : > { %v317_v56 = vpop.permute.xlu0 %316  ;;  %v382_v57 = vmul.f32 %v865_v25, %v322_v55  ;;  %543 = vmatmul.bf16.vlgmr.msra.gmra.mxu3 %v435_v54 }
  0x93   : > { %v381_v58 = vmul.f32 %v865_v25, %v317_v56  ;;  %533 = vmatmul.bf16.vlgmr.msra.gmra.mxu2 %v433_v53 }
  0x94   : > { %v402_v59 = vadd.f32 %v870_v27, %v382_v57  ;;  %v563_v57 = vld [vmem:[%s908_s28 + $0x48] sm:$0xff] }
  0x95   : > { %v401_v60 = vadd.f32 %v870_v27, %v381_v58 }
  0x96   : > { %v418_v0 = vmax.f32 %v402_v59, 0.0  ;;  %v567_v59 = vld [vmem:[%s908_s28 + $0x68] sm:$0xff] }
  0x97   : > { %v417_v1 = vmax.f32 %v401_v60, 0.0 }
  0x99   : > { %v431_v2 = vpack.c.bf16 %v418_v0, %v417_v1  ;;  %v367_v3 = vpop.permute.xlu1 %366 }
  0x9a   : > { %v352_v4 = vpop.permute.xlu0 %351  ;;  %v391_v7 = vmul.f32 %v865_v25, %v367_v3 }
  0x9b   : > { %v388_v8 = vmul.f32 %v865_v25, %v352_v4  ;;  %523 = vmatmul.bf16.vlgmr.msra.gmra.mxu1 %v431_v2 }
  0x9c   : > { %v411_v9 = vadd.f32 %v870_v27, %v391_v7  ;;  %v568_v7 = vld [vmem:[%s908_s28 + $0x70] sm:$0xff] }
  0x9d   : > { %v408_v10 = vadd.f32 %v870_v27, %v388_v8 }
  0x9e   : > { %v427_v13 = vmax.f32 %v411_v9, 0.0 }
  0x9f   : > { %v424_v14 = vmax.f32 %v408_v10, 0.0 }
  0xa0   : > { %v436_v16 = vpack.c.bf16 %v428_v12, %v427_v13 }
  0xa1   : > { %v434_v15 = vpack.c.bf16 %v424_v14, %v423_v11  ;;  %v312_v17 = vpop.permute.xlu1 %311  ;;  %v556_v11 = vld [vmem:[%s908_s28 + $0x10] sm:$0xff] }
  0xa2   : > { %v307_v18 = vpop.permute.xlu0 %306  ;;  %v380_v19 = vmul.f32 %v865_v25, %v312_v17  ;;  %548 = vmatmul.bf16.gmra.mxu3 %v436_v16  ;;  %v565_v17 = vld [vmem:[%s908_s28 + $0x58] sm:$0xff] }
  0xa3   : > { %v379_v20 = vmul.f32 %v865_v25, %v307_v18  ;;  %538 = vmatmul.bf16.gmra.mxu2 %v434_v15 }
  0xa4   : > { %v400_v22 = vadd.f32 %v870_v27, %v380_v19  ;;  %v569_v19 = vld [vmem:[%s908_s28 + $0x78] sm:$0xff] }
  0xa5   : > { %v399_v23 = vadd.f32 %v870_v27, %v379_v20 }
  0xa6   : > { %v416_v26 = vmax.f32 %v400_v22, 0.0 }
  0xa7   : > { %v415_v28 = vmax.f32 %v399_v23, 0.0  ;;  %v557_v23 = vld [vmem:[%s908_s28 + $0x18] sm:$0xff] }
  0xa9   : > { %v430_v29 = vpack.c.bf16 %v416_v26, %v415_v28  ;;  %v560_v26 = vld [vmem:[%s908_s28 + $0x30] sm:$0xff] }
  0xaa   : > { %v332_v30 = vpop.permute.xlu0 %331 }
  0xab   : > { %v384_v32 = vmul.f32 %v865_v25, %v332_v30  ;;  %518 = vmatmul.bf16.gmra.mxu0 %v430_v29  ;;  %v913_v25 = vld [vmem:[%s977_s5] ss:$0 sm:$0xff] }
  0xad   : > { %v404_v33 = vadd.f32 %v870_v27, %v384_v32  ;;  %v554_v27 = vld [vmem:[%s908_s28] sm:$0xff] }
  0xaf   : > { %v420_v35 = vmax.f32 %v404_v33, 0.0 }
  0xb1   : > { %v432_v36 = vpack.c.bf16 %v420_v35, %v419_v34  ;;  %v561_v35 = vld [vmem:[%s908_s28 + $0x38] sm:$0xff] }
  0xb3   : > { %528 = vmatmul.bf16.gmra.mxu1 %v432_v36 }
  0xf9   : > { %v514_v37 = vpop.f32.mrf.mxu0 }
  0xfa   : > { %v515_v38 = vadd.f32 %v913_v25, %v514_v37 }
  0xfc   : > { %v570_v39 = vmul.f32 %v554_v27, %v515_v38 }
  0xfe   : > { %586 = vst [vmem:[%s921_s9] sm:$0xff] %v570_v39 }
 0x101   : > { %v516_v40 = vpop.f32.mrf.mxu0 }
 0x102   : > { %v517_v42 = vadd.f32 %v913_v25, %v516_v40 }
 0x104   : > { %v571_v43 = vmul.f32 %v555_v41, %v517_v42 }
 0x106   : > { %587 = vst [vmem:[%s921_s9 + $0x8] sm:$0xff] %v571_v43 }
 0x115   : > { %v544_v46 = vpop.f32.mrf.mxu3 }
 0x116   : > { %v534_v44 = vpop.f32.mrf.mxu2  ;;  %v545_v49 = vadd.f32 %v913_v25, %v544_v46 }
 0x117   : > { %v535_v48 = vadd.f32 %v913_v25, %v534_v44 }
 0x118   : > { %v524_v50 = vpop.f32.mrf.mxu1  ;;  %v582_v53 = vmul.f32 %v566_v47, %v545_v49 }
 0x119   : > { %v578_v52 = vmul.f32 %v562_v45, %v535_v48  ;;  %v525_v54 = vadd.f32 %v913_v25, %v524_v50 }
 0x11a   : > { %598 = vst [vmem:[%s921_s9 + $0x60] sm:$0xff] %v582_v53 }
 0x11b   : > { %594 = vst [vmem:[%s921_s9 + $0x40] sm:$0xff] %v578_v52  ;;  %v574_v55 = vmul.f32 %v558_v51, %v525_v54 }
 0x11d   : > { %590 = vst [vmem:[%s921_s9 + $0x20] sm:$0xff] %v574_v55  ;;  %v546_v58 = vpop.f32.mrf.mxu3 }
 0x11e   : > { %v536_v56 = vpop.f32.mrf.mxu2  ;;  %v547_v61 = vadd.f32 %v913_v25, %v546_v58 }
 0x11f   : > { %v537_v60 = vadd.f32 %v913_v25, %v536_v56 }
 0x120   : > { %v526_v62 = vpop.f32.mrf.mxu1  ;;  %v583_v1 = vmul.f32 %v567_v59, %v547_v61 }
 0x121   : > { %v579_v0 = vmul.f32 %v563_v57, %v537_v60  ;;  %v527_v2 = vadd.f32 %v913_v25, %v526_v62 }
 0x122   : > { %599 = vst [vmem:[%s921_s9 + $0x68] sm:$0xff] %v583_v1 }
 0x123   : > { %595 = vst [vmem:[%s921_s9 + $0x48] sm:$0xff] %v579_v0  ;;  %v575_v3 = vmul.f32 %v559_v63, %v527_v2 }
 0x125   : > { %591 = vst [vmem:[%s921_s9 + $0x28] sm:$0xff] %v575_v3  ;;  %v549_v6 = vpop.f32.mrf.mxu3 }
 0x126   : > { %v539_v4 = vpop.f32.mrf.mxu2  ;;  %v550_v9 = vadd.f32 %v913_v25, %v549_v6 }
 0x127   : > { %v540_v8 = vadd.f32 %v913_v25, %v539_v4 }
 0x128   : > { %v519_v10 = vpop.f32.mrf.mxu0  ;;  %v584_v13 = vmul.f32 %v568_v7, %v550_v9 }
 0x129   : > { %v580_v12 = vmul.f32 %v564_v5, %v540_v8  ;;  %v520_v14 = vadd.f32 %v913_v25, %v519_v10 }
 0x12a   : > { %600 = vst [vmem:[%s921_s9 + $0x70] sm:$0xff] %v584_v13 }
 0x12b   : > { %596 = vst [vmem:[%s921_s9 + $0x50] sm:$0xff] %v580_v12  ;;  %v572_v15 = vmul.f32 %v556_v11, %v520_v14 }
 0x12d   : > { %588 = vst [vmem:[%s921_s9 + $0x10] sm:$0xff] %v572_v15  ;;  %v551_v18 = vpop.f32.mrf.mxu3 }
 0x12e   : > { %v541_v16 = vpop.f32.mrf.mxu2  ;;  %v552_v21 = vadd.f32 %v913_v25, %v551_v18 }
 0x12f   : > { %v542_v20 = vadd.f32 %v913_v25, %v541_v16 }
 0x130   : > { %v521_v22 = vpop.f32.mrf.mxu0  ;;  %v529_v24 = vpop.f32.mrf.mxu1  ;;  %v585_v29 = vmul.f32 %v569_v19, %v552_v21 }
 0x131   : > { %v581_v28 = vmul.f32 %v565_v17, %v542_v20  ;;  %v522_v30 = vadd.f32 %v913_v25, %v521_v22  ;;  %v530_v31 = vadd.f32 %v913_v25, %v529_v24 }
 0x132   : > { %601 = vst [vmem:[%s921_s9 + $0x78] sm:$0xff] %v585_v29 }
 0x133   : > { %597 = vst [vmem:[%s921_s9 + $0x58] sm:$0xff] %v581_v28  ;;  %v573_v32 = vmul.f32 %v557_v23, %v522_v30  ;;  %v576_v33 = vmul.f32 %v560_v26, %v530_v31 }
 0x135   : > { %589 = vst [vmem:[%s921_s9 + $0x18] sm:$0xff] %v573_v32 }
 0x136   : > { %592 = vst [vmem:[%s921_s9 + $0x30] sm:$0xff] %v576_v33 }
 0x138   : > { %v531_v34 = vpop.f32.mrf.mxu1 }
 0x139   : > { %v532_v36 = vadd.f32 %v913_v25, %v531_v34 }
 0x13b   : > { %v577_v37 = vmul.f32 %v561_v35, %v532_v36 }
 0x13d   : > { %593 = vst [vmem:[%s921_s9 + $0x38] sm:$0xff] %v577_v37 }
 0x13e PF: > { %s16_s21 = sadd.s32 1, %s768_s21  }
 0x13f   : > { %p13_p4 = scmp.ge.s32.totalorder %s16_s21, 4  }
 0x141   :  { %15 = sbr.rel (!%p13_p4) target bundleno = 1 (0x1), region = 77 }

// kernel: edm_block_forward.7
= control target key start
LH: loop header
LB: loop body
LE: loop exit
PB: predicated region body
PF: predicated region fallthrough
CT: control target
= control target key end

     0   :  { %s2448_s25 = smov 0   ;;  %s2930_s0 = inlined_call_operand.vmem [shape: s32[256,1], index: 0, kind: input, shape index: {}]   ;;  %s2931_s1 = inlined_call_operand.vmem [shape: s32[256,1], index: 1, kind: input, shape index: {}]   ;;  %s2932_s2 = inlined_call_operand.vmem [shape: s32[1,256], index: 2, kind: input, shape index: {}]   ;;  %s2933_s3 = inlined_call_operand.vmem [shape: f32[64,128], index: 3, kind: input, shape index: {}]   ;;  %s2934_s4 = inlined_call_operand.vmem [shape: f32[256,128], index: 4, kind: input, shape index: {}]   ;;  %s2935_s5 = inlined_call_operand.vmem [shape: bf16[384,128], index: 5, kind: input, shape index: {}]   ;;  %s2936_s6 = inlined_call_operand.vmem [shape: f32[1,128], index: 6, kind: input, shape index: {}]   ;;  %s2937_s7 = inlined_call_operand.vmem [shape: bf16[128,128], index: 7, kind: input, shape index: {}]   ;;  %s2938_s8 = inlined_call_operand.vmem [shape: f32[1,128], index: 8, kind: input, shape index: {}]   ;;  %s2939_s9 = inlined_call_operand.vmem [shape: bf16[256,128], index: 9, kind: input, shape index: {}]   ;;  %s2940_s10 = inlined_call_operand.vmem [shape: f32[1,128], index: 10, kind: input, shape index: {}]   ;;  %s2941_s11 = inlined_call_operand.vmem [shape: bf16[128,128], index: 11, kind: input, shape index: {}]   ;;  %s2942_s12 = inlined_call_operand.vmem [shape: f32[1,128], index: 12, kind: input, shape index: {}]   ;;  %s2943_s13 = inlined_call_operand.vmem [shape: f32[64,128], index: 13, kind: output, shape index: {}]  }
   0x1 LB: > { %s2454_s26 = sadd.s32 4294967295, %s2372_s25   ;;  %p1975_p0 = scmp.ge.s32.totalorder %s2372_s25, 1  ;;  %s2372_s25 = sphi %s2448_s25, %s23_s25  }
   0x2   : > { %p413_p1 = scmp.lt.s32.totalorder %s2372_s25, 3 }
   0x4   : > { %p414_p2 = pnand %p1975_p0, %p413_p1 }
   0x5   : > { %s1976_s27 = sshll.u32 (!%p414_p2), %s2454_s26, 4  ;;  %p477_p3 = scmp.lt.s32.totalorder (!%p414_p2), %s2454_s26, 1 }
   0x6   : > { %417 = sbr.rel (%p414_p2) target bundleno = 1314 (0x522), region = 72  ;;  %p466_p4 = scmp.lt.s32.totalorder (!%p414_p2), %s1976_s27, 31 }
   0x7   : > { %p1982_p5 = scmp.ne.s32.totalorder (!%p414_p2), %s2454_s26, 0 }
   0xb   : > { %s2461_s28 = scalar_select %p477_p3, %s2454_s26, 1 }
   0xc   : > { %s2945_s27 = smov (!%p466_p4, %s1976_s27), 31  ;;  %490 = sbr.rel (%p1982_p5) target bundleno = 26 (0x1a), region = 76 }
   0xd   : > { %s479_s14 = scalar_lea.vmem %s2932_s2, %s2461_s28  ;;  %s1977_s15 = sshll.u32 %s2945_s27, 3 }
   0xe   : > { %s2470_s18 = scalar_lea.vmem %s2930_s0, %s1977_s15  ;;  %s2475_s21 = scalar_lea.vmem %s2931_s1, %s1977_s15 }
   0xf   : > { %s2480_s24 = scalar_lea.vmem %s2934_s4, %s1977_s15 }
  0x11   : > { %v2374_v0 = vmov 0.0  }
  0x12   : > { %491 = vst [vmem:[#allocation2 + $0x30] sm:$0xff] %v2374_v0 }
  0x13   : > { %492 = vst [vmem:[#allocation2] sm:$0xff] %v2374_v0 }
  0x14   : > { %493 = vst [vmem:[#allocation2 + $0x18] sm:$0xff] %v2374_v0 }
  0x15   : > { %494 = vst [vmem:[#allocation2 + $0x10] sm:$0xff] %v2374_v0 }
  0x16   : > { %495 = vst [vmem:[#allocation2 + $0x8] sm:$0xff] %v2374_v0 }
  0x17   : > { %496 = vst [vmem:[#allocation2 + $0x20] sm:$0xff] %v2374_v0 }
  0x18   : > { %497 = vst [vmem:[#allocation2 + $0x28] sm:$0xff] %v2374_v0 }
  0x19   : > { %498 = vst [vmem:[#allocation2 + $0x38] sm:$0xff] %v2374_v0 }
  0x1a PF: > { %v633_v1 = vld [vmem:[%s2475_s21] sm:$0xff]  ;;  %v515_v2 = vld [vmem:[%s2470_s18 + $0x10] sm:$0xff]  ;;  %v2375_v4 = vmov 0   ;;  %v634_v5 = vld [vmem:[%s2475_s21 + $0x8] sm:$0xff]  ;;  %v511_v47 = vlaneseq  ;;  %v2376_v55 = vmov 0.0   ;;  %vm753_vm2 = vcmask 523264  }
  0x1b   : > { %v513_v3 = vld [vmem:[%s2470_s18] sm:$0xff]  ;;  %2360 = vset.pattern.permute.xlu2 %v2375_v4  ;;  %2359 = vset.pattern.permute.xlu1 %v2375_v4  ;;  %v516_v6 = vld [vmem:[%s2470_s18 + $0x18] sm:$0xff]  ;;  %v514_v7 = vld [vmem:[%s2470_s18 + $0x8] sm:$0xff]  ;;  %p2175_p6 = scmp.ne.s32.totalorder %s2454_s26, 1 }
  0x1c   : > { %2358 = vset.pattern.permute.xlu0 %v2375_v4  ;;  %650 = vperm.xlu2 %2360, %v633_v1   ;;  %v517_v8 = vld [vmem:[%s2470_s18 + $0x20] sm:$0xff]  ;;  %v636_v9 = vld [vmem:[%s2475_s21 + $0x18] sm:$0xff]  ;;  %v635_v10 = vld [vmem:[%s2475_s21 + $0x10] sm:$0xff]  ;;  %v2588_v51 = vand.u32 127, %v511_v47 }
  0x1d   : > { %536 = vperm.xlu1 %2359, %v515_v2   ;;  %530 = vperm.xlu0 %2358, %v513_v3   ;;  %v638_v11 = vld [vmem:[%s2475_s21 + $0x28] sm:$0xff]  ;;  %v637_v12 = vld [vmem:[%s2475_s21 + $0x20] sm:$0xff]  ;;  %v639_v14 = vld [vmem:[%s2475_s21 + $0x30] sm:$0xff] }
  0x1e   : > { %v518_v13 = vld [vmem:[%s2470_s18 + $0x28] sm:$0xff]  ;;  %v520_v15 = vld [vmem:[%s2470_s18 + $0x38] sm:$0xff]  ;;  %v519_v16 = vld [vmem:[%s2470_s18 + $0x30] sm:$0xff] }
  0x1f   : > { %v522_v17 = vld [vmem:[%s2470_s18 + $0x48] sm:$0xff]  ;;  %v521_v18 = vld [vmem:[%s2470_s18 + $0x40] sm:$0xff]  ;;  %v640_v19 = vld [vmem:[%s2475_s21 + $0x38] sm:$0xff] }
  0x20   : > { %v523_v20 = vld [vmem:[%s2470_s18 + $0x50] sm:$0xff]  ;;  %v642_v21 = vld [vmem:[%s2475_s21 + $0x48] sm:$0xff]  ;;  %v641_v22 = vld [vmem:[%s2475_s21 + $0x40] sm:$0xff] }
  0x21   : > { %v644_v23 = vld [vmem:[%s2475_s21 + $0x58] sm:$0xff]  ;;  %v643_v24 = vld [vmem:[%s2475_s21 + $0x50] sm:$0xff]  ;;  %v645_v26 = vld [vmem:[%s2475_s21 + $0x60] sm:$0xff] }
  0x22   : > { %v524_v25 = vld [vmem:[%s2470_s18 + $0x58] sm:$0xff]  ;;  %v526_v27 = vld [vmem:[%s2470_s18 + $0x68] sm:$0xff]  ;;  %v525_v28 = vld [vmem:[%s2470_s18 + $0x60] sm:$0xff] }
  0x23   : > { %v528_v29 = vld [vmem:[%s2470_s18 + $0x78] sm:$0xff]  ;;  %v527_v30 = vld [vmem:[%s2470_s18 + $0x70] sm:$0xff]  ;;  %v646_v31 = vld [vmem:[%s2475_s21 + $0x68] sm:$0xff] }
  0x24   : > { %653 = vperm.xlu2 %2360, %v634_v5   ;;  %v2516_v32 = vld [vmem:[%s2933_s3 + $0x30] sm:$0xff]  ;;  %v2521_v33 = vld [vmem:[%s2933_s3 + $0x38] sm:$0xff]  ;;  %v2535_v37 = vld [vmem:[%s2933_s3 + $0x20] sm:$0xff] }
  0x25   : > { %539 = vperm.xlu1 %2359, %v516_v6   ;;  %533 = vperm.xlu0 %2358, %v514_v7   ;;  %v2525_v34 = vpack.c.bf16 %v2521_v33, %v2516_v32  ;;  %v648_v35 = vld [vmem:[%s2475_s21 + $0x78] sm:$0xff]  ;;  %v647_v36 = vld [vmem:[%s2475_s21 + $0x70] sm:$0xff]  ;;  %v2540_v38 = vld [vmem:[%s2933_s3 + $0x28] sm:$0xff] }
  0x26   : > { %v2544_v39 = vpack.c.bf16 %v2540_v38, %v2535_v37  ;;  %v2550_v40 = vld [vmem:[%s2933_s3 + $0x10] sm:$0xff]  ;;  %v2555_v41 = vld [vmem:[%s2933_s3 + $0x18] sm:$0xff]  ;;  %v2568_v43 = vld [vmem:[%s2933_s3] sm:$0xff] }
  0x27   : > { %782 = vmatpush.bf16.msra.mxu0 %v2525_v34  ;;  %2330 = vmatpush.bf16.msra.mxu3 %v2525_v34  ;;  %v2560_v42 = vpack.c.bf16 %v2555_v41, %v2550_v40  ;;  %v2573_v44 = vld [vmem:[%s2933_s3 + $0x8] sm:$0xff] }
  0x28   : > { %2334 = vmatpush.bf16.msra.mxu1 %v2525_v34  ;;  %v2578_v45 = vpack.c.bf16 %v2573_v44, %v2568_v43 }
  0x2b   : > { %783 = vmatpush.bf16.msra.mxu0 %v2544_v39  ;;  %2331 = vmatpush.bf16.msra.mxu3 %v2544_v39 }
  0x2c   : > { %542 = vperm.xlu2 %2360, %v517_v8   ;;  %2335 = vmatpush.bf16.msra.mxu1 %v2544_v39 }
  0x2d   : > { %659 = vperm.xlu1 %2359, %v636_v9   ;;  %656 = vperm.xlu0 %2358, %v635_v10  }
  0x2f   : > { %784 = vmatpush.bf16.msra.mxu0 %v2560_v42  ;;  %2332 = vmatpush.bf16.msra.mxu3 %v2560_v42 }
  0x30   : > { %2336 = vmatpush.bf16.msra.mxu1 %v2560_v42 }
  0x33   : > { %785 = vmatpush.bf16.msra.mxu0 %v2578_v45  ;;  %2333 = vmatpush.bf16.msra.mxu3 %v2578_v45 }
  0x34   : > { %665 = vperm.xlu2 %2360, %v638_v11   ;;  %2337 = vmatpush.bf16.msra.mxu1 %v2578_v45 }
  0x35   : > { %662 = vperm.xlu1 %2359, %v637_v12   ;;  %545 = vperm.xlu0 %2358, %v518_v13  }
  0x37   : > { %855 = vmatpush.bf16.msrb.mxu0 %v2525_v34 }
  0x3b   : > { %856 = vmatpush.bf16.msrb.mxu0 %v2544_v39 }
  0x3c   : > { %668 = vperm.xlu2 %2360, %v639_v14  }
  0x3d   : > { %551 = vperm.xlu1 %2359, %v520_v15   ;;  %548 = vperm.xlu0 %2358, %v519_v16  }
  0x3f   : > { %857 = vmatpush.bf16.msrb.mxu0 %v2560_v42 }
  0x43   : > { %858 = vmatpush.bf16.msrb.mxu0 %v2578_v45 }
  0x44   : > { %557 = vperm.xlu2 %2360, %v522_v17  }
  0x45   : > { %554 = vperm.xlu1 %2359, %v521_v18   ;;  %671 = vperm.xlu0 %2358, %v640_v19  }
  0x4c   : > { %560 = vperm.xlu2 %2360, %v523_v20  }
  0x4d   : > { %677 = vperm.xlu1 %2359, %v642_v21   ;;  %674 = vperm.xlu0 %2358, %v641_v22  }
  0x54   : > { %683 = vperm.xlu2 %2360, %v644_v23  }
  0x55   : > { %680 = vperm.xlu1 %2359, %v643_v24   ;;  %563 = vperm.xlu0 %2358, %v524_v25  }
  0x5c   : > { %686 = vperm.xlu2 %2360, %v645_v26  }
  0x5d   : > { %569 = vperm.xlu1 %2359, %v526_v27   ;;  %566 = vperm.xlu0 %2358, %v525_v28  }
  0x64   : > { %575 = vperm.xlu2 %2360, %v528_v29  }
  0x65   : > { %572 = vperm.xlu1 %2359, %v527_v30   ;;  %689 = vperm.xlu0 %2358, %v646_v31  }
  0x6d   : > { %695 = vperm.xlu1 %2359, %v648_v35   ;;  %692 = vperm.xlu0 %2358, %v647_v36  }
  0x76   : > { %v651_v46 = vpop.permute.xlu2 %650 }
  0x77   : > { %vm697_vm9 = vcmp.eq.s32.totalorder %v2588_v51, %v651_v46 }
  0x78   : > { %v1999_v12 = vsel %vm697_vm9, 1.0, %v2376_v55 }
  0x7e   : > { %v654_v48 = vpop.permute.xlu2 %653 }
  0x7f   : > { %vm698_vm10 = vcmp.eq.s32.totalorder %v2588_v51, %v654_v48 }
  0x80   : > { %v2000_v13 = vsel %vm698_vm10, 1.0, %v2376_v55 }
  0x81   : > { %v745_v20 = vpack.c.bf16 %v2000_v13, %v1999_v12 }
  0x86   : > { %v543_v54 = vpop.permute.xlu2 %542 }
  0x87   : > { %vm581_vm3 = vcmp.eq.s32.totalorder %v2588_v51, %v543_v54 }
  0x88   : > { %v1987_v62 = vsel %vm581_vm3, 1.0, %v2376_v55 }
  0x8e   : > { %v666_v61 = vpop.permute.xlu2 %665 }
  0x8f   : > { %v537_v49 = vpop.permute.xlu1 %536  ;;  %v531_v50 = vpop.permute.xlu0 %530  ;;  %vm702_vm4 = vcmp.eq.s32.totalorder %v2588_v51, %v666_v61  ;;  %v2281_v61 = vld [vmem:[%s2935_s5 + $0x38] sm:$0xff] }
  0x90   : > { %vm577_vm0 = vcmp.eq.s32.totalorder %v2588_v51, %v531_v50  ;;  %vm579_vm5 = vcmp.eq.s32.totalorder %v2588_v51, %v537_v49  ;;  %v2004_v63 = vsel %vm702_vm4, 1.0, %v2376_v55  ;;  %1133 = vmatpush.bf16.msrb.mxu3 %v2281_v61 }
  0x91   : > { %v1983_v56 = vsel %vm577_vm0, 1.0, %v2376_v55  ;;  %v1985_v0 = vsel %vm579_vm5, 1.0, %v2376_v55 }
  0x96   : > { %v669_v11 = vpop.permute.xlu2 %668 }
  0x97   : > { %v540_v52 = vpop.permute.xlu1 %539  ;;  %v534_v53 = vpop.permute.xlu0 %533  ;;  %vm703_vm13 = vcmp.eq.s32.totalorder %v2588_v51, %v669_v11  ;;  %v2277_v11 = vld [vmem:[%s2935_s5 + $0x18] sm:$0xff] }
  0x98   : > { %vm578_vm1 = vcmp.eq.s32.totalorder %v2588_v51, %v534_v53  ;;  %vm580_vm6 = vcmp.eq.s32.totalorder %v2588_v51, %v540_v52  ;;  %v2005_v18 = vsel %vm703_vm13, 1.0, %v2376_v55 }
  0x99   : > { %v1984_v57 = vsel %vm578_vm1, 1.0, %v2376_v55  ;;  %v1986_v1 = vsel %vm580_vm6, 1.0, %v2376_v55 }
  0x9a   : > { %v625_v58 = vpack.c.bf16 %v1984_v57, %v1983_v56  ;;  %v626_v6 = vpack.c.bf16 %v1986_v1, %v1985_v0  ;;  %v2279_v1 = vld [vmem:[%s2935_s5 + $0x28] sm:$0xff] }
  0x9c   : > { %2015 = vmatmul.msk.bf16.vlgmr.msra.gmra.mxu0 %vm753_vm2, %v625_v58 }
  0x9e   : > { %v558_v23 = vpop.permute.xlu2 %557 }
  0x9f   : > { %v660_v59 = vpop.permute.xlu1 %659  ;;  %v657_v60 = vpop.permute.xlu0 %656  ;;  %vm586_vm5 = vcmp.eq.s32.totalorder %v2588_v51, %v558_v23  ;;  %v2297_v23 = vld [vmem:[%s2935_s5 + $0xb8] sm:$0xff] }
  0xa0   : > { %vm700_vm15 = vcmp.eq.s32.totalorder %v2588_v51, %v660_v59  ;;  %vm699_vm0 = vcmp.eq.s32.totalorder %v2588_v51, %v657_v60  ;;  %v1992_v31 = vsel %vm586_vm5, 1.0, %v2376_v55  ;;  %1230 = vmatpush.bf16.msra.mxu0 %v2297_v23 }
  0xa1   : > { %v2002_v26 = vsel %vm700_vm15, 1.0, %v2376_v55  ;;  %v2001_v27 = vsel %vm699_vm0, 1.0, %v2376_v55 }
  0xa2   : > { %v746_v35 = vpack.c.bf16 %v2002_v26, %v2001_v27  ;;  %v2287_v26 = vld [vmem:[%s2935_s5 + $0x68] sm:$0xff] }
  0xa3   : > { %v2295_v27 = vld [vmem:[%s2935_s5 + $0xa8] sm:$0xff] }
  0xa6   : > { %v561_v36 = vpop.permute.xlu2 %560 }
  0xa7   : > { %v663_v2 = vpop.permute.xlu1 %662  ;;  %v546_v3 = vpop.permute.xlu0 %545 }
  0xa8   : > { %vm701_vm7 = vcmp.eq.s32.totalorder %v2588_v51, %v663_v2  ;;  %vm582_vm8 = vcmp.eq.s32.totalorder %v2588_v51, %v546_v3 }
  0xa9   : > { %v2003_v4 = vsel %vm701_vm7, 1.0, %v2376_v55  ;;  %v1988_v5 = vsel %vm582_vm8, 1.0, %v2376_v55  ;;  %vm587_vm8 = vcmp.eq.s32.totalorder %v2588_v51, %v561_v36  ;;  %v2292_v36 = vld [vmem:[%s2935_s5 + $0x90] sm:$0xff] }
  0xaa   : > { %v747_v7 = vpack.c.bf16 %v2004_v63, %v2003_v4  ;;  %v627_v8 = vpack.c.bf16 %v1988_v5, %v1987_v62  ;;  %v1993_v57 = vsel %vm587_vm8, 1.0, %v2376_v55  ;;  %v2280_v63 = vld [vmem:[%s2935_s5 + $0x30] sm:$0xff]  ;;  %v2278_v5 = vld [vmem:[%s2935_s5 + $0x20] sm:$0xff] }
  0xab   : > { %1134 = vmatpush.bf16.msrb.mxu3 %v2280_v63  ;;  %v950_v63 = vld [vmem:[%s2480_s24 + $0x10] sm:$0xff] }
  0xac   : > { %2016 = vmatmul.msk.bf16.gmra.mxu0 %vm753_vm2, %v626_v6  ;;  %2017 = vmatmul.msk.bf16.vlgmr.msra.gmra.mxu3 %vm753_vm2, %v627_v8 }
  0xad   : > { %2025 = vmatmul.msk.bf16.vlgmr.msra.gmra.mxu1 %vm753_vm2, %v747_v7 }
  0xae   : > { %v684_v52 = vpop.permute.xlu2 %683 }
  0xaf   : > { %v552_v9 = vpop.permute.xlu1 %551  ;;  %v549_v10 = vpop.permute.xlu0 %548  ;;  %vm708_vm9 = vcmp.eq.s32.totalorder %v2588_v51, %v684_v52  ;;  %1135 = vmatpush.bf16.msrb.mxu3 %v2279_v1  ;;  %v2290_v52 = vld [vmem:[%s2935_s5 + $0x80] sm:$0xff] }
  0xb0   : > { %vm584_vm11 = vcmp.eq.s32.totalorder %v2588_v51, %v552_v9  ;;  %vm583_vm12 = vcmp.eq.s32.totalorder %v2588_v51, %v549_v10  ;;  %v2010_v58 = vsel %vm708_vm9, 1.0, %v2376_v55 }
  0xb1   : > { %v1990_v14 = vsel %vm584_vm11, 1.0, %v2376_v55  ;;  %v1989_v15 = vsel %vm583_vm12, 1.0, %v2376_v55 }
  0xb2   : > { %v628_v21 = vpack.c.bf16 %v1990_v14, %v1989_v15 }
  0xb3   : > { %1136 = vmatpush.bf16.msrb.mxu3 %v2278_v5 }
  0xb6   : > { %v687_v2 = vpop.permute.xlu2 %686 }
  0xb7   : > { %v672_v16 = vpop.permute.xlu0 %671  ;;  %v555_v17 = vpop.permute.xlu1 %554  ;;  %vm709_vm13 = vcmp.eq.s32.totalorder %v2588_v51, %v687_v2  ;;  %1137 = vmatpush.bf16.msrb.mxu3 %v2277_v11 }
  0xb8   : > { %vm704_vm14 = vcmp.eq.s32.totalorder %v2588_v51, %v672_v16  ;;  %vm585_vm1 = vcmp.eq.s32.totalorder %v2588_v51, %v555_v17  ;;  %v2011_v8 = vsel %vm709_vm13, 1.0, %v2376_v55 }
  0xb9   : > { %v2006_v19 = vsel %vm704_vm14, 1.0, %v2376_v55  ;;  %v1991_v28 = vsel %vm585_vm1, 1.0, %v2376_v55 }
  0xba   : > { %v748_v22 = vpack.c.bf16 %v2006_v19, %v2005_v18  ;;  %v629_v46 = vpack.c.bf16 %v1992_v31, %v1991_v28  ;;  %v2276_v18 = vld [vmem:[%s2935_s5 + $0x10] sm:$0xff]  ;;  %v2286_v28 = vld [vmem:[%s2935_s5 + $0x60] sm:$0xff]  ;;  %v2293_v31 = vld [vmem:[%s2935_s5 + $0x98] sm:$0xff] }
  0xbb   : > { %1138 = vmatpush.bf16.msrb.mxu3 %v2276_v18 }
  0xbc   : > { %2018 = vmatmul.msk.bf16.gmra.mxu3 %vm753_vm2, %v628_v21  ;;  %2023 = vmatmul.msk.bf16.vlgmr.msrb.gmra.mxu0 %vm753_vm2, %v745_v20  ;;  %v2275_v21 = vld [vmem:[%s2935_s5 + $0x8] sm:$0xff] }
  0xbd   : > { %2026 = vmatmul.msk.bf16.gmra.mxu1 %vm753_vm2, %v748_v22 }
  0xbe   : > { %v576_v14 = vpop.permute.xlu2 %575 }
  0xbf   : > { %v678_v24 = vpop.permute.xlu1 %677  ;;  %v675_v25 = vpop.permute.xlu0 %674  ;;  %vm592_vm1 = vcmp.eq.s32.totalorder %v2588_v51, %v576_v14  ;;  %1139 = vmatpush.bf16.msrb.mxu3 %v2275_v21 }
  0xc0   : > { %vm706_vm3 = vcmp.eq.s32.totalorder %v2588_v51, %v678_v24  ;;  %vm705_vm4 = vcmp.eq.s32.totalorder %v2588_v51, %v675_v25  ;;  %v1998_v19 = vsel %vm592_vm1, 1.0, %v2376_v55  ;;  %v2288_v24 = vld [vmem:[%s2935_s5 + $0x70] sm:$0xff] }
  0xc1   : > { %v2008_v29 = vsel %vm706_vm3, 1.0, %v2376_v55  ;;  %v2007_v30 = vsel %vm705_vm4, 1.0, %v2376_v55  ;;  %v2296_v25 = vld [vmem:[%s2935_s5 + $0xb0] sm:$0xff] }
  0xc2   : > { %v749_v48 = vpack.c.bf16 %v2008_v29, %v2007_v30  ;;  %1231 = vmatpush.bf16.msra.mxu0 %v2296_v25  ;;  %v2294_v29 = vld [vmem:[%s2935_s5 + $0xa0] sm:$0xff]  ;;  %v2285_v30 = vld [vmem:[%s2935_s5 + $0x58] sm:$0xff] }
  0xc6   : > { %1232 = vmatpush.bf16.msra.mxu0 %v2295_v27  ;;  %v957_v27 = vld [vmem:[%s2480_s24 + $0x48] sm:$0xff] }
  0xc7   : > { %v564_v49 = vpop.permute.xlu0 %563  ;;  %v681_v50 = vpop.permute.xlu1 %680 }
  0xc8   : > { %vm588_vm6 = vcmp.eq.s32.totalorder %v2588_v51, %v564_v49  ;;  %vm707_vm7 = vcmp.eq.s32.totalorder %v2588_v51, %v681_v50  ;;  %v2291_v49 = vld [vmem:[%s2935_s5 + $0x88] sm:$0xff]  ;;  %v2282_v50 = vld [vmem:[%s2935_s5 + $0x40] sm:$0xff] }
  0xc9   : > { %v1994_v53 = vsel %vm588_vm6, 1.0, %v2376_v55  ;;  %v2009_v54 = vsel %vm707_vm7, 1.0, %v2376_v55 }
  0xca   : > { %v630_v59 = vpack.c.bf16 %v1994_v53, %v1993_v57  ;;  %v750_v60 = vpack.c.bf16 %v2010_v58, %v2009_v54  ;;  %1233 = vmatpush.bf16.msra.mxu0 %v2294_v29  ;;  %v949_v57 = vld [vmem:[%s2480_s24 + $0x8] sm:$0xff] }
  0xcc   : > { %2019 = vmatmul.msk.bf16.gmra.mxu3 %vm753_vm2, %v629_v46  ;;  %2024 = vmatmul.msk.bf16.gmra.mxu0 %vm753_vm2, %v746_v35  ;;  %v2284_v35 = vld [vmem:[%s2935_s5 + $0x50] sm:$0xff] }
  0xcd   : > { %2027 = vmatmul.msk.bf16.gmra.mxu1 %vm753_vm2, %v749_v48  ;;  %v2283_v48 = vld [vmem:[%s2935_s5 + $0x48] sm:$0xff] }
  0xce   : > { %1234 = vmatpush.bf16.msra.mxu0 %v2293_v31 }
  0xcf   : > { %v567_v56 = vpop.permute.xlu0 %566  ;;  %v570_v62 = vpop.permute.xlu1 %569 }
  0xd0   : > { %vm590_vm10 = vcmp.eq.s32.totalorder %v2588_v51, %v570_v62  ;;  %vm589_vm11 = vcmp.eq.s32.totalorder %v2588_v51, %v567_v56  ;;  %v948_v56 = vld [vmem:[%s2480_s24] sm:$0xff] }
  0xd1   : > { %v1996_v3 = vsel %vm590_vm10, 1.0, %v2376_v55  ;;  %v1995_v4 = vsel %vm589_vm11, 1.0, %v2376_v55  ;;  %v964_v58 = vpack.c.bf16 %v949_v57, %v948_v56  ;;  %v960_v57 = vld [vmem:[%s2480_s24 + $0x60] sm:$0xff] }
  0xd2   : > { %v631_v9 = vpack.c.bf16 %v1996_v3, %v1995_v4  ;;  %1235 = vmatpush.bf16.msra.mxu0 %v2292_v36 }
  0xd6   : > { %1236 = vmatpush.bf16.msra.mxu0 %v2291_v49 }
  0xd7   : > { %v690_v0 = vpop.permute.xlu0 %689  ;;  %v573_v6 = vpop.permute.xlu1 %572 }
  0xd8   : > { %vm710_vm12 = vcmp.eq.s32.totalorder %v2588_v51, %v690_v0  ;;  %vm591_vm14 = vcmp.eq.s32.totalorder %v2588_v51, %v573_v6  ;;  %v951_v0 = vld [vmem:[%s2480_s24 + $0x18] sm:$0xff] }
  0xd9   : > { %v2012_v7 = vsel %vm710_vm12, 1.0, %v2376_v55  ;;  %v1997_v15 = vsel %vm591_vm14, 1.0, %v2376_v55  ;;  %v965_v1 = vpack.c.bf16 %v951_v0, %v950_v63 }
  0xda   : > { %v751_v10 = vpack.c.bf16 %v2012_v7, %v2011_v8  ;;  %v632_v20 = vpack.c.bf16 %v1998_v19, %v1997_v15  ;;  %1237 = vmatpush.bf16.msra.mxu0 %v2290_v52  ;;  %v954_v19 = vld [vmem:[%s2480_s24 + $0x30] sm:$0xff] }
  0xdc   : > { %2020 = vmatmul.msk.bf16.gmra.mxu3 %vm753_vm2, %v630_v59 }
  0xdd   : > { %2028 = vmatmul.msk.bf16.gmra.mxu1 %vm753_vm2, %v750_v60  ;;  %1238 = vmatmul.bf16.vlgmr.msra.gmra.mxu0 %v964_v58  ;;  %v961_v58 = vld [vmem:[%s2480_s24 + $0x68] sm:$0xff] }
  0xdf   : > { %v696_v12 = vpop.permute.xlu1 %695  ;;  %v693_v13 = vpop.permute.xlu0 %692 }
  0xe0   : > { %vm712_vm15 = vcmp.eq.s32.totalorder %v2588_v51, %v696_v12  ;;  %vm711_vm0 = vcmp.eq.s32.totalorder %v2588_v51, %v693_v13  ;;  %v2274_v51 = vld [vmem:[%s2935_s5] sm:$0xff] }
  0xe1   : > { %v2014_v16 = vsel %vm712_vm15, 1.0, %v2376_v55  ;;  %v2013_v17 = vsel %vm711_vm0, 1.0, %v2376_v55  ;;  %1140 = vmatpush.bf16.msrb.mxu3 %v2274_v51  ;;  %v2289_v55 = vld [vmem:[%s2935_s5 + $0x78] sm:$0xff] }
  0xe2   : > { %v752_v22 = vpack.c.bf16 %v2014_v16, %v2013_v17  ;;  %1036 = vmatpush.bf16.msra.mxu2 %v2289_v55 }
  0xe6   : > { %1037 = vmatpush.bf16.msra.mxu2 %v2288_v24 }
  0xea   : > { %1038 = vmatpush.bf16.msra.mxu2 %v2287_v26  ;;  %v956_v26 = vld [vmem:[%s2480_s24 + $0x40] sm:$0xff] }
  0xec   : > { %2021 = vmatmul.msk.bf16.gmra.mxu3 %vm753_vm2, %v631_v9  ;;  %v952_v9 = vld [vmem:[%s2480_s24 + $0x20] sm:$0xff] }
  0xed   : > { %2029 = vmatmul.msk.bf16.gmra.mxu1 %vm753_vm2, %v751_v10  ;;  %1243 = vmatmul.bf16.gmra.mxu0 %v965_v1  ;;  %v953_v10 = vld [vmem:[%s2480_s24 + $0x28] sm:$0xff] }
  0xee   : > { %1039 = vmatpush.bf16.msra.mxu2 %v2286_v28  ;;  %v966_v11 = vpack.c.bf16 %v953_v10, %v952_v9  ;;  %v968_v28 = vpack.c.bf16 %v957_v27, %v956_v26  ;;  %v2785_v27 = vld [vmem:[%s2936_s6] ss:$0 sm:$0xff] }
  0xf2   : > { %1040 = vmatpush.bf16.msra.mxu2 %v2285_v30 }
  0xf6   : > { %1041 = vmatpush.bf16.msra.mxu2 %v2284_v35 }
  0xfa   : > { %1042 = vmatpush.bf16.msra.mxu2 %v2283_v48  ;;  %v959_v48 = vld [vmem:[%s2480_s24 + $0x58] sm:$0xff] }
  0xfc   : > { %2022 = vmatmul.msk.bf16.gmra.mxu3 %vm753_vm2, %v632_v20  ;;  %v955_v20 = vld [vmem:[%s2480_s24 + $0x38] sm:$0xff] }
  0xfd   : > { %2030 = vmatmul.msk.bf16.gmra.mxu1 %vm753_vm2, %v752_v22  ;;  %1248 = vmatmul.bf16.gmra.mxu0 %v966_v11  ;;  %v967_v21 = vpack.c.bf16 %v955_v20, %v954_v19  ;;  %v2302_v11 = vld [vmem:[%s2937_s7 + $0x20] sm:$0xff] }
  0xfe   : > { %1043 = vmatpush.bf16.msra.mxu2 %v2282_v50 }
 0x10d   : > { %1253 = vmatmul.bf16.gmra.mxu0 %v967_v21  ;;  %v2298_v21 = vld [vmem:[%s2937_s7] sm:$0xff] }
 0x119   : > { %v787_v46 = vpop.f32.mrf.mxu0 }
 0x11d   : > { %1258 = vmatmul.bf16.gmra.mxu0 %v968_v28 }
 0x121   : > { %v789_v53 = vpop.f32.mrf.mxu0 }
 0x122   : > { %v972_v54 = vpack.c.bf16 %v789_v53, %v787_v46  ;;  %v958_v46 = vld [vmem:[%s2480_s24 + $0x50] sm:$0xff] }
 0x123   : > { %v969_v50 = vpack.c.bf16 %v959_v48, %v958_v46 }
 0x124   : > { %1141 = vmatmul.bf16.vlgmr.msrb.gmra.mxu3 %v972_v54 }
 0x129   : > { %v792_v59 = vpop.f32.mrf.mxu0 }
 0x12a   : > { %v870_v5 = vpop.f32.mrf.mxu1 }
 0x12d   : > { %1263 = vmatmul.bf16.gmra.mxu0 %v969_v50 }
 0x12f   : > { %v797_v60 = vpop.f32.mrf.mxu3 }
 0x131   : > { %v794_v61 = vpop.f32.mrf.mxu0 }
 0x132   : > { %v973_v62 = vpack.c.bf16 %v794_v61, %v792_v59  ;;  %v872_v14 = vpop.f32.mrf.mxu1  ;;  %v970_v59 = vpack.c.bf16 %v961_v58, %v960_v57 }
 0x133   : > { %v982_v25 = vpack.c.bf16 %v872_v14, %v870_v5  ;;  %v2305_v5 = vld [vmem:[%s2937_s7 + $0x38] sm:$0xff] }
 0x134   : > { %1146 = vmatmul.bf16.gmra.mxu3 %v973_v62  ;;  %1407 = vmatpush.bf16.msrb.mxu1 %v2305_v5 }
 0x137   : > { %v799_v2 = vpop.f32.mrf.mxu3 }
 0x138   : > { %v974_v8 = vpack.c.bf16 %v799_v2, %v797_v60  ;;  %v962_v2 = vld [vmem:[%s2480_s24 + $0x70] sm:$0xff] }
 0x139   : > { %v860_v3 = vpop.f32.mrf.mxu0 }
 0x13a   : > { %v875_v22 = vpop.f32.mrf.mxu1 }
 0x13d   : > { %1268 = vmatmul.bf16.gmra.mxu0 %v970_v59 }
 0x13f   : > { %v802_v4 = vpop.f32.mrf.mxu3 }
 0x141   : > { %v862_v6 = vpop.f32.mrf.mxu0 }
 0x142   : > { %v980_v7 = vpack.c.bf16 %v862_v6, %v860_v3  ;;  %v877_v55 = vpop.f32.mrf.mxu1  ;;  %v963_v3 = vld [vmem:[%s2480_s24 + $0x78] sm:$0xff] }
 0x143   : > { %v983_v36 = vpack.c.bf16 %v877_v55, %v875_v22 }
 0x144   : > { %1044 = vmatmul.bf16.vlgmr.msra.gmra.mxu2 %v980_v7  ;;  %1151 = vmatmul.bf16.gmra.mxu3 %v974_v8  ;;  %v2304_v7 = vld [vmem:[%s2937_s7 + $0x30] sm:$0xff]  ;;  %v2303_v8 = vld [vmem:[%s2937_s7 + $0x28] sm:$0xff] }
 0x145   : > { %1408 = vmatpush.bf16.msrb.mxu1 %v2304_v7 }
 0x147   : > { %v804_v12 = vpop.f32.mrf.mxu3 }
 0x148   : > { %v975_v18 = vpack.c.bf16 %v804_v12, %v802_v4  ;;  %v971_v4 = vpack.c.bf16 %v963_v3, %v962_v2 }
 0x149   : > { %v865_v13 = vpop.f32.mrf.mxu0  ;;  %1409 = vmatpush.bf16.msrb.mxu1 %v2303_v8 }
 0x14a   : > { %v880_v30 = vpop.f32.mrf.mxu1 }
 0x14d   : > { %1273 = vmatmul.bf16.gmra.mxu0 %v971_v4  ;;  %1410 = vmatpush.bf16.msrb.mxu1 %v2302_v11 }
 0x14f   : > { %v807_v15 = vpop.f32.mrf.mxu3 }
 0x151   : > { %v867_v16 = vpop.f32.mrf.mxu0 }
 0x152   : > { %v981_v17 = vpack.c.bf16 %v867_v16, %v865_v13  ;;  %v882_v49 = vpop.f32.mrf.mxu1  ;;  %v2301_v13 = vld [vmem:[%s2937_s7 + $0x18] sm:$0xff] }
 0x153   : > { %v984_v54 = vpack.c.bf16 %v882_v49, %v880_v30  ;;  %1411 = vmatpush.bf16.msrb.mxu1 %v2301_v13 }
 0x154   : > { %1049 = vmatmul.bf16.gmra.mxu2 %v981_v17  ;;  %1156 = vmatmul.bf16.gmra.mxu3 %v975_v18  ;;  %v2299_v18 = vld [vmem:[%s2937_s7 + $0x8] sm:$0xff] }
 0x157   : > { %v809_v51 = vpop.f32.mrf.mxu3 }
 0x158   : > { %v976_v24 = vpack.c.bf16 %v809_v51, %v807_v15  ;;  %v2300_v15 = vld [vmem:[%s2937_s7 + $0x10] sm:$0xff] }
 0x159   : > { %1412 = vmatpush.bf16.msrb.mxu1 %v2300_v15 }
 0x15a   : > { %v885_v53 = vpop.f32.mrf.mxu1  ;;  %v1239_v14 = vpop.f32.mrf.mxu0 }
 0x15d   : > { %1413 = vmatpush.bf16.msrb.mxu1 %v2299_v18 }
 0x15f   : > { %v812_v23 = vpop.f32.mrf.mxu3 }
 0x161   : > { %1414 = vmatpush.bf16.msrb.mxu1 %v2298_v21 }
 0x162   : > { %v887_v61 = vpop.f32.mrf.mxu1  ;;  %v1241_v20 = vpop.f32.mrf.mxu0 }
 0x163   : > { %v985_v0 = vpack.c.bf16 %v887_v61, %v885_v53 }
 0x164   : > { %1054 = vmatmul.bf16.gmra.mxu2 %v982_v25  ;;  %1161 = vmatmul.bf16.gmra.mxu3 %v976_v24 }
 0x167   : > { %v814_v29 = vpop.f32.mrf.mxu3 }
 0x168   : > { %v977_v35 = vpack.c.bf16 %v814_v29, %v812_v23 }
 0x16a   : > { %v890_v63 = vpop.f32.mrf.mxu1  ;;  %v1244_v51 = vpop.f32.mrf.mxu0 }
 0x16f   : > { %v817_v31 = vpop.f32.mrf.mxu3 }
 0x172   : > { %v892_v6 = vpop.f32.mrf.mxu1  ;;  %v1246_v24 = vpop.f32.mrf.mxu0 }
 0x173   : > { %v986_v9 = vpack.c.bf16 %v892_v6, %v890_v63 }
 0x174   : > { %1059 = vmatmul.bf16.gmra.mxu2 %v983_v36  ;;  %1166 = vmatmul.bf16.gmra.mxu3 %v977_v35 }
 0x177   : > { %v819_v52 = vpop.f32.mrf.mxu3 }
 0x178   : > { %v978_v56 = vpack.c.bf16 %v819_v52, %v817_v31 }
 0x17a   : > { %v895_v10 = vpop.f32.mrf.mxu1  ;;  %v1249_v36 = vpop.f32.mrf.mxu0 }
 0x17f   : > { %v822_v60 = vpop.f32.mrf.mxu3 }
 0x182   : > { %v897_v16 = vpop.f32.mrf.mxu1 }
 0x183   : > { %v987_v17 = vpack.c.bf16 %v897_v16, %v895_v10 }
 0x184   : > { %1064 = vmatmul.bf16.gmra.mxu2 %v984_v54  ;;  %1171 = vmatmul.bf16.gmra.mxu3 %v978_v56  ;;  %v1251_v56 = vpop.f32.mrf.mxu0 }
 0x187   : > { %v824_v62 = vpop.f32.mrf.mxu3 }
 0x188   : > { %v979_v1 = vpack.c.bf16 %v824_v62, %v822_v60 }
 0x18c   : > { %v1254_v3 = vpop.f32.mrf.mxu0 }
 0x194   : > { %1069 = vmatmul.bf16.gmra.mxu2 %v985_v0  ;;  %1176 = vmatmul.bf16.gmra.mxu3 %v979_v1  ;;  %v1256_v10 = vpop.f32.mrf.mxu0 }
 0x1a4   : > { %1074 = vmatmul.bf16.gmra.mxu2 %v986_v9 }
 0x1a7   : > { %v1142_v12 = vpop.f32.mrf.mxu3 }
 0x1af   : > { %v1144_v19 = vpop.f32.mrf.mxu3 }
 0x1b4   : > { %1079 = vmatmul.bf16.gmra.mxu2 %v987_v17 }
 0x1b7   : > { %v1147_v22 = vpop.f32.mrf.mxu3 }
 0x1bf   : > { %v1149_v55 = vpop.f32.mrf.mxu3 }
 0x1c7   : > { %v1045_v23 = vpop.f32.mrf.mxu2  ;;  %v1152_v30 = vpop.f32.mrf.mxu3 }
 0x1c8   : > { %v1143_v25 = vadd.f32 %v1142_v12, %v1045_v23 }
 0x1ca   : > { %v1279_v26 = vadd.f32 %v1239_v14, %v1143_v25 }
 0x1cc   : > { %v1299_v31 = vadd.f32 %v2785_v27, %v1279_v26 }
 0x1ce   : > { %v1315_v48 = vmax.f32 %v1299_v31, 0.0 }
 0x1cf   : > { %v1047_v28 = vpop.f32.mrf.mxu2  ;;  %v1154_v54 = vpop.f32.mrf.mxu3 }
 0x1d0   : > { %v1145_v29 = vadd.f32 %v1144_v19, %v1047_v28 }
 0x1d2   : > { %v1280_v35 = vadd.f32 %v1241_v20, %v1145_v29  ;;  %v1259_v20 = vpop.f32.mrf.mxu0 }
 0x1d4   : > { %v1300_v46 = vadd.f32 %v2785_v27, %v1280_v35 }
 0x1d6   : > { %v1316_v49 = vmax.f32 %v1300_v46, 0.0 }
 0x1d7   : > { %v1050_v50 = vpop.f32.mrf.mxu2  ;;  %v1157_v63 = vpop.f32.mrf.mxu3 }
 0x1d8   : > { %v1331_v52 = vpack.c.bf16 %v1316_v49, %v1315_v48  ;;  %v1148_v53 = vadd.f32 %v1147_v22, %v1050_v50 }
 0x1da   : > { %1415 = vmatmul.bf16.vlgmr.msrb.gmra.mxu1 %v1331_v52  ;;  %v1281_v57 = vadd.f32 %v1244_v51, %v1148_v53  ;;  %v1261_v26 = vpop.f32.mrf.mxu0 }
 0x1dc   : > { %v1301_v61 = vadd.f32 %v2785_v27, %v1281_v57 }
 0x1de   : > { %v1317_v0 = vmax.f32 %v1301_v61, 0.0 }
 0x1df   : > { %v1052_v58 = vpop.f32.mrf.mxu2  ;;  %v1159_v7 = vpop.f32.mrf.mxu3 }
 0x1e0   : > { %v1150_v59 = vadd.f32 %v1149_v55, %v1052_v58 }
 0x1e2   : > { %v1282_v60 = vadd.f32 %v1246_v24, %v1150_v59  ;;  %v1264_v49 = vpop.f32.mrf.mxu0 }
 0x1e4   : > { %v1302_v62 = vadd.f32 %v2785_v27, %v1282_v60 }
 0x1e6   : > { %v1318_v1 = vmax.f32 %v1302_v62, 0.0 }
 0x1e7   : > { %v1055_v2 = vpop.f32.mrf.mxu2  ;;  %v1162_v18 = vpop.f32.mrf.mxu3 }
 0x1e8   : > { %v1332_v4 = vpack.c.bf16 %v1318_v1, %v1317_v0  ;;  %v1153_v5 = vadd.f32 %v1152_v30, %v1055_v2 }
 0x1ea   : > { %1420 = vmatmul.bf16.gmra.mxu1 %v1332_v4  ;;  %v1283_v6 = vadd.f32 %v1249_v36, %v1153_v5  ;;  %v1266_v61 = vpop.f32.mrf.mxu0 }
 0x1ec   : > { %v1303_v12 = vadd.f32 %v2785_v27, %v1283_v6 }
 0x1ee   : > { %v1319_v14 = vmax.f32 %v1303_v12, 0.0 }
 0x1ef   : > { %v1057_v8 = vpop.f32.mrf.mxu2  ;;  %v1164_v24 = vpop.f32.mrf.mxu3 }
 0x1f0   : > { %v1155_v9 = vadd.f32 %v1154_v54, %v1057_v8 }
 0x1f2   : > { %v1284_v11 = vadd.f32 %v1251_v56, %v1155_v9  ;;  %v1269_v5 = vpop.f32.mrf.mxu0 }
 0x1f4   : > { %v1304_v13 = vadd.f32 %v2785_v27, %v1284_v11 }
 0x1f6   : > { %v1320_v15 = vmax.f32 %v1304_v13, 0.0 }
 0x1f7   : > { %v1060_v16 = vpop.f32.mrf.mxu2  ;;  %v1167_v36 = vpop.f32.mrf.mxu3 }
 0x1f8   : > { %v1333_v17 = vpack.c.bf16 %v1320_v15, %v1319_v14  ;;  %v1158_v19 = vadd.f32 %v1157_v63, %v1060_v16 }
 0x1fa   : > { %1425 = vmatmul.bf16.gmra.mxu1 %v1333_v17  ;;  %v1285_v21 = vadd.f32 %v1254_v3, %v1158_v19  ;;  %v1271_v13 = vpop.f32.mrf.mxu0 }
 0x1fc   : > { %v1305_v23 = vadd.f32 %v2785_v27, %v1285_v21 }
 0x1fe   : > { %v1321_v28 = vmax.f32 %v1305_v23, 0.0 }
 0x1ff   : > { %v1062_v22 = vpop.f32.mrf.mxu2  ;;  %v1169_v58 = vpop.f32.mrf.mxu3 }
 0x200   : > { %v1160_v51 = vadd.f32 %v1159_v7, %v1062_v22 }
 0x202   : > { %v1286_v55 = vadd.f32 %v1256_v10, %v1160_v51  ;;  %v1274_v51 = vpop.f32.mrf.mxu0 }
 0x204   : > { %v1306_v25 = vadd.f32 %v2785_v27, %v1286_v55 }
 0x206   : > { %v1322_v29 = vmax.f32 %v1306_v25, 0.0 }
 0x207   : > { %v1065_v30 = vpop.f32.mrf.mxu2  ;;  %v1172_v2 = vpop.f32.mrf.mxu3 }
 0x208   : > { %v1334_v31 = vpack.c.bf16 %v1322_v29, %v1321_v28  ;;  %v1163_v35 = vadd.f32 %v1162_v18, %v1065_v30 }
 0x20a   : > { %1430 = vmatmul.bf16.gmra.mxu1 %v1334_v31  ;;  %v1287_v46 = vadd.f32 %v1259_v20, %v1163_v35  ;;  %v1276_v30 = vpop.f32.mrf.mxu0 }
 0x20c   : > { %v1307_v53 = vadd.f32 %v2785_v27, %v1287_v46 }
 0x20e   : > { %v1323_v56 = vmax.f32 %v1307_v53, 0.0 }
 0x20f   : > { %v1067_v48 = vpop.f32.mrf.mxu2  ;;  %v1174_v12 = vpop.f32.mrf.mxu3 }
 0x210   : > { %v1165_v50 = vadd.f32 %v1164_v24, %v1067_v48 }
 0x212   : > { %v1288_v52 = vadd.f32 %v1261_v26, %v1165_v50 }
 0x214   : > { %v1308_v54 = vadd.f32 %v2785_v27, %v1288_v52 }
 0x216   : > { %v1324_v57 = vmax.f32 %v1308_v54, 0.0 }
 0x217   : > { %v1070_v59 = vpop.f32.mrf.mxu2  ;;  %v1177_v20 = vpop.f32.mrf.mxu3 }
 0x218   : > { %v1335_v60 = vpack.c.bf16 %v1324_v57, %v1323_v56  ;;  %v1168_v62 = vadd.f32 %v1167_v36, %v1070_v59 }
 0x21a   : > { %1435 = vmatmul.bf16.gmra.mxu1 %v1335_v60  ;;  %v1289_v63 = vadd.f32 %v1264_v49, %v1168_v62 }
 0x21c   : > { %v1309_v4 = vadd.f32 %v2785_v27, %v1289_v63 }
 0x21e   : > { %v1325_v7 = vmax.f32 %v1309_v4, 0.0 }
 0x21f   : > { %v1072_v0 = vpop.f32.mrf.mxu2  ;;  %v1179_v26 = vpop.f32.mrf.mxu3 }
 0x220   : > { %v1170_v1 = vadd.f32 %v1169_v58, %v1072_v0 }
 0x222   : > { %v1290_v3 = vadd.f32 %v1266_v61, %v1170_v1 }
 0x224   : > { %v1310_v6 = vadd.f32 %v2785_v27, %v1290_v3 }
 0x226   : > { %v1326_v8 = vmax.f32 %v1310_v6, 0.0 }
 0x227   : > { %v1075_v9 = vpop.f32.mrf.mxu2 }
 0x228   : > { %v1336_v10 = vpack.c.bf16 %v1326_v8, %v1325_v7  ;;  %v1173_v11 = vadd.f32 %v1172_v2, %v1075_v9 }
 0x22a   : > { %1440 = vmatmul.bf16.gmra.mxu1 %v1336_v10  ;;  %v1291_v14 = vadd.f32 %v1269_v5, %v1173_v11 }
 0x22c   : > { %v1311_v17 = vadd.f32 %v2785_v27, %v1291_v14 }
 0x22e   : > { %v1327_v21 = vmax.f32 %v1311_v17, 0.0 }
 0x22f   : > { %v1077_v15 = vpop.f32.mrf.mxu2 }
 0x230   : > { %v1175_v16 = vadd.f32 %v1174_v12, %v1077_v15 }
 0x232   : > { %v1292_v18 = vadd.f32 %v1271_v13, %v1175_v16 }
 0x234   : > { %v1312_v19 = vadd.f32 %v2785_v27, %v1292_v18 }
 0x236   : > { %v1328_v22 = vmax.f32 %v1312_v19, 0.0 }
 0x237   : > { %v1080_v55 = vpop.f32.mrf.mxu2 }
 0x238   : > { %v1337_v23 = vpack.c.bf16 %v1328_v22, %v1327_v21  ;;  %v1178_v24 = vadd.f32 %v1177_v20, %v1080_v55 }
 0x23a   : > { %1445 = vmatmul.bf16.gmra.mxu1 %v1337_v23  ;;  %v1293_v25 = vadd.f32 %v1274_v51, %v1178_v24 }
 0x23c   : > { %v1313_v31 = vadd.f32 %v2785_v27, %v1293_v25 }
 0x23e   : > { %v1329_v46 = vmax.f32 %v1313_v31, 0.0 }
 0x23f   : > { %v1082_v28 = vpop.f32.mrf.mxu2 }
 0x240   : > { %v1180_v29 = vadd.f32 %v1179_v26, %v1082_v28 }
 0x242   : > { %v1294_v35 = vadd.f32 %v1276_v30, %v1180_v29 }
 0x244   : > { %v1314_v36 = vadd.f32 %v2785_v27, %v1294_v35  ;;  %v2362_v27 = vld [vmem:[%s2938_s8] ss:$0 sm:$0xff] }
 0x246   : > { %v1330_v48 = vmax.f32 %v1314_v36, 0.0  ;;  %v1473_v36 = vshrl.u32 %v511_v47, 7 }
 0x248   : > { %v1338_v49 = vpack.c.bf16 %v1330_v48, %v1329_v46  ;;  %v2363_v46 = vld [vmem:[%s479_s14] ss:$0 sm:$0xff]  ;;  %v1476_v47 = vadd.s32 24, %v1473_v36 }
 0x249   : > { %vm1483_vm2 = vcmp.eq.s32.totalorder %v1473_v36, %v2363_v46 }
 0x24a   : > { %1450 = vmatmul.bf16.gmra.mxu1 %v1338_v49  ;;  %vm1486_vm5 = vcmp.eq.s32.totalorder %v1476_v47, %v2363_v46 }
 0x257   : > { %v1416_v50 = vpop.f32.mrf.mxu1 }
 0x258   : > { %v1417_v31 = vadd.f32 %v2362_v27, %v1416_v50  ;;  %v1475_v50 = vadd.s32 16, %v1473_v36 }
 0x25a   : > { %v1456_v49 = vmax.f32 %v1417_v31, 0.0  ;;  %vm1485_vm4 = vcmp.eq.s32.totalorder %v1475_v50, %v2363_v46 }
 0x25f   : > { %v1418_v52 = vpop.f32.mrf.mxu1 }
 0x260   : > { %v1419_v29 = vadd.f32 %v2362_v27, %v1418_v52  ;;  %v1474_v52 = vadd.s32 8, %v1473_v36 }
 0x262   : > { %v1457_v48 = vmax.f32 %v1419_v29, 0.0  ;;  %vm1484_vm3 = vcmp.eq.s32.totalorder %v1474_v52, %v2363_v46 }
 0x267   : > { %v1421_v53 = vpop.f32.mrf.mxu1 }
 0x268   : > { %v1422_v26 = vadd.f32 %v2362_v27, %v1421_v53  ;;  %v2377_v53 = vmov 1.0  }
 0x26a   : > { %v1458_v35 = vmax.f32 %v1422_v26, 0.0 }
 0x26f   : > { %v1423_v54 = vpop.f32.mrf.mxu1 }
 0x270   : > { %v1424_v24 = vadd.f32 %v2362_v27, %v1423_v54  ;;  %v1477_v54 = vadd.s32 32, %v1473_v36 }
 0x272   : > { %v1459_v30 = vmax.f32 %v1424_v24, 0.0  ;;  %vm1487_vm6 = vcmp.eq.s32.totalorder %v1477_v54, %v2363_v46 }
 0x277   : > { %v1426_v56 = vpop.f32.mrf.mxu1 }
 0x278   : > { %v1427_v55 = vadd.f32 %v2362_v27, %v1426_v56  ;;  %v1478_v56 = vadd.s32 40, %v1473_v36 }
 0x27a   : > { %v1460_v28 = vmax.f32 %v1427_v55, 0.0  ;;  %vm1488_vm7 = vcmp.eq.s32.totalorder %v1478_v56, %v2363_v46 }
 0x27f   : > { %v1428_v57 = vpop.f32.mrf.mxu1 }
 0x280   : > { %v1429_v22 = vadd.f32 %v2362_v27, %v1428_v57  ;;  %v1479_v57 = vadd.s32 48, %v1473_v36 }
 0x282   : > { %v1461_v25 = vmax.f32 %v1429_v22, 0.0  ;;  %vm1489_vm8 = vcmp.eq.s32.totalorder %v1479_v57, %v2363_v46 }
 0x287   : > { %v1431_v58 = vpop.f32.mrf.mxu1 }
 0x288   : > { %v1432_v20 = vadd.f32 %v2362_v27, %v1431_v58  ;;  %v1480_v58 = vadd.s32 56, %v1473_v36 }
 0x28a   : > { %v1462_v23 = vmax.f32 %v1432_v20, 0.0  ;;  %vm1490_vm9 = vcmp.eq.s32.totalorder %v1480_v58, %v2363_v46 }
 0x28f   : > { %v1433_v59 = vpop.f32.mrf.mxu1 }
 0x290   : > { %v1434_v18 = vadd.f32 %v2362_v27, %v1433_v59  ;;  %v1507_v59 = vld [vmem:[#allocation2 + $0x30] sm:$0xff] }
 0x292   : > { %v1463_v51 = vmax.f32 %v1434_v18, 0.0 }
 0x297   : > { %v1436_v60 = vpop.f32.mrf.mxu1 }
 0x298   : > { %v1437_v16 = vadd.f32 %v2362_v27, %v1436_v60 }
 0x29a   : > { %v1464_v21 = vmax.f32 %v1437_v16, 0.0 }
 0x29f   : > { %v1438_v61 = vpop.f32.mrf.mxu1 }
 0x2a0   : > { %v1439_v14 = vadd.f32 %v2362_v27, %v1438_v61 }
 0x2a2   : > { %v1465_v19 = vmax.f32 %v1439_v14, 0.0 }
 0x2a7   : > { %v1441_v62 = vpop.f32.mrf.mxu1 }
 0x2a8   : > { %v1442_v12 = vadd.f32 %v2362_v27, %v1441_v62  ;;  %v1508_v62 = vld [vmem:[#allocation2] sm:$0xff] }
 0x2aa   : > { %v1466_v17 = vmax.f32 %v1442_v12, 0.0  ;;  %v1513_v12 = vld [vmem:[#allocation2 + $0x28] sm:$0xff] }
 0x2af   : > { %v1443_v63 = vpop.f32.mrf.mxu1 }
 0x2b0   : > { %v1444_v10 = vadd.f32 %v2362_v27, %v1443_v63 }
 0x2b2   : > { %v1467_v15 = vmax.f32 %v1444_v10, 0.0 }
 0x2b7   : > { %v1446_v0 = vpop.f32.mrf.mxu1 }
 0x2b8   : > { %v1447_v8 = vadd.f32 %v2362_v27, %v1446_v0 }
 0x2ba   : > { %v1468_v13 = vmax.f32 %v1447_v8, 0.0 }
 0x2bf   : > { %v1448_v1 = vpop.f32.mrf.mxu1 }
 0x2c0   : > { %v1449_v6 = vadd.f32 %v2362_v27, %v1448_v1  ;;  %v1509_v1 = vld [vmem:[#allocation2 + $0x18] sm:$0xff] }
 0x2c2   : > { %v1469_v11 = vmax.f32 %v1449_v6, 0.0  ;;  %v1511_v6 = vld [vmem:[#allocation2 + $0x8] sm:$0xff] }
 0x2c7   : > { %v1451_v2 = vpop.f32.mrf.mxu1 }
 0x2c8   : > { %v1452_v4 = vadd.f32 %v2362_v27, %v1451_v2 }
 0x2ca   : > { %v1470_v9 = vmax.f32 %v1452_v4, 0.0 }
 0x2cf   : > { %v1453_v3 = vpop.f32.mrf.mxu1 }
 0x2d0   : > { %v1454_v5 = vadd.f32 %v2362_v27, %v1453_v3  ;;  %v1510_v3 = vld [vmem:[#allocation2 + $0x10] sm:$0xff] }
 0x2d2   : > { %v1471_v7 = vmax.f32 %v1454_v5, 0.0 }
 0x2d4   : > { %1515 = vmatpush.msrb.mxu2 %v1471_v7 }
 0x2d6   : > { %1516 = vmatpush.msrb.mxu2 %v1470_v9  ;;  %v1512_v9 = vld [vmem:[#allocation2 + $0x20] sm:$0xff] }
 0x2d8   : > { %1517 = vmatpush.msrb.mxu2 %v1469_v11 }
 0x2da   : > { %1518 = vmatpush.msrb.mxu2 %v1468_v13 }
 0x2dc   : > { %1519 = vmatpush.msrb.mxu2 %v1467_v15  ;;  %v1514_v15 = vld [vmem:[#allocation2 + $0x38] sm:$0xff] }
 0x2de   : > { %1520 = vmatpush.msrb.mxu2 %v1466_v17 }
 0x2e0   : > { %1521 = vmatpush.msrb.mxu2 %v1465_v19 }
 0x2e2   : > { %1522 = vmatpush.msrb.mxu2 %v1464_v21 }
 0x2e4   : > { %1523 = vmatpush.msrb.mxu2 %v1463_v51 }
 0x2e6   : > { %1524 = vmatpush.msrb.mxu2 %v1462_v23 }
 0x2e8   : > { %1525 = vmatpush.msrb.mxu2 %v1461_v25 }
 0x2ea   : > { %1526 = vmatpush.msrb.mxu2 %v1460_v28 }
 0x2ec   : > { %1527 = vmatpush.msrb.mxu2 %v1459_v30 }
 0x2ee   : > { %1528 = vmatpush.msrb.mxu2 %v1458_v35 }
 0x2f0   : > { %1529 = vmatpush.msrb.mxu2 %v1457_v48 }
 0x2f2   : > { %1530 = vmatpush.msrb.mxu2 %v1456_v49 }
 0x2f3   : > { %2167 = vmatmul.msk.f32.vlgmr.msrb.gmra.mxu2 %vm1483_vm2, %v2377_v53 }
 0x2fb   : > { %2168 = vmatmul.msk.f32.gmra.mxu2 %vm1484_vm3, %v2377_v53 }
 0x303   : > { %2169 = vmatmul.msk.f32.gmra.mxu2 %vm1485_vm4, %v2377_v53 }
 0x30b   : > { %2170 = vmatmul.msk.f32.gmra.mxu2 %vm1486_vm5, %v2377_v53 }
 0x313   : > { %2171 = vmatmul.msk.f32.gmra.mxu2 %vm1487_vm6, %v2377_v53 }
 0x31b   : > { %2172 = vmatmul.msk.f32.gmra.mxu2 %vm1488_vm7, %v2377_v53 }
 0x323   : > { %2173 = vmatmul.msk.f32.gmra.mxu2 %vm1489_vm8, %v2377_v53 }
 0x32b   : > { %2174 = vmatmul.msk.f32.gmra.mxu2 %vm1490_vm9, %v2377_v53 }
 0x376   : > { %v1532_v60 = vpop.f32.mrf.mxu2 }
 0x377   : > { %v1556_v61 = vadd.f32 %v1532_v60, %v1507_v59 }
 0x379   : > { %1564 = vst [vmem:[#allocation2 + $0x30] sm:$0xff] %v1556_v61 }
 0x37e   : > { %v1535_v63 = vpop.f32.mrf.mxu2 }
 0x37f   : > { %v1557_v0 = vadd.f32 %v1535_v63, %v1508_v62 }
 0x381   : > { %1565 = vst [vmem:[#allocation2] sm:$0xff] %v1557_v0 }
 0x386   : > { %v1538_v2 = vpop.f32.mrf.mxu2 }
 0x387   : > { %v1558_v27 = vadd.f32 %v1538_v2, %v1509_v1 }
 0x389   : > { %1566 = vst [vmem:[#allocation2 + $0x18] sm:$0xff] %v1558_v27 }
 0x38e   : > { %v1541_v4 = vpop.f32.mrf.mxu2 }
 0x38f   : > { %v1559_v5 = vadd.f32 %v1541_v4, %v1510_v3 }
 0x391   : > { %1567 = vst [vmem:[#allocation2 + $0x10] sm:$0xff] %v1559_v5 }
 0x396   : > { %v1544_v7 = vpop.f32.mrf.mxu2 }
 0x397   : > { %v1560_v8 = vadd.f32 %v1544_v7, %v1511_v6 }
 0x399   : > { %1568 = vst [vmem:[#allocation2 + $0x8] sm:$0xff] %v1560_v8 }
 0x39e   : > { %v1547_v10 = vpop.f32.mrf.mxu2 }
 0x39f   : > { %v1561_v11 = vadd.f32 %v1547_v10, %v1512_v9 }
 0x3a1   : > { %1569 = vst [vmem:[#allocation2 + $0x20] sm:$0xff] %v1561_v11 }
 0x3a6   : > { %v1550_v13 = vpop.f32.mrf.mxu2 }
 0x3a7   : > { %v1562_v14 = vadd.f32 %v1550_v13, %v1513_v12 }
 0x3a9   : > { %1570 = vst [vmem:[#allocation2 + $0x28] sm:$0xff] %v1562_v14 }
 0x3ad   : > { %1575 = sbr.rel (%p2175_p6) target bundleno = 1314 (0x522), region = 80 }
 0x3ae   : > { %v1553_v16 = vpop.f32.mrf.mxu2 }
 0x3af   : > { %v1563_v17 = vadd.f32 %v1553_v16, %v1514_v15 }
 0x3b1   : > { %1571 = vst [vmem:[#allocation2 + $0x38] sm:$0xff] %v1563_v17 }
 0x3b2   : > { %v2321_v18 = vld [vmem:[%s2939_s9 + $0x78] sm:$0xff]  ;;  %v2320_v20 = vld [vmem:[%s2939_s9 + $0x70] sm:$0xff]  ;;  %v2319_v22 = vld [vmem:[%s2939_s9 + $0x68] sm:$0xff] }
 0x3b3   : > { %v2313_v19 = vld [vmem:[%s2939_s9 + $0x38] sm:$0xff]  ;;  %1668 = vmatpush.bf16.msra.mxu0 %v2321_v18  ;;  %v2312_v21 = vld [vmem:[%s2939_s9 + $0x30] sm:$0xff]  ;;  %2338 = vmatpush.bf16.msra.mxu3 %v2321_v18  ;;  %v2311_v51 = vld [vmem:[%s2939_s9 + $0x28] sm:$0xff] }
 0x3b4   : > { %1745 = vmatpush.bf16.msra.mxu1 %v2313_v19  ;;  %v2318_v55 = vld [vmem:[%s2939_s9 + $0x60] sm:$0xff]  ;;  %v2317_v24 = vld [vmem:[%s2939_s9 + $0x58] sm:$0xff]  ;;  %v2316_v26 = vld [vmem:[%s2939_s9 + $0x50] sm:$0xff] }
 0x3b5   : > { %v2310_v23 = vld [vmem:[%s2939_s9 + $0x20] sm:$0xff]  ;;  %v2309_v25 = vld [vmem:[%s2939_s9 + $0x18] sm:$0xff]  ;;  %v2308_v28 = vld [vmem:[%s2939_s9 + $0x10] sm:$0xff] }
 0x3b6   : > { %v2315_v29 = vld [vmem:[%s2939_s9 + $0x48] sm:$0xff]  ;;  %v2314_v31 = vld [vmem:[%s2939_s9 + $0x40] sm:$0xff]  ;;  %v1576_v36 = vld [vmem:[#allocation2 + $0x30] sm:$0xff] }
 0x3b7   : > { %1669 = vmatpush.bf16.msra.mxu0 %v2320_v20  ;;  %2339 = vmatpush.bf16.msra.mxu3 %v2320_v20  ;;  %v2307_v30 = vld [vmem:[%s2939_s9 + $0x8] sm:$0xff]  ;;  %v2306_v35 = vld [vmem:[%s2939_s9] sm:$0xff]  ;;  %v1578_v48 = vld [vmem:[#allocation2 + $0x18] sm:$0xff] }
 0x3b8   : > { %1746 = vmatpush.bf16.msra.mxu1 %v2312_v21  ;;  %v1577_v46 = vld [vmem:[#allocation2] sm:$0xff]  ;;  %v1579_v49 = vld [vmem:[#allocation2 + $0x10] sm:$0xff]  ;;  %v1580_v50 = vld [vmem:[#allocation2 + $0x8] sm:$0xff] }
 0x3b9   : > { %v1616_v53 = vpack.c.bf16 %v1577_v46, %v1576_v36  ;;  %v1617_v52 = vpack.c.bf16 %v1579_v49, %v1578_v48  ;;  %v1581_v47 = vld [vmem:[#allocation2 + $0x20] sm:$0xff]  ;;  %v2329_v56 = vld [vmem:[%s2941_s11 + $0x38] sm:$0xff]  ;;  %v2328_v57 = vld [vmem:[%s2941_s11 + $0x30] sm:$0xff] }
 0x3ba   : > { %v1618_v54 = vpack.c.bf16 %v1581_v47, %v1580_v50  ;;  %1866 = vmatpush.bf16.msra.mxu2 %v2329_v56  ;;  %v1582_v58 = vld [vmem:[#allocation2 + $0x28] sm:$0xff]  ;;  %v1583_v59 = vld [vmem:[#allocation2 + $0x38] sm:$0xff]  ;;  %v2324_v62 = vld [vmem:[%s2941_s11 + $0x10] sm:$0xff] }
 0x3bb   : > { %1670 = vmatpush.bf16.msra.mxu0 %v2319_v22  ;;  %2340 = vmatpush.bf16.msra.mxu3 %v2319_v22  ;;  %v1619_v60 = vpack.c.bf16 %v1583_v59, %v1582_v58  ;;  %v2325_v61 = vld [vmem:[%s2941_s11 + $0x18] sm:$0xff]  ;;  %v2323_v63 = vld [vmem:[%s2941_s11 + $0x8] sm:$0xff]  ;;  %v2364_v2 = vld [vmem:[%s2940_s10] ss:$0 sm:$0xff] }
 0x3bc   : > { %1747 = vmatpush.bf16.msra.mxu1 %v2311_v51  ;;  %v2365_v56 = vld [vmem:[%s2942_s12] ss:$0 sm:$0xff] }
 0x3be   : > { %1867 = vmatpush.bf16.msra.mxu2 %v2328_v57 }
 0x3bf   : > { %1671 = vmatpush.bf16.msra.mxu0 %v2318_v55  ;;  %2341 = vmatpush.bf16.msra.mxu3 %v2318_v55 }
 0x3c0   : > { %1748 = vmatpush.bf16.msra.mxu1 %v2310_v23 }
 0x3c3   : > { %1672 = vmatpush.bf16.msra.mxu0 %v2317_v24  ;;  %2342 = vmatpush.bf16.msra.mxu3 %v2317_v24 }
 0x3c4   : > { %1749 = vmatpush.bf16.msra.mxu1 %v2309_v25 }
 0x3c7   : > { %1673 = vmatpush.bf16.msra.mxu0 %v2316_v26  ;;  %2343 = vmatpush.bf16.msra.mxu3 %v2316_v26 }
 0x3c8   : > { %1750 = vmatpush.bf16.msra.mxu1 %v2308_v28 }
 0x3cb   : > { %1674 = vmatpush.bf16.msra.mxu0 %v2315_v29  ;;  %2344 = vmatpush.bf16.msra.mxu3 %v2315_v29 }
 0x3cc   : > { %1751 = vmatpush.bf16.msra.mxu1 %v2307_v30 }
 0x3cf   : > { %1675 = vmatpush.bf16.msra.mxu0 %v2314_v31  ;;  %2345 = vmatpush.bf16.msra.mxu3 %v2314_v31 }
 0x3d0   : > { %1752 = vmatpush.bf16.msra.mxu1 %v2306_v35 }
 0x3d2   : > { %1676 = vmatmul.bf16.vlgmr.msra.gmra.mxu0 %v1616_v53  ;;  %1681 = vmatmul.bf16.vlgmr.msra.gmra.mxu3 %v1617_v52 }
 0x3d3   : > { %1753 = vmatmul.bf16.vlgmr.msra.gmra.mxu1 %v2578_v45  ;;  %v2327_v45 = vld [vmem:[%s2941_s11 + $0x28] sm:$0xff] }
 0x3d4   : > { %1868 = vmatpush.bf16.msra.mxu2 %v2327_v45 }
 0x3e2   : > { %1686 = vmatmul.bf16.gmra.mxu3 %v1618_v54 }
 0x3e3   : > { %1758 = vmatmul.bf16.gmra.mxu1 %v2560_v42  ;;  %v2326_v42 = vld [vmem:[%s2941_s11 + $0x20] sm:$0xff] }
 0x3e4   : > { %1869 = vmatpush.bf16.msra.mxu2 %v2326_v42 }
 0x3e8   : > { %1870 = vmatpush.bf16.msra.mxu2 %v2325_v61 }
 0x3ec   : > { %1871 = vmatpush.bf16.msra.mxu2 %v2324_v62 }
 0x3f0   : > { %1872 = vmatpush.bf16.msra.mxu2 %v2323_v63 }
 0x3f2   : > { %1691 = vmatmul.bf16.gmra.mxu3 %v1619_v60 }
 0x3f3   : > { %1763 = vmatmul.bf16.gmra.mxu1 %v2544_v39  ;;  %v2322_v39 = vld [vmem:[%s2941_s11] sm:$0xff] }
 0x3f4   : > { %1873 = vmatpush.bf16.msra.mxu2 %v2322_v39 }
 0x403   : > { %1768 = vmatmul.bf16.gmra.mxu1 %v2525_v34 }
 0x44f   : > { %v1677_v34 = vpop.f32.mrf.mxu0 }
 0x450   : > { %v1754_v0 = vpop.f32.mrf.mxu1 }
 0x451   : > { %v1755_v1 = vadd.f32 %v1754_v0, %v1677_v34 }
 0x453   : > { %v1778_v5 = vadd.f32 %v2364_v2, %v1755_v1 }
 0x455   : > { %v1682_v27 = vpop.f32.mrf.mxu3  ;;  %v1786_v8 = vmax.f32 %v1778_v5, 0.0 }
 0x457   : > { %v1679_v3 = vpop.f32.mrf.mxu0 }
 0x458   : > { %v1756_v4 = vpop.f32.mrf.mxu1 }
 0x459   : > { %v1757_v6 = vadd.f32 %v1756_v4, %v1679_v3 }
 0x45b   : > { %v1779_v7 = vadd.f32 %v2364_v2, %v1757_v6 }
 0x45d   : > { %v1787_v9 = vmax.f32 %v1779_v7, 0.0  ;;  %v1684_v11 = vpop.f32.mrf.mxu3 }
 0x45f   : > { %v1794_v10 = vpack.c.bf16 %v1787_v9, %v1786_v8 }
 0x460   : > { %v1759_v12 = vpop.f32.mrf.mxu1 }
 0x461   : > { %1874 = vmatmul.bf16.vlgmr.msra.gmra.mxu2 %v1794_v10  ;;  %v1760_v13 = vadd.f32 %v1759_v12, %v1682_v27 }
 0x463   : > { %v1780_v15 = vadd.f32 %v2364_v2, %v1760_v13 }
 0x465   : > { %v1687_v17 = vpop.f32.mrf.mxu3  ;;  %v1788_v19 = vmax.f32 %v1780_v15, 0.0 }
 0x468   : > { %v1761_v14 = vpop.f32.mrf.mxu1 }
 0x469   : > { %v1762_v16 = vadd.f32 %v1761_v14, %v1684_v11 }
 0x46b   : > { %v1781_v18 = vadd.f32 %v2364_v2, %v1762_v16 }
 0x46d   : > { %v1789_v20 = vmax.f32 %v1781_v18, 0.0  ;;  %v1689_v51 = vpop.f32.mrf.mxu3 }
 0x46f   : > { %v1795_v21 = vpack.c.bf16 %v1789_v20, %v1788_v19 }
 0x470   : > { %v1764_v22 = vpop.f32.mrf.mxu1 }
 0x471   : > { %1879 = vmatmul.bf16.gmra.mxu2 %v1795_v21  ;;  %v1765_v55 = vadd.f32 %v1764_v22, %v1687_v17 }
 0x473   : > { %v1782_v24 = vadd.f32 %v2364_v2, %v1765_v55 }
 0x475   : > { %v1790_v28 = vmax.f32 %v1782_v24, 0.0  ;;  %v1692_v30 = vpop.f32.mrf.mxu3 }
 0x478   : > { %v1766_v23 = vpop.f32.mrf.mxu1 }
 0x479   : > { %v1767_v25 = vadd.f32 %v1766_v23, %v1689_v51 }
 0x47b   : > { %v1783_v26 = vadd.f32 %v2364_v2, %v1767_v25 }
 0x47d   : > { %v1791_v29 = vmax.f32 %v1783_v26, 0.0  ;;  %v1694_v46 = vpop.f32.mrf.mxu3 }
 0x47f   : > { %v1796_v31 = vpack.c.bf16 %v1791_v29, %v1790_v28 }
 0x480   : > { %v1769_v35 = vpop.f32.mrf.mxu1 }
 0x481   : > { %1884 = vmatmul.bf16.gmra.mxu2 %v1796_v31  ;;  %v1770_v36 = vadd.f32 %v1769_v35, %v1692_v30 }
 0x483   : > { %v1784_v49 = vadd.f32 %v2364_v2, %v1770_v36 }
 0x485   : > { %v1792_v50 = vmax.f32 %v1784_v49, 0.0 }
 0x488   : > { %v1771_v48 = vpop.f32.mrf.mxu1 }
 0x489   : > { %v1772_v53 = vadd.f32 %v1771_v48, %v1694_v46 }
 0x48b   : > { %v1785_v52 = vadd.f32 %v2364_v2, %v1772_v53 }
 0x48d   : > { %v1793_v47 = vmax.f32 %v1785_v52, 0.0 }
 0x48f   : > { %v1797_v54 = vpack.c.bf16 %v1793_v47, %v1792_v50 }
 0x491   : > { %1889 = vmatmul.bf16.gmra.mxu2 %v1797_v54 }
 0x4e4   : > { %v1875_v57 = vpop.f32.mrf.mxu2 }
 0x4e5   : > { %v1876_v45 = vadd.f32 %v2365_v56, %v1875_v57 }
 0x4e7   : > { %v1895_v58 = vadd.f32 %v1876_v45, %v2568_v43 }
 0x4e9   : > { %1903 = vst [vmem:[%s2943_s13] sm:$0xff] %v1895_v58 }
 0x4ec   : > { %v1877_v59 = vpop.f32.mrf.mxu2 }
 0x4ed   : > { %v1878_v42 = vadd.f32 %v2365_v56, %v1877_v59 }
 0x4ef   : > { %v1896_v60 = vadd.f32 %v1878_v42, %v2573_v44 }
 0x4f1   : > { %1904 = vst [vmem:[%s2943_s13 + $0x8] sm:$0xff] %v1896_v60 }
 0x4f4   : > { %v1880_v61 = vpop.f32.mrf.mxu2 }
 0x4f5   : > { %v1881_v62 = vadd.f32 %v2365_v56, %v1880_v61 }
 0x4f7   : > { %v1897_v63 = vadd.f32 %v1881_v62, %v2550_v40 }
 0x4f9   : > { %1905 = vst [vmem:[%s2943_s13 + $0x10] sm:$0xff] %v1897_v63 }
 0x4fc   : > { %v1882_v43 = vpop.f32.mrf.mxu2 }
 0x4fd   : > { %v1883_v39 = vadd.f32 %v2365_v56, %v1882_v43 }
 0x4ff   : > { %v1898_v34 = vadd.f32 %v1883_v39, %v2555_v41 }
 0x501   : > { %1906 = vst [vmem:[%s2943_s13 + $0x18] sm:$0xff] %v1898_v34 }
 0x504   : > { %v1885_v44 = vpop.f32.mrf.mxu2 }
 0x505   : > { %v1886_v0 = vadd.f32 %v2365_v56, %v1885_v44 }
 0x507   : > { %v1899_v1 = vadd.f32 %v1886_v0, %v2535_v37 }
 0x509   : > { %1907 = vst [vmem:[%s2943_s13 + $0x20] sm:$0xff] %v1899_v1 }
 0x50c   : > { %v1887_v40 = vpop.f32.mrf.mxu2 }
 0x50d   : > { %v1888_v2 = vadd.f32 %v2365_v56, %v1887_v40 }
 0x50f   : > { %v1900_v27 = vadd.f32 %v1888_v2, %v2540_v38 }
 0x511   : > { %1908 = vst [vmem:[%s2943_s13 + $0x28] sm:$0xff] %v1900_v27 }
 0x514   : > { %v1890_v41 = vpop.f32.mrf.mxu2 }
 0x515   : > { %v1891_v3 = vadd.f32 %v2365_v56, %v1890_v41 }
 0x517   : > { %v1901_v4 = vadd.f32 %v1891_v3, %v2516_v32 }
 0x519   : > { %1909 = vst [vmem:[%s2943_s13 + $0x30] sm:$0xff] %v1901_v4 }
 0x51c   : > { %v1892_v37 = vpop.f32.mrf.mxu2 }
 0x51d   : > { %v1893_v5 = vadd.f32 %v2365_v56, %v1892_v37 }
 0x51f   : > { %v1902_v6 = vadd.f32 %v1893_v5, %v2521_v33 }
 0x521   : > { %1910 = vst [vmem:[%s2943_s13 + $0x38] sm:$0xff] %v1902_v6 }
 0x522 PF: > { %s23_s25 = sadd.s32 1, %s2372_s25  }
 0x523   : > { %p20_p7 = scmp.ge.s32.totalorder %s23_s25, 4  }
 0x525   :  { %22 = sbr.rel (!%p20_p7) target bundleno = 1 (0x1), region = 115 }

// kernel: edm_block_forward.9
= control target key start
LH: loop header
LB: loop body
LE: loop exit
PB: predicated region body
PF: predicated region fallthrough
CT: control target
= control target key end

     0   :  { %s2722_s27 = smov 0   ;;  %s3513_s0 = inlined_call_operand.vmem [shape: s32[256,1], index: 0, kind: input, shape index: {}]   ;;  %s3514_s1 = inlined_call_operand.vmem [shape: s32[256,1], index: 1, kind: input, shape index: {}]   ;;  %s3515_s2 = inlined_call_operand.vmem [shape: s32[1,256], index: 2, kind: input, shape index: {}]   ;;  %s3516_s3 = inlined_call_operand.vmem [shape: f32[64,128], index: 3, kind: input, shape index: {}]   ;;  %s3517_s4 = inlined_call_operand.vmem [shape: f32[256,128], index: 4, kind: input, shape index: {}]   ;;  %s3518_s5 = inlined_call_operand.vmem [shape: f32[64,3], index: 5, kind: input, shape index: {}]   ;;  %s3519_s6 = inlined_call_operand.vmem [shape: f32[256,1], index: 6, kind: input, shape index: {}]   ;;  %s3520_s7 = inlined_call_operand.vmem [shape: bf16[384,128], index: 7, kind: input, shape index: {}]   ;;  %s3521_s8 = inlined_call_operand.vmem [shape: f32[1,128], index: 8, kind: input, shape index: {}]   ;;  %s3522_s9 = inlined_call_operand.vmem [shape: bf16[128,64], index: 9, kind: input, shape index: {}]   ;;  %s3523_s10 = inlined_call_operand.vmem [shape: f32[1,64], index: 10, kind: input, shape index: {}]   ;;  %s3524_s11 = inlined_call_operand.vmem [shape: f32[1,64], index: 11, kind: input, shape index: {}]   ;;  %s3525_s12 = inlined_call_operand.<no memory space> [shape: f32[1,1], index: 12, kind: input, shape index: {}]   ;;  %s3526_s13 = inlined_call_operand.vmem [shape: f32[64,3], index: 13, kind: output, shape index: {}]  }
   0x1   :  { %v18_v0 = vstv %s3525_s12 }
   0x2   :  { %19 = vst [vmem:[#allocation3] sm:$0x1] %v18_v0 }
   0x3 LB: > { %3530 = sst [smem:[#allocation4_spill]] %s2643_s27  ;;  %s2728_s28 = sadd.s32 4294967295, %s2643_s27   ;;  %s2643_s27 = sphi %s2722_s27, %s25_s27  }
   0x4   : > { %p2296_p0 = scmp.ge.s32.totalorder %s2643_s27, 1  ;;  %p426_p1 = scmp.lt.s32.totalorder %s2643_s27, 3 }
   0x6   : > { %p427_p2 = pnand %p2296_p0, %p426_p1 }
   0x8   : > { %430 = sbr.rel (%p427_p2) target bundleno = 1192 (0x4a8), region = 72 }
   0xd   : > { %s2297_s12 = sshll.u32 %s2728_s28, 4  ;;  %p495_p3 = scmp.lt.s32.totalorder %s2728_s28, 1 }
   0xe   : > { %p484_p4 = scmp.lt.s32.totalorder %s2297_s12, 31  ;;  %p2305_p5 = scmp.ne.s32.totalorder %s2728_s28, 0 }
   0xf   : > { %s2735_s29 = scalar_select %p495_p3, %s2728_s28, 1 }
  0x10   : > { %s3545_s12 = smov (!%p484_p4, %s2297_s12), 31  ;;  %514 = sbr.rel (%p2305_p5) target bundleno = 30 (0x1e), region = 76 }
  0x11   : > { %s497_s15 = scalar_lea.vmem %s3515_s2, %s2735_s29  ;;  %s2298_s16 = sshll.u32 %s3545_s12, 3 }
  0x12   : > { %s2744_s19 = scalar_lea.vmem %s3513_s0, %s2298_s16  ;;  %s2749_s22 = scalar_lea.vmem %s3514_s1, %s2298_s16 }
  0x13   : > { %s2754_s25 = scalar_lea.vmem %s3517_s4, %s2298_s16  ;;  %s2759_s30 = scalar_lea.vmem %s3519_s6, %s2298_s16 }
  0x15   : > { %vm515_vm0 = vcmask 23552   ;;  %v2645_v1 = vmov 0.0  }
  0x16   : > { %516 = vst.msk [vmem:[#allocation2] sm:$0xff] %vm515_vm0, %v2645_v1 }
  0x17   : > { %517 = vst.msk [vmem:[#allocation2 + $0x8] sm:$0xff] %vm515_vm0, %v2645_v1 }
  0x18   : > { %518 = vst.msk [vmem:[#allocation2 + $0x10] sm:$0xff] %vm515_vm0, %v2645_v1 }
  0x19   : > { %519 = vst.msk [vmem:[#allocation2 + $0x18] sm:$0xff] %vm515_vm0, %v2645_v1 }
  0x1a   : > { %520 = vst.msk [vmem:[#allocation2 + $0x20] sm:$0xff] %vm515_vm0, %v2645_v1 }
  0x1b   : > { %521 = vst.msk [vmem:[#allocation2 + $0x28] sm:$0xff] %vm515_vm0, %v2645_v1 }
  0x1c   : > { %522 = vst.msk [vmem:[#allocation2 + $0x30] sm:$0xff] %vm515_vm0, %v2645_v1 }
  0x1d   : > { %523 = vst.msk [vmem:[#allocation2 + $0x38] sm:$0xff] %vm515_vm0, %v2645_v1 }
  0x1e PF: > { %v540_v2 = vld [vmem:[%s2744_s19 + $0x70] sm:$0xff]  ;;  %v538_v3 = vld [vmem:[%s2744_s19 + $0x60] sm:$0xff]  ;;  %v2646_v5 = vmov 0   ;;  %v541_v6 = vld [vmem:[%s2744_s19 + $0x78] sm:$0xff]  ;;  %v3528_v1 = vlaneseq  ;;  %vm770_vm3 = vcmask 523264   ;;  %p2530_p6 = scmp.ne.s32.totalorder %s2728_s28, 1 }
  0x1f   : > { %v526_v4 = vld [vmem:[%s2744_s19] sm:$0xff]  ;;  %2599 = vset.pattern.permute.xlu2 %v2646_v5  ;;  %2598 = vset.pattern.permute.xlu1 %v2646_v5  ;;  %v539_v7 = vld [vmem:[%s2744_s19 + $0x68] sm:$0xff]  ;;  %v528_v11 = vld [vmem:[%s2744_s19 + $0x10] sm:$0xff] }
  0x20   : > { %2597 = vset.pattern.permute.xlu0 %v2646_v5  ;;  %585 = vperm.xlu1 %2598, %v540_v2   ;;  %v527_v8 = vld [vmem:[%s2744_s19 + $0x8] sm:$0xff]  ;;  %v638_v10 = vld [vmem:[%s2749_s22] sm:$0xff]  ;;  %v640_v12 = vld [vmem:[%s2749_s22 + $0x10] sm:$0xff] }
  0x21   : > { %579 = vperm.xlu0 %2597, %v538_v3   ;;  %543 = vperm.xlu2 %2599, %v526_v4   ;;  %v639_v9 = vld [vmem:[%s2749_s22 + $0x8] sm:$0xff]  ;;  %v529_v13 = vld [vmem:[%s2744_s19 + $0x18] sm:$0xff]  ;;  %v530_v16 = vld [vmem:[%s2744_s19 + $0x20] sm:$0xff] }
  0x22   : > { %v641_v14 = vld [vmem:[%s2749_s22 + $0x18] sm:$0xff]  ;;  %v531_v15 = vld [vmem:[%s2744_s19 + $0x28] sm:$0xff]  ;;  %v642_v17 = vld [vmem:[%s2749_s22 + $0x20] sm:$0xff] }
  0x23   : > { %v532_v18 = vld [vmem:[%s2744_s19 + $0x30] sm:$0xff]  ;;  %v643_v19 = vld [vmem:[%s2749_s22 + $0x28] sm:$0xff]  ;;  %v533_v20 = vld [vmem:[%s2744_s19 + $0x38] sm:$0xff] }
  0x24   : > { %v645_v21 = vld [vmem:[%s2749_s22 + $0x38] sm:$0xff]  ;;  %v644_v22 = vld [vmem:[%s2749_s22 + $0x30] sm:$0xff]  ;;  %v534_v23 = vld [vmem:[%s2744_s19 + $0x40] sm:$0xff] }
  0x25   : > { %v646_v24 = vld [vmem:[%s2749_s22 + $0x40] sm:$0xff]  ;;  %v535_v25 = vld [vmem:[%s2744_s19 + $0x48] sm:$0xff]  ;;  %v537_v27 = vld [vmem:[%s2744_s19 + $0x58] sm:$0xff] }
  0x26   : > { %v647_v26 = vld [vmem:[%s2749_s22 + $0x48] sm:$0xff]  ;;  %v536_v28 = vld [vmem:[%s2744_s19 + $0x50] sm:$0xff]  ;;  %v1834_v30 = vld [vmem:[%s2759_s30 + $0x78] sm:$0xff] }
  0x27   : > { %v648_v29 = vld [vmem:[%s2749_s22 + $0x50] sm:$0xff]  ;;  %v1850_v31 = vmax.f32 %v1834_v30, 1e-12  ;;  %v650_v32 = vld [vmem:[%s2749_s22 + $0x60] sm:$0xff]  ;;  %v649_v33 = vld [vmem:[%s2749_s22 + $0x58] sm:$0xff] }
  0x28   : > { %588 = vperm.xlu1 %2598, %v541_v6   ;;  %v651_v34 = vld [vmem:[%s2749_s22 + $0x68] sm:$0xff]  ;;  %v1831_v35 = vld [vmem:[%s2759_s30 + $0x60] sm:$0xff]  ;;  %v1833_v36 = vld [vmem:[%s2759_s30 + $0x70] sm:$0xff] }
  0x29   : > { %582 = vperm.xlu0 %2597, %v539_v7   ;;  %546 = vperm.xlu2 %2599, %v527_v8   ;;  %2605 = vrcp.f32 %v1850_v31  ;;  %v1830_v37 = vld [vmem:[%s2759_s30 + $0x58] sm:$0xff]  ;;  %v1847_v38 = vmax.f32 %v1831_v35, 1e-12  ;;  %v1849_v39 = vmax.f32 %v1833_v36, 1e-12  ;;  %v756_v42 = vld [vmem:[%s3516_s3 + $0x30] sm:$0xff] }
  0x2a   : > { %v1846_v40 = vmax.f32 %v1830_v37, 1e-12  ;;  %v653_v41 = vld [vmem:[%s2749_s22 + $0x78] sm:$0xff]  ;;  %v652_v45 = vld [vmem:[%s2749_s22 + $0x70] sm:$0xff]  ;;  %v1828_v47 = vld [vmem:[%s2759_s30 + $0x48] sm:$0xff] }
  0x2b   : > { %v757_v43 = vld [vmem:[%s3516_s3 + $0x38] sm:$0xff]  ;;  %2607 = vrcp.f32 %v1847_v38  ;;  %v1832_v48 = vld [vmem:[%s2759_s30 + $0x68] sm:$0xff]  ;;  %v1827_v49 = vld [vmem:[%s2759_s30 + $0x40] sm:$0xff]  ;;  %v1844_v50 = vmax.f32 %v1828_v47, 1e-12 }
  0x2c   : > { %v761_v46 = vpack.c.bf16 %v757_v43, %v756_v42  ;;  %2609 = vrcp.f32 %v1849_v39  ;;  %v754_v51 = vld [vmem:[%s3516_s3 + $0x20] sm:$0xff]  ;;  %v755_v52 = vld [vmem:[%s3516_s3 + $0x28] sm:$0xff]  ;;  %v1848_v53 = vmax.f32 %v1832_v48, 1e-12  ;;  %v1843_v56 = vmax.f32 %v1827_v49, 1e-12 }
  0x2d   : > { %2611 = vrcp.f32 %v1846_v40  ;;  %v760_v54 = vpack.c.bf16 %v755_v52, %v754_v51  ;;  %v752_v58 = vld [vmem:[%s3516_s3 + $0x10] sm:$0xff]  ;;  %v753_v59 = vld [vmem:[%s3516_s3 + $0x18] sm:$0xff]  ;;  %v1824_v0 = vld [vmem:[%s2759_s30 + $0x28] sm:$0xff] }
  0x2e   : > { %799 = vmatpush.bf16.msra.mxu0 %v761_v46  ;;  %2565 = vmatpush.bf16.msra.mxu1 %v761_v46  ;;  %2613 = vrcp.f32 %v1844_v50  ;;  %v759_v61 = vpack.c.bf16 %v753_v59, %v752_v58  ;;  %v1825_v62 = vld [vmem:[%s2759_s30 + $0x30] sm:$0xff]  ;;  %v750_v3 = vld [vmem:[%s3516_s3] sm:$0xff]  ;;  %v751_v4 = vld [vmem:[%s3516_s3 + $0x8] sm:$0xff] }
  0x2f   : > { %v2606_v44 = vpop.eup %2605  ;;  %2615 = vrcp.f32 %v1848_v53  ;;  %v1829_v63 = vld [vmem:[%s2759_s30 + $0x50] sm:$0xff]  ;;  %v1841_v2 = vmax.f32 %v1825_v62, 1e-12  ;;  %v758_v7 = vpack.c.bf16 %v751_v4, %v750_v3 }
  0x30   : > { %658 = vperm.xlu1 %2598, %v639_v9   ;;  %2617 = vrcp.f32 %v1843_v56  ;;  %v1845_v6 = vmax.f32 %v1829_v63, 1e-12  ;;  %v1840_v9 = vmax.f32 %v1824_v0, 1e-12 }
  0x31   : > { %655 = vperm.xlu0 %2597, %v638_v10   ;;  %549 = vperm.xlu2 %2599, %v528_v11   ;;  %v2608_v55 = vpop.eup %2607  ;;  %2619 = vrcp.f32 %v1841_v2 }
  0x32   : > { %v2610_v57 = vpop.eup %2609  ;;  %800 = vmatpush.bf16.msra.mxu0 %v760_v54  ;;  %2566 = vmatpush.bf16.msra.mxu1 %v760_v54  ;;  %2621 = vrcp.f32 %v1845_v6 }
  0x33   : > { %v2612_v60 = vpop.eup %2611  ;;  %2623 = vrcp.f32 %v1840_v9  ;;  %v2540_v9 = vld [vmem:[%s3520_s7 + $0x38] sm:$0xff] }
  0x34   : > { %v2614_v8 = vpop.eup %2613  ;;  %1158 = vmatpush.bf16.msra.mxu3 %v2540_v9  ;;  %v2543_v9 = vld [vmem:[%s3520_s7 + $0x50] sm:$0xff] }
  0x35   : > { %v2616_v10 = vpop.eup %2615 }
  0x36   : > { %801 = vmatpush.bf16.msra.mxu0 %v759_v61  ;;  %2567 = vmatpush.bf16.msra.mxu1 %v759_v61  ;;  %v2618_v11 = vpop.eup %2617 }
  0x38   : > { %661 = vperm.xlu1 %2598, %v640_v12   ;;  %v2829_v12 = vand.u32 127, %v3528_v1 }
  0x39   : > { %552 = vperm.xlu0 %2597, %v529_v13   ;;  %664 = vperm.xlu2 %2599, %v641_v14   ;;  %v1826_v13 = vld [vmem:[%s2759_s30 + $0x38] sm:$0xff]  ;;  %v2647_v14 = vmov 0.0  }
  0x3a   : > { %802 = vmatpush.bf16.msra.mxu0 %v758_v7  ;;  %2568 = vmatpush.bf16.msra.mxu1 %v758_v7 }
  0x3e   : > { %880 = vmatpush.bf16.msrb.mxu1 %v761_v46 }
  0x40   : > { %558 = vperm.xlu1 %2598, %v531_v15  }
  0x41   : > { %555 = vperm.xlu0 %2597, %v530_v16   ;;  %667 = vperm.xlu2 %2599, %v642_v17   ;;  %v2620_v17 = vpop.eup %2619 }
  0x42   : > { %881 = vmatpush.bf16.msrb.mxu1 %v760_v54 }
  0x46   : > { %882 = vmatpush.bf16.msrb.mxu1 %v759_v61 }
  0x48   : > { %561 = vperm.xlu1 %2598, %v532_v18   ;;  %v1842_v18 = vmax.f32 %v1826_v13, 1e-12  ;;  %v2539_v13 = vld [vmem:[%s3520_s7 + $0x30] sm:$0xff] }
  0x49   : > { %670 = vperm.xlu0 %2597, %v643_v19   ;;  %564 = vperm.xlu2 %2599, %v533_v20   ;;  %v2622_v19 = vpop.eup %2621 }
  0x4a   : > { %2625 = vrcp.f32 %v1842_v18  ;;  %883 = vmatpush.bf16.msrb.mxu1 %v758_v7  ;;  %1159 = vmatpush.bf16.msra.mxu3 %v2539_v13 }
  0x50   : > { %676 = vperm.xlu1 %2598, %v645_v21   ;;  %v2624_v21 = vpop.eup %2623 }
  0x51   : > { %673 = vperm.xlu0 %2597, %v644_v22   ;;  %567 = vperm.xlu2 %2599, %v534_v23   ;;  %v2626_v23 = vpop.eup %2625 }
  0x58   : > { %679 = vperm.xlu1 %2598, %v646_v24  }
  0x59   : > { %570 = vperm.xlu0 %2597, %v535_v25   ;;  %682 = vperm.xlu2 %2599, %v647_v26  }
  0x60   : > { %576 = vperm.xlu1 %2598, %v537_v27  }
  0x61   : > { %573 = vperm.xlu0 %2597, %v536_v28   ;;  %685 = vperm.xlu2 %2599, %v648_v29  }
  0x68   : > { %691 = vperm.xlu1 %2598, %v650_v32  }
  0x69   : > { %688 = vperm.xlu0 %2597, %v649_v33   ;;  %694 = vperm.xlu2 %2599, %v651_v34  }
  0x70   : > { %700 = vperm.xlu1 %2598, %v653_v41  }
  0x71   : > { %697 = vperm.xlu0 %2597, %v652_v45   ;;  %1960 = vperm.xlu2 %2599, %v2606_v44  }
  0x78   : > { %1945 = vperm.xlu1 %2598, %v2608_v55  }
  0x79   : > { %1955 = vperm.xlu0 %2597, %v2610_v57   ;;  %1940 = vperm.xlu2 %2599, %v2612_v60  }
  0x7b   : > { %v544_v5 = vpop.permute.xlu2 %543 }
  0x7c   : > { %vm590_vm1 = vcmp.eq.s32.totalorder %v2829_v12, %v544_v5 }
  0x7d   : > { %v2834_v15 = vsel %vm590_vm1, 1.0, %v2647_v14 }
  0x80   : > { %1930 = vperm.xlu1 %2598, %v2614_v8  }
  0x81   : > { %1950 = vperm.xlu0 %2597, %v2616_v10   ;;  %1925 = vperm.xlu2 %2599, %v2618_v11  }
  0x83   : > { %v547_v16 = vpop.permute.xlu2 %546 }
  0x84   : > { %vm591_vm2 = vcmp.eq.s32.totalorder %v2829_v12, %v547_v16 }
  0x85   : > { %v2838_v20 = vsel %vm591_vm2, 1.0, %v2647_v14 }
  0x86   : > { %v762_v22 = vpack.c.bf16 %v2838_v20, %v2834_v15 }
  0x88   : > { %1915 = vperm.xlu1 %2598, %v2620_v17   ;;  %2338 = vmatmul.msk.bf16.vlgmr.msra.gmra.mxu0 %vm770_vm3, %v762_v22 }
  0x89   : > { %1935 = vperm.xlu0 %2597, %v2622_v19   ;;  %1910 = vperm.xlu2 %2599, %v2624_v21  }
  0x8b   : > { %v550_v33 = vpop.permute.xlu2 %549 }
  0x8c   : > { %vm592_vm6 = vcmp.eq.s32.totalorder %v2829_v12, %v550_v33  ;;  %v2534_v33 = vld [vmem:[%s3520_s7 + $0x8] sm:$0xff] }
  0x8d   : > { %v2858_v34 = vsel %vm592_vm6, 1.0, %v2647_v14 }
  0x91   : > { %1920 = vperm.xlu0 %2597, %v2626_v23   ;;  %v2538_v23 = vld [vmem:[%s3520_s7 + $0x28] sm:$0xff] }
  0x92   : > { %v586_v24 = vpop.permute.xlu1 %585  ;;  %1160 = vmatpush.bf16.msra.mxu3 %v2538_v23 }
  0x93   : > { %v580_v25 = vpop.permute.xlu0 %579  ;;  %vm604_vm7 = vcmp.eq.s32.totalorder %v2829_v12, %v586_v24  ;;  %v665_v42 = vpop.permute.xlu2 %664  ;;  %v2537_v24 = vld [vmem:[%s3520_s7 + $0x20] sm:$0xff] }
  0x94   : > { %vm602_vm4 = vcmp.eq.s32.totalorder %v2829_v12, %v580_v25  ;;  %v2861_v35 = vsel %vm604_vm7, 1.0, %v2647_v14  ;;  %vm705_vm14 = vcmp.eq.s32.totalorder %v2829_v12, %v665_v42  ;;  %v2536_v25 = vld [vmem:[%s3520_s7 + $0x18] sm:$0xff] }
  0x95   : > { %v2846_v28 = vsel %vm602_vm4, 1.0, %v2647_v14  ;;  %v2903_v55 = vsel %vm705_vm14, 1.0, %v2647_v14  ;;  %v2556_v42 = vld [vmem:[%s3520_s7 + $0xb8] sm:$0xff] }
  0x96   : > { %1161 = vmatpush.bf16.msra.mxu3 %v2537_v24  ;;  %1255 = vmatpush.bf16.msrb.mxu0 %v2556_v42  ;;  %v2541_v24 = vld [vmem:[%s3520_s7 + $0x40] sm:$0xff] }
  0x9a   : > { %v589_v26 = vpop.permute.xlu1 %588  ;;  %1162 = vmatpush.bf16.msra.mxu3 %v2536_v25  ;;  %v2549_v25 = vld [vmem:[%s3520_s7 + $0x80] sm:$0xff] }
  0x9b   : > { %v583_v27 = vpop.permute.xlu0 %582  ;;  %vm605_vm8 = vcmp.eq.s32.totalorder %v2829_v12, %v589_v26  ;;  %v668_v51 = vpop.permute.xlu2 %667 }
  0x9c   : > { %vm603_vm5 = vcmp.eq.s32.totalorder %v2829_v12, %v583_v27  ;;  %v2864_v36 = vsel %vm605_vm8, 1.0, %v2647_v14 }
  0x9d   : > { %v2849_v29 = vsel %vm603_vm5, 1.0, %v2647_v14  ;;  %v769_v40 = vpack.c.bf16 %v2864_v36, %v2861_v35  ;;  %vm706_vm5 = vcmp.eq.s32.totalorder %v2829_v12, %v668_v51 }
  0x9e   : > { %v768_v30 = vpack.c.bf16 %v2849_v29, %v2846_v28  ;;  %v2931_v5 = vsel %vm706_vm5, 1.0, %v2647_v14 }
  0xa0   : > { %2344 = vmatmul.msk.bf16.vlgmr.msra.gmra.mxu1 %vm770_vm3, %v768_v30  ;;  %v2535_v30 = vld [vmem:[%s3520_s7 + $0x10] sm:$0xff] }
  0xa1   : > { %1163 = vmatpush.bf16.msra.mxu3 %v2535_v30 }
  0xa2   : > { %v659_v31 = vpop.permute.xlu1 %658 }
  0xa3   : > { %v656_v32 = vpop.permute.xlu0 %655  ;;  %vm703_vm10 = vcmp.eq.s32.totalorder %v2829_v12, %v659_v31  ;;  %v565_v54 = vpop.permute.xlu2 %564 }
  0xa4   : > { %vm702_vm11 = vcmp.eq.s32.totalorder %v2829_v12, %v656_v32  ;;  %v2881_v45 = vsel %vm703_vm10, 1.0, %v2647_v14  ;;  %vm597_vm1 = vcmp.eq.s32.totalorder %v2829_v12, %v565_v54 }
  0xa5   : > { %v2884_v46 = vsel %vm702_vm11, 1.0, %v2647_v14  ;;  %v2912_v59 = vsel %vm597_vm1, 1.0, %v2647_v14  ;;  %1164 = vmatpush.bf16.msra.mxu3 %v2534_v33  ;;  %v973_v33 = vld [vmem:[%s2754_s25] sm:$0xff] }
  0xa6   : > { %v844_v49 = vpack.c.bf16 %v2881_v45, %v2884_v46 }
  0xaa   : > { %v662_v37 = vpop.permute.xlu1 %661 }
  0xab   : > { %v553_v38 = vpop.permute.xlu0 %552  ;;  %vm704_vm15 = vcmp.eq.s32.totalorder %v2829_v12, %v662_v37  ;;  %v568_v0 = vpop.permute.xlu2 %567  ;;  %v2533_v37 = vld [vmem:[%s3520_s7] sm:$0xff] }
  0xac   : > { %vm593_vm9 = vcmp.eq.s32.totalorder %v2829_v12, %v553_v38  ;;  %v2906_v56 = vsel %vm704_vm15, 1.0, %v2647_v14  ;;  %vm598_vm6 = vcmp.eq.s32.totalorder %v2829_v12, %v568_v0  ;;  %1165 = vmatpush.bf16.msra.mxu3 %v2533_v37  ;;  %v974_v37 = vld [vmem:[%s2754_s25 + $0x8] sm:$0xff] }
  0xad   : > { %v2868_v39 = vsel %vm593_vm9, 1.0, %v2647_v14  ;;  %v845_v60 = vpack.c.bf16 %v2903_v55, %v2906_v56  ;;  %v2934_v6 = vsel %vm598_vm6, 1.0, %v2647_v14 }
  0xae   : > { %v763_v41 = vpack.c.bf16 %v2868_v39, %v2858_v34 }
  0xb0   : > { %2339 = vmatmul.msk.bf16.gmra.mxu0 %vm770_vm3, %v763_v41  ;;  %2345 = vmatmul.msk.bf16.gmra.mxu1 %vm770_vm3, %v769_v40  ;;  %v2548_v41 = vld [vmem:[%s3520_s7 + $0x78] sm:$0xff] }
  0xb1   : > { %1061 = vmatpush.bf16.msra.mxu2 %v2548_v41 }
  0xb2   : > { %v559_v43 = vpop.permute.xlu1 %558 }
  0xb3   : > { %v556_v44 = vpop.permute.xlu0 %555  ;;  %vm595_vm12 = vcmp.eq.s32.totalorder %v2829_v12, %v559_v43  ;;  %v683_v26 = vpop.permute.xlu2 %682 }
  0xb4   : > { %vm594_vm13 = vcmp.eq.s32.totalorder %v2829_v12, %v556_v44  ;;  %v2887_v47 = vsel %vm595_vm12, 1.0, %v2647_v14  ;;  %vm711_vm12 = vcmp.eq.s32.totalorder %v2829_v12, %v683_v26 }
  0xb5   : > { %v2890_v48 = vsel %vm594_vm13, 1.0, %v2647_v14  ;;  %v2988_v31 = vsel %vm711_vm12, 1.0, %v2647_v14 }
  0xb6   : > { %v764_v50 = vpack.c.bf16 %v2887_v47, %v2890_v48 }
  0xba   : > { %v562_v53 = vpop.permute.xlu1 %561 }
  0xbb   : > { %v671_v52 = vpop.permute.xlu0 %670  ;;  %vm596_vm0 = vcmp.eq.s32.totalorder %v2829_v12, %v562_v53  ;;  %v686_v43 = vpop.permute.xlu2 %685 }
  0xbc   : > { %v2909_v57 = vsel %vm596_vm0, 1.0, %v2647_v14  ;;  %vm707_vm2 = vcmp.eq.s32.totalorder %v2829_v12, %v671_v52  ;;  %vm712_vm14 = vcmp.eq.s32.totalorder %v2829_v12, %v686_v43 }
  0xbd   : > { %v765_v61 = vpack.c.bf16 %v2912_v59, %v2909_v57  ;;  %v2925_v2 = vsel %vm707_vm2, 1.0, %v2647_v14  ;;  %v3017_v51 = vsel %vm712_vm14, 1.0, %v2647_v14 }
  0xbe   : > { %v846_v7 = vpack.c.bf16 %v2925_v2, %v2931_v5 }
  0xc0   : > { %2340 = vmatmul.msk.bf16.gmra.mxu0 %vm770_vm3, %v764_v50  ;;  %2346 = vmatmul.msk.bf16.vlgmr.msrb.gmra.mxu1 %vm770_vm3, %v844_v49  ;;  %v2547_v49 = vld [vmem:[%s3520_s7 + $0x70] sm:$0xff] }
  0xc1   : > { %v2555_v50 = vld [vmem:[%s3520_s7 + $0xb0] sm:$0xff]  ;;  %1062 = vmatpush.bf16.msra.mxu2 %v2547_v49 }
  0xc2   : > { %v677_v62 = vpop.permute.xlu1 %676  ;;  %1256 = vmatpush.bf16.msrb.mxu0 %v2555_v50 }
  0xc3   : > { %v674_v58 = vpop.permute.xlu0 %673  ;;  %vm709_vm7 = vcmp.eq.s32.totalorder %v2829_v12, %v677_v62  ;;  %v2553_v62 = vld [vmem:[%s3520_s7 + $0xa0] sm:$0xff]  ;;  %v695_v0 = vpop.permute.xlu2 %694 }
  0xc4   : > { %vm708_vm8 = vcmp.eq.s32.totalorder %v2829_v12, %v674_v58  ;;  %v2953_v16 = vsel %vm709_vm7, 1.0, %v2647_v14  ;;  %v2546_v58 = vld [vmem:[%s3520_s7 + $0x68] sm:$0xff]  ;;  %vm715_vm0 = vcmp.eq.s32.totalorder %v2829_v12, %v695_v0 }
  0xc5   : > { %v2956_v17 = vsel %vm708_vm8, 1.0, %v2647_v14  ;;  %1063 = vmatpush.bf16.msra.mxu2 %v2546_v58  ;;  %v978_v0 = vld [vmem:[%s2754_s25 + $0x28] sm:$0xff] }
  0xc6   : > { %v847_v21 = vpack.c.bf16 %v2953_v16, %v2956_v17 }
  0xca   : > { %v680_v3 = vpop.permute.xlu1 %679 }
  0xcb   : > { %v571_v63 = vpop.permute.xlu0 %570  ;;  %vm710_vm11 = vcmp.eq.s32.totalorder %v2829_v12, %v680_v3  ;;  %v2544_v3 = vld [vmem:[%s3520_s7 + $0x58] sm:$0xff] }
  0xcc   : > { %vm599_vm4 = vcmp.eq.s32.totalorder %v2829_v12, %v571_v63  ;;  %v2982_v27 = vsel %vm710_vm11, 1.0, %v2647_v14  ;;  %vm2167_vm11 = vcmask 23552  }
  0xcd   : > { %v2928_v4 = vsel %vm599_vm4, 1.0, %v2647_v14  ;;  %v848_v32 = vpack.c.bf16 %v2988_v31, %v2982_v27 }
  0xce   : > { %v766_v8 = vpack.c.bf16 %v2928_v4, %v2934_v6 }
  0xd0   : > { %2341 = vmatmul.msk.bf16.gmra.mxu0 %vm770_vm3, %v765_v61  ;;  %2347 = vmatmul.msk.bf16.gmra.mxu1 %vm770_vm3, %v845_v60  ;;  %v2554_v60 = vld [vmem:[%s3520_s7 + $0xa8] sm:$0xff]  ;;  %v2545_v61 = vld [vmem:[%s3520_s7 + $0x60] sm:$0xff] }
  0xd1   : > { %1257 = vmatpush.bf16.msrb.mxu0 %v2554_v60  ;;  %1064 = vmatpush.bf16.msra.mxu2 %v2545_v61 }
  0xd2   : > { %v577_v10 = vpop.permute.xlu1 %576 }
  0xd3   : > { %v574_v11 = vpop.permute.xlu0 %573  ;;  %vm601_vm9 = vcmp.eq.s32.totalorder %v2829_v12, %v577_v10  ;;  %v2551_v10 = vld [vmem:[%s3520_s7 + $0x90] sm:$0xff] }
  0xd4   : > { %vm600_vm10 = vcmp.eq.s32.totalorder %v2829_v12, %v574_v11  ;;  %v2959_v18 = vsel %vm601_vm9, 1.0, %v2647_v14  ;;  %v3052_v11 = vsel %vm715_vm0, 1.0, %v2647_v14 }
  0xd5   : > { %v2962_v19 = vsel %vm600_vm10, 1.0, %v2647_v14  ;;  %1258 = vmatpush.bf16.msrb.mxu0 %v2553_v62  ;;  %1065 = vmatpush.bf16.msra.mxu2 %v2544_v3 }
  0xd6   : > { %v767_v22 = vpack.c.bf16 %v2959_v18, %v2962_v19 }
  0xd9   : > { %1066 = vmatpush.bf16.msra.mxu2 %v2543_v9 }
  0xda   : > { %v692_v63 = vpop.permute.xlu1 %691 }
  0xdb   : > { %v689_v38 = vpop.permute.xlu0 %688  ;;  %vm714_vm15 = vcmp.eq.s32.totalorder %v2829_v12, %v692_v63  ;;  %v977_v63 = vld [vmem:[%s2754_s25 + $0x20] sm:$0xff] }
  0xdc   : > { %vm713_vm13 = vcmp.eq.s32.totalorder %v2829_v12, %v689_v38  ;;  %v989_v38 = vpack.c.bf16 %v974_v37, %v973_v33  ;;  %v991_v9 = vpack.c.bf16 %v978_v0, %v977_v63  ;;  %v983_v63 = vld [vmem:[%s2754_s25 + $0x50] sm:$0xff]  ;;  %v984_v0 = vld [vmem:[%s2754_s25 + $0x58] sm:$0xff] }
  0xdd   : > { %v3008_v44 = vsel %vm713_vm13, 1.0, %v2647_v14 }
  0xde   : > { %v849_v53 = vpack.c.bf16 %v3008_v44, %v3017_v51 }
  0xe0   : > { %2342 = vmatmul.msk.bf16.gmra.mxu0 %vm770_vm3, %v766_v8  ;;  %2348 = vmatmul.msk.bf16.gmra.mxu1 %vm770_vm3, %v846_v7  ;;  %v2552_v7 = vld [vmem:[%s3520_s7 + $0x98] sm:$0xff]  ;;  %v3043_v8 = vsel %vm714_vm15, 1.0, %v2647_v14 }
  0xe1   : > { %1259 = vmatpush.bf16.msrb.mxu0 %v2552_v7  ;;  %v850_v23 = vpack.c.bf16 %v3052_v11, %v3043_v8 }
  0xe2   : > { %v701_v26 = vpop.permute.xlu1 %700 }
  0xe3   : > { %v698_v30 = vpop.permute.xlu0 %697  ;;  %vm717_vm1 = vcmp.eq.s32.totalorder %v2829_v12, %v701_v26 }
  0xe4   : > { %vm716_vm2 = vcmp.eq.s32.totalorder %v2829_v12, %v698_v30  ;;  %v975_v12 = vld [vmem:[%s2754_s25 + $0x10] sm:$0xff] }
  0xe5   : > { %1260 = vmatpush.bf16.msrb.mxu0 %v2551_v10  ;;  %v3081_v41 = vsel %vm716_vm2, 1.0, %v2647_v14 }
  0xf0   : > { %2343 = vmatmul.msk.bf16.gmra.mxu0 %vm770_vm3, %v767_v22  ;;  %2349 = vmatmul.msk.bf16.gmra.mxu1 %vm770_vm3, %v847_v21  ;;  %v2542_v21 = vld [vmem:[%s3520_s7 + $0x48] sm:$0xff] }
  0xf1   : > { %v2550_v22 = vld [vmem:[%s3520_s7 + $0x88] sm:$0xff]  ;;  %1067 = vmatpush.bf16.msra.mxu2 %v2542_v21 }
  0xf2   : > { %1261 = vmatpush.bf16.msrb.mxu0 %v2550_v22 }
  0xf5   : > { %1068 = vmatpush.bf16.msra.mxu2 %v2541_v24  ;;  %v979_v24 = vld [vmem:[%s2754_s25 + $0x30] sm:$0xff] }
  0xf6   : > { %1262 = vmatpush.bf16.msrb.mxu0 %v2549_v25  ;;  %v980_v25 = vld [vmem:[%s2754_s25 + $0x38] sm:$0xff] }
  0xf7   : > { %v992_v33 = vpack.c.bf16 %v980_v25, %v979_v24  ;;  %v1589_v24 = vld [vmem:[%s3518_s5 + $0x20] sm:$0xff]  ;;  %v1588_v25 = vld [vmem:[%s3518_s5 + $0x18] sm:$0xff] }
 0x100   : > { %2350 = vmatmul.msk.bf16.gmra.mxu1 %vm770_vm3, %v848_v32  ;;  %1263 = vmatmul.bf16.vlgmr.msrb.gmra.mxu0 %v989_v38 }
 0x105   : > { %v804_v40 = vpop.f32.mrf.mxu0 }
 0x10d   : > { %v806_v52 = vpop.f32.mrf.mxu0 }
 0x10e   : > { %v997_v54 = vpack.c.bf16 %v806_v52, %v804_v40  ;;  %v3078_v40 = vsel %vm717_vm1, 1.0, %v2647_v14 }
 0x10f   : > { %v851_v49 = vpack.c.bf16 %v3078_v40, %v3081_v41 }
 0x110   : > { %2351 = vmatmul.msk.bf16.gmra.mxu1 %vm770_vm3, %v849_v53  ;;  %1166 = vmatmul.bf16.vlgmr.msra.gmra.mxu3 %v997_v54  ;;  %v976_v53 = vld [vmem:[%s2754_s25 + $0x18] sm:$0xff] }
 0x111   : > { %v990_v58 = vpack.c.bf16 %v976_v53, %v975_v12  ;;  %v982_v12 = vld [vmem:[%s2754_s25 + $0x48] sm:$0xff] }
 0x113   : > { %1268 = vmatmul.bf16.gmra.mxu0 %v990_v58 }
 0x11d   : > { %v3054_v13 = vpop.f32.mrf.mxu1 }
 0x120   : > { %2352 = vmatmul.msk.bf16.gmra.mxu1 %vm770_vm3, %v850_v23 }
 0x123   : > { %1273 = vmatmul.bf16.gmra.mxu0 %v991_v9  ;;  %v994_v9 = vpack.c.bf16 %v984_v0, %v983_v63  ;;  %v2563_v63 = vld [vmem:[%s3522_s9 + $0x30] sm:$0xff]  ;;  %v2562_v0 = vld [vmem:[%s3522_s9 + $0x28] sm:$0xff] }
 0x125   : > { %v3071_v32 = vpop.f32.mrf.mxu1 }
 0x12d   : > { %v809_v42 = vpop.f32.mrf.mxu0  ;;  %v3083_v43 = vpop.f32.mrf.mxu1 }
 0x130   : > { %2353 = vmatmul.msk.bf16.gmra.mxu1 %vm770_vm3, %v851_v49 }
 0x133   : > { %1278 = vmatmul.bf16.gmra.mxu0 %v992_v33 }
 0x135   : > { %v811_v50 = vpop.f32.mrf.mxu0  ;;  %v3088_v52 = vpop.f32.mrf.mxu1 }
 0x136   : > { %v998_v54 = vpack.c.bf16 %v811_v50, %v809_v42  ;;  %v981_v50 = vld [vmem:[%s2754_s25 + $0x40] sm:$0xff] }
 0x137   : > { %v993_v58 = vpack.c.bf16 %v982_v12, %v981_v50  ;;  %v1585_v50 = vld [vmem:[%s3518_s5] sm:$0xff] }
 0x138   : > { %1171 = vmatmul.bf16.gmra.mxu3 %v998_v54 }
 0x13d   : > { %v814_v14 = vpop.f32.mrf.mxu0  ;;  %v885_v60 = vpop.f32.mrf.mxu1 }
 0x143   : > { %1283 = vmatmul.bf16.gmra.mxu0 %v993_v58  ;;  %v987_v58 = vld [vmem:[%s2754_s25 + $0x70] sm:$0xff] }
 0x145   : > { %v816_v61 = vpop.f32.mrf.mxu0  ;;  %v887_v62 = vpop.f32.mrf.mxu1 }
 0x146   : > { %v1005_v3 = vpack.c.bf16 %v887_v62, %v885_v60  ;;  %v999_v7 = vpack.c.bf16 %v816_v61, %v814_v14 }
 0x148   : > { %1069 = vmatmul.bf16.vlgmr.msra.gmra.mxu2 %v1005_v3  ;;  %1176 = vmatmul.bf16.gmra.mxu3 %v999_v7 }
 0x14d   : > { %v819_v10 = vpop.f32.mrf.mxu0  ;;  %v890_v21 = vpop.f32.mrf.mxu1 }
 0x153   : > { %1288 = vmatmul.bf16.gmra.mxu0 %v994_v9 }
 0x155   : > { %v821_v22 = vpop.f32.mrf.mxu0  ;;  %v892_v23 = vpop.f32.mrf.mxu1 }
 0x156   : > { %v1006_v26 = vpack.c.bf16 %v892_v23, %v890_v21  ;;  %v1000_v30 = vpack.c.bf16 %v821_v22, %v819_v10  ;;  %v1592_v10 = vld [vmem:[%s3518_s5 + $0x38] sm:$0xff]  ;;  %v1591_v21 = vld [vmem:[%s3518_s5 + $0x30] sm:$0xff]  ;;  %v1590_v22 = vld [vmem:[%s3518_s5 + $0x28] sm:$0xff] }
 0x157   : > { %1762 = vmatpush.msrb.mxu3 %v1592_v10  ;;  %1649 = vmatpush.msrb.mxu2 %v1592_v10  ;;  %v2560_v10 = vld [vmem:[%s3522_s9 + $0x18] sm:$0xff] }
 0x158   : > { %1074 = vmatmul.bf16.gmra.mxu2 %v1006_v26  ;;  %1181 = vmatmul.bf16.gmra.mxu3 %v1000_v30  ;;  %v1587_v26 = vld [vmem:[%s3518_s5 + $0x10] sm:$0xff]  ;;  %v1586_v30 = vld [vmem:[%s3518_s5 + $0x8] sm:$0xff] }
 0x159   : > { %1763 = vmatpush.msrb.mxu3 %v1591_v21  ;;  %1650 = vmatpush.msrb.mxu2 %v1591_v21 }
 0x15b   : > { %1764 = vmatpush.msrb.mxu3 %v1590_v22  ;;  %1651 = vmatpush.msrb.mxu2 %v1590_v22 }
 0x15d   : > { %v824_v37 = vpop.f32.mrf.mxu0  ;;  %v895_v38 = vpop.f32.mrf.mxu1  ;;  %1765 = vmatpush.msrb.mxu3 %v1589_v24  ;;  %1652 = vmatpush.msrb.mxu2 %v1589_v24  ;;  %v2558_v24 = vld [vmem:[%s3522_s9 + $0x8] sm:$0xff] }
 0x15f   : > { %1766 = vmatpush.msrb.mxu3 %v1588_v25  ;;  %1653 = vmatpush.msrb.mxu2 %v1588_v25 }
 0x161   : > { %1767 = vmatpush.msrb.mxu3 %v1587_v26  ;;  %1654 = vmatpush.msrb.mxu2 %v1587_v26 }
 0x163   : > { %1768 = vmatpush.msrb.mxu3 %v1586_v30  ;;  %1655 = vmatpush.msrb.mxu2 %v1586_v30 }
 0x165   : > { %v826_v42 = vpop.f32.mrf.mxu0  ;;  %v897_v49 = vpop.f32.mrf.mxu1  ;;  %1769 = vmatpush.msrb.mxu3 %v1585_v50  ;;  %1656 = vmatpush.msrb.mxu2 %v1585_v50 }
 0x166   : > { %v1007_v53 = vpack.c.bf16 %v897_v49, %v895_v38  ;;  %v1001_v54 = vpack.c.bf16 %v826_v42, %v824_v37  ;;  %v985_v37 = vld [vmem:[%s2754_s25 + $0x60] sm:$0xff]  ;;  %v986_v38 = vld [vmem:[%s2754_s25 + $0x68] sm:$0xff]  ;;  %v1003_v49 = vpack.c.bf16 %v3071_v32, %v3054_v13  ;;  %v2564_v32 = vld [vmem:[%s3522_s9 + $0x38] sm:$0xff] }
 0x167   : > { %v995_v12 = vpack.c.bf16 %v986_v38, %v985_v37  ;;  %1432 = vmatpush.bf16.msra.mxu1 %v2564_v32 }
 0x168   : > { %1079 = vmatmul.bf16.gmra.mxu2 %v1007_v53  ;;  %1186 = vmatmul.bf16.gmra.mxu3 %v1001_v54 }
 0x169   : > { %1293 = vmatmul.bf16.gmra.mxu0 %v995_v12 }
 0x16b   : > { %1433 = vmatpush.bf16.msra.mxu1 %v2563_v63 }
 0x16d   : > { %v829_v14 = vpop.f32.mrf.mxu0  ;;  %v900_v60 = vpop.f32.mrf.mxu1 }
 0x16f   : > { %1434 = vmatpush.bf16.msra.mxu1 %v2562_v0 }
 0x175   : > { %v831_v61 = vpop.f32.mrf.mxu0  ;;  %v902_v62 = vpop.f32.mrf.mxu1 }
 0x176   : > { %v1002_v3 = vpack.c.bf16 %v831_v61, %v829_v14  ;;  %v1008_v7 = vpack.c.bf16 %v902_v62, %v900_v60  ;;  %v988_v14 = vld [vmem:[%s2754_s25 + $0x78] sm:$0xff]  ;;  %v1004_v61 = vpack.c.bf16 %v3088_v52, %v3083_v43 }
 0x177   : > { %v996_v13 = vpack.c.bf16 %v988_v14, %v987_v58 }
 0x178   : > { %1084 = vmatmul.bf16.gmra.mxu2 %v1008_v7  ;;  %1191 = vmatmul.bf16.gmra.mxu3 %v1002_v3  ;;  %v2561_v7 = vld [vmem:[%s3522_s9 + $0x20] sm:$0xff] }
 0x179   : > { %1298 = vmatmul.bf16.gmra.mxu0 %v996_v13  ;;  %1435 = vmatpush.bf16.msra.mxu1 %v2561_v7 }
 0x17d   : > { %v905_v23 = vpop.f32.mrf.mxu1  ;;  %v1264_v21 = vpop.f32.mrf.mxu0  ;;  %1436 = vmatpush.bf16.msra.mxu1 %v2560_v10 }
 0x185   : > { %v907_v33 = vpop.f32.mrf.mxu1  ;;  %v1266_v26 = vpop.f32.mrf.mxu0 }
 0x186   : > { %v1009_v42 = vpack.c.bf16 %v907_v33, %v905_v23 }
 0x188   : > { %1089 = vmatmul.bf16.gmra.mxu2 %v1009_v42  ;;  %1196 = vmatmul.bf16.gmra.mxu3 %v1003_v49 }
 0x18d   : > { %v910_v53 = vpop.f32.mrf.mxu1 }
 0x190   : > { %v1269_v33 = vpop.f32.mrf.mxu0 }
 0x193   : > { %v1167_v3 = vpop.f32.mrf.mxu3 }
 0x195   : > { %v912_v54 = vpop.f32.mrf.mxu1 }
 0x196   : > { %v1010_v60 = vpack.c.bf16 %v912_v54, %v910_v53 }
 0x198   : > { %1094 = vmatmul.bf16.gmra.mxu2 %v1010_v60  ;;  %1201 = vmatmul.bf16.gmra.mxu3 %v1004_v61  ;;  %v1271_v42 = vpop.f32.mrf.mxu0 }
 0x19b   : > { %v1169_v22 = vpop.f32.mrf.mxu3 }
 0x19d   : > { %v915_v62 = vpop.f32.mrf.mxu1 }
 0x1a0   : > { %v1274_v58 = vpop.f32.mrf.mxu0 }
 0x1a5   : > { %v917_v43 = vpop.f32.mrf.mxu1 }
 0x1a6   : > { %v1011_v52 = vpack.c.bf16 %v917_v43, %v915_v62 }
 0x1a8   : > { %1099 = vmatmul.bf16.gmra.mxu2 %v1011_v52  ;;  %2498 = vmatmul.msk.f32.vlgmr.msrb.gmra.mxu3 %vm770_vm3, %v2884_v46  ;;  %v2559_v46 = vld [vmem:[%s3522_s9 + $0x10] sm:$0xff]  ;;  %v1276_v62 = vpop.f32.mrf.mxu0 }
 0x1a9   : > { %1437 = vmatpush.bf16.msra.mxu1 %v2559_v46 }
 0x1ad   : > { %v920_v9 = vpop.f32.mrf.mxu1  ;;  %1438 = vmatpush.bf16.msra.mxu1 %v2558_v24 }
 0x1b0   : > { %2499 = vmatmul.msk.f32.gmra.mxu3 %vm770_vm3, %v2881_v45  ;;  %v2557_v45 = vld [vmem:[%s3522_s9] sm:$0xff] }
 0x1b1   : > { %1439 = vmatpush.bf16.msra.mxu1 %v2557_v45 }
 0x1b5   : > { %v922_v23 = vpop.f32.mrf.mxu1 }
 0x1b6   : > { %v1012_v25 = vpack.c.bf16 %v922_v23, %v920_v9  ;;  %v1279_v9 = vpop.f32.mrf.mxu0 }
 0x1b8   : > { %1104 = vmatmul.bf16.gmra.mxu2 %v1012_v25  ;;  %2500 = vmatmul.msk.f32.gmra.mxu3 %vm770_vm3, %v2906_v56 }
 0x1bb   : > { %v1172_v30 = vpop.f32.mrf.mxu3 }
 0x1be   : > { %v1281_v24 = vpop.f32.mrf.mxu0 }
 0x1c0   : > { %2501 = vmatmul.msk.f32.gmra.mxu3 %vm770_vm3, %v2903_v55  ;;  %v3175_v55 = vld [vmem:[%s3521_s8] ss:$0 sm:$0xff] }
 0x1c3   : > { %v1174_v37 = vpop.f32.mrf.mxu3 }
 0x1c8   : > { %2482 = vmatmul.msk.f32.vlgmr.msrb.gmra.mxu2 %vm770_vm3, %v2834_v15  ;;  %2502 = vmatmul.msk.f32.gmra.mxu3 %vm770_vm3, %v2931_v5 }
 0x1cb   : > { %v1070_v38 = vpop.f32.mrf.mxu2  ;;  %v1177_v56 = vpop.f32.mrf.mxu3 }
 0x1cc   : > { %v1168_v49 = vadd.f32 %v1167_v3, %v1070_v38 }
 0x1ce   : > { %v1304_v50 = vadd.f32 %v1264_v21, %v1168_v49 }
 0x1d0   : > { %2483 = vmatmul.msk.f32.gmra.mxu2 %vm770_vm3, %v2838_v20  ;;  %2503 = vmatmul.msk.f32.gmra.mxu3 %vm770_vm3, %v2925_v2  ;;  %v1324_v5 = vadd.f32 %v3175_v55, %v1304_v50 }
 0x1d2   : > { %v1340_v20 = vmax.f32 %v1324_v5, 0.0 }
 0x1d3   : > { %v1072_v15 = vpop.f32.mrf.mxu2  ;;  %v1179_v12 = vpop.f32.mrf.mxu3 }
 0x1d4   : > { %v1170_v53 = vadd.f32 %v1169_v22, %v1072_v15 }
 0x1d6   : > { %v1305_v54 = vadd.f32 %v1266_v26, %v1170_v53 }
 0x1d8   : > { %v1325_v14 = vadd.f32 %v3175_v55, %v1305_v54  ;;  %2484 = vmatmul.msk.f32.gmra.mxu2 %vm770_vm3, %v2858_v34  ;;  %2504 = vmatmul.msk.f32.gmra.mxu3 %vm770_vm3, %v2956_v17 }
 0x1da   : > { %v1341_v2 = vmax.f32 %v1325_v14, 0.0 }
 0x1db   : > { %v1075_v60 = vpop.f32.mrf.mxu2  ;;  %v1182_v61 = vpop.f32.mrf.mxu3 }
 0x1dc   : > { %v1356_v13 = vpack.c.bf16 %v1341_v2, %v1340_v20  ;;  %v1173_v32 = vadd.f32 %v1172_v30, %v1075_v60 }
 0x1de   : > { %1440 = vmatmul.bf16.vlgmr.msra.gmra.mxu1 %v1356_v13  ;;  %v1306_v63 = vadd.f32 %v1269_v33, %v1173_v32 }
 0x1e0   : > { %2485 = vmatmul.msk.f32.gmra.mxu2 %vm770_vm3, %v2868_v39  ;;  %2505 = vmatmul.msk.f32.gmra.mxu3 %vm770_vm3, %v2953_v16  ;;  %v1326_v17 = vadd.f32 %v3175_v55, %v1306_v63 }
 0x1e2   : > { %v1342_v39 = vmax.f32 %v1326_v17, 0.0 }
 0x1e3   : > { %v1077_v0 = vpop.f32.mrf.mxu2  ;;  %v1184_v34 = vpop.f32.mrf.mxu3 }
 0x1e4   : > { %v1175_v43 = vadd.f32 %v1174_v37, %v1077_v0 }
 0x1e6   : > { %v1307_v52 = vadd.f32 %v1271_v42, %v1175_v43 }
 0x1e8   : > { %2486 = vmatmul.msk.f32.gmra.mxu2 %vm770_vm3, %v2890_v48  ;;  %2506 = vmatmul.msk.f32.gmra.mxu3 %vm770_vm3, %v2982_v27  ;;  %v1327_v3 = vadd.f32 %v3175_v55, %v1307_v52 }
 0x1ea   : > { %v1343_v7 = vmax.f32 %v1327_v3, 0.0 }
 0x1eb   : > { %v1080_v16 = vpop.f32.mrf.mxu2  ;;  %v1187_v10 = vpop.f32.mrf.mxu3 }
 0x1ec   : > { %v1357_v21 = vpack.c.bf16 %v1343_v7, %v1342_v39  ;;  %v1178_v22 = vadd.f32 %v1177_v56, %v1080_v16  ;;  %v1284_v56 = vpop.f32.mrf.mxu0 }
 0x1ee   : > { %1445 = vmatmul.bf16.gmra.mxu1 %v1357_v21  ;;  %v1308_v48 = vadd.f32 %v1274_v58, %v1178_v22 }
 0x1f0   : > { %2487 = vmatmul.msk.f32.gmra.mxu2 %vm770_vm3, %v2887_v47  ;;  %2507 = vmatmul.msk.f32.gmra.mxu3 %vm770_vm3, %v2988_v31  ;;  %v1328_v25 = vadd.f32 %v3175_v55, %v1308_v48 }
 0x1f2   : > { %v1344_v47 = vmax.f32 %v1328_v25, 0.0 }
 0x1f3   : > { %v1082_v46 = vpop.f32.mrf.mxu2  ;;  %v1189_v27 = vpop.f32.mrf.mxu3 }
 0x1f4   : > { %v1180_v23 = vadd.f32 %v1179_v12, %v1082_v46  ;;  %v1286_v53 = vpop.f32.mrf.mxu0 }
 0x1f6   : > { %v1309_v26 = vadd.f32 %v1276_v62, %v1180_v23 }
 0x1f8   : > { %v1329_v45 = vadd.f32 %v3175_v55, %v1309_v26  ;;  %2488 = vmatmul.msk.f32.gmra.mxu2 %vm770_vm3, %v2909_v57  ;;  %2508 = vmatmul.msk.f32.gmra.mxu3 %vm770_vm3, %v3017_v51 }
 0x1fa   : > { %v1345_v30 = vmax.f32 %v1329_v45, 0.0 }
 0x1fb   : > { %v1085_v33 = vpop.f32.mrf.mxu2  ;;  %v1192_v38 = vpop.f32.mrf.mxu3 }
 0x1fc   : > { %v1358_v31 = vpack.c.bf16 %v1345_v30, %v1344_v47  ;;  %v1183_v37 = vadd.f32 %v1182_v61, %v1085_v33 }
 0x1fe   : > { %1450 = vmatmul.bf16.gmra.mxu1 %v1358_v31  ;;  %v1310_v42 = vadd.f32 %v1279_v9, %v1183_v37 }
 0x200   : > { %2489 = vmatmul.msk.f32.gmra.mxu2 %vm770_vm3, %v2912_v59  ;;  %2509 = vmatmul.msk.f32.gmra.mxu3 %vm770_vm3, %v3008_v44  ;;  %v1330_v50 = vadd.f32 %v3175_v55, %v1310_v42 }
 0x202   : > { %v1346_v59 = vmax.f32 %v1330_v50, 0.0 }
 0x203   : > { %v1087_v49 = vpop.f32.mrf.mxu2  ;;  %v1194_v12 = vpop.f32.mrf.mxu3 }
 0x204   : > { %v1185_v57 = vadd.f32 %v1184_v34, %v1087_v49 }
 0x206   : > { %v1311_v51 = vadd.f32 %v1281_v24, %v1185_v57 }
 0x208   : > { %v1331_v15 = vadd.f32 %v3175_v55, %v1311_v51  ;;  %2490 = vmatmul.msk.f32.gmra.mxu2 %vm770_vm3, %v2934_v6  ;;  %2510 = vmatmul.msk.f32.gmra.mxu3 %vm770_vm3, %v3043_v8  ;;  %v1289_v6 = vpop.f32.mrf.mxu0 }
 0x20a   : > { %v1347_v5 = vmax.f32 %v1331_v15, 0.0 }
 0x20b   : > { %v1090_v54 = vpop.f32.mrf.mxu2  ;;  %v1197_v20 = vpop.f32.mrf.mxu3 }
 0x20c   : > { %v1359_v44 = vpack.c.bf16 %v1347_v5, %v1346_v59  ;;  %v1188_v58 = vadd.f32 %v1187_v10, %v1090_v54 }
 0x20e   : > { %1455 = vmatmul.bf16.gmra.mxu1 %v1359_v44  ;;  %v1312_v14 = vadd.f32 %v1284_v56, %v1188_v58 }
 0x210   : > { %2491 = vmatmul.msk.f32.gmra.mxu2 %vm770_vm3, %v2928_v4  ;;  %2511 = vmatmul.msk.f32.gmra.mxu3 %vm770_vm3, %v3052_v11  ;;  %v1332_v8 = vadd.f32 %v3175_v55, %v1312_v14  ;;  %v1291_v0 = vpop.f32.mrf.mxu0 }
 0x212   : > { %v1348_v32 = vmax.f32 %v1332_v8, 0.0 }
 0x213   : > { %v1092_v2 = vpop.f32.mrf.mxu2  ;;  %v1199_v11 = vpop.f32.mrf.mxu3 }
 0x214   : > { %v1190_v60 = vadd.f32 %v1189_v27, %v1092_v2  ;;  %v3270_v2 = vld [vmem:[%s3524_s11] ss:$0 sm:$0xff] }
 0x216   : > { %v1313_v61 = vadd.f32 %v1286_v53, %v1190_v60 }
 0x218   : > { %v1333_v13 = vadd.f32 %v3175_v55, %v1313_v61  ;;  %2492 = vmatmul.msk.f32.gmra.mxu2 %vm770_vm3, %v2962_v19  ;;  %2512 = vmatmul.msk.f32.gmra.mxu3 %vm770_vm3, %v3081_v41  ;;  %v1294_v39 = vpop.f32.mrf.mxu0 }
 0x21a   : > { %v1349_v4 = vmax.f32 %v1333_v13, 0.0 }
 0x21b   : > { %v1095_v62 = vpop.f32.mrf.mxu2  ;;  %v1202_v41 = vpop.f32.mrf.mxu3 }
 0x21c   : > { %v1360_v63 = vpack.c.bf16 %v1349_v4, %v1348_v32  ;;  %v1193_v34 = vadd.f32 %v1192_v38, %v1095_v62 }
 0x21e   : > { %1460 = vmatmul.bf16.gmra.mxu1 %v1360_v63  ;;  %v1314_v43 = vadd.f32 %v1289_v6, %v1193_v34 }
 0x220   : > { %2493 = vmatmul.msk.f32.gmra.mxu2 %vm770_vm3, %v2959_v18  ;;  %2513 = vmatmul.msk.f32.gmra.mxu3 %vm770_vm3, %v3078_v40  ;;  %v1334_v17 = vadd.f32 %v3175_v55, %v1314_v43  ;;  %v1296_v22 = vpop.f32.mrf.mxu0 }
 0x222   : > { %v1350_v9 = vmax.f32 %v1334_v17, 0.0 }
 0x223   : > { %v1097_v52 = vpop.f32.mrf.mxu2  ;;  %v1204_v40 = vpop.f32.mrf.mxu3 }
 0x224   : > { %v1195_v19 = vadd.f32 %v1194_v12, %v1097_v52 }
 0x226   : > { %v1315_v3 = vadd.f32 %v1291_v0, %v1195_v19 }
 0x228   : > { %v1335_v7 = vadd.f32 %v3175_v55, %v1315_v3  ;;  %2494 = vmatmul.msk.f32.gmra.mxu2 %vm770_vm3, %v2846_v28  ;;  %v1299_v47 = vpop.f32.mrf.mxu0 }
 0x22a   : > { %v1351_v16 = vmax.f32 %v1335_v7, 0.0 }
 0x22b   : > { %v1100_v10 = vpop.f32.mrf.mxu2  ;;  %v3237_v26 = vpop.f32.mrf.mxu3 }
 0x22c   : > { %v1361_v18 = vpack.c.bf16 %v1351_v16, %v1350_v9  ;;  %v1198_v21 = vadd.f32 %v1197_v20, %v1100_v10  ;;  %3531 = vst [vmem:[#allocation5_spill] sm:$0xff] %v3237_v26 }
 0x22e   : > { %1465 = vmatmul.bf16.gmra.mxu1 %v1361_v18  ;;  %v1316_v48 = vadd.f32 %v1294_v39, %v1198_v21 }
 0x230   : > { %2495 = vmatmul.msk.f32.gmra.mxu2 %vm770_vm3, %v2849_v29  ;;  %v1336_v27 = vadd.f32 %v3175_v55, %v1316_v48  ;;  %v1301_v42 = vpop.f32.mrf.mxu0 }
 0x232   : > { %v1352_v28 = vmax.f32 %v1336_v27, 0.0 }
 0x233   : > { %v1102_v46 = vpop.f32.mrf.mxu2  ;;  %v3241_v38 = vpop.f32.mrf.mxu3 }
 0x234   : > { %v1200_v23 = vadd.f32 %v1199_v11, %v1102_v46 }
 0x236   : > { %v1317_v24 = vadd.f32 %v1296_v22, %v1200_v23 }
 0x238   : > { %v1337_v25 = vadd.f32 %v3175_v55, %v1317_v24  ;;  %2496 = vmatmul.msk.f32.gmra.mxu2 %vm770_vm3, %v2861_v35 }
 0x23a   : > { %v1353_v45 = vmax.f32 %v1337_v25, 0.0 }
 0x23b   : > { %v1105_v30 = vpop.f32.mrf.mxu2 }
 0x23c   : > { %v1362_v33 = vpack.c.bf16 %v1353_v45, %v1352_v28  ;;  %v1203_v29 = vadd.f32 %v1202_v41, %v1105_v30 }
 0x23e   : > { %1470 = vmatmul.bf16.gmra.mxu1 %v1362_v33  ;;  %v1318_v31 = vadd.f32 %v1299_v47, %v1203_v29 }
 0x240   : > { %2497 = vmatmul.msk.f32.gmra.mxu2 %vm770_vm3, %v2864_v36  ;;  %v1338_v35 = vadd.f32 %v3175_v55, %v1318_v31  ;;  %v3249_v36 = vpop.f32.mrf.mxu3 }
 0x242   : > { %v1354_v50 = vmax.f32 %v1338_v35, 0.0 }
 0x243   : > { %v1107_v37 = vpop.f32.mrf.mxu2 }
 0x244   : > { %v1205_v56 = vadd.f32 %v1204_v40, %v1107_v37 }
 0x246   : > { %v1319_v49 = vadd.f32 %v1301_v42, %v1205_v56 }
 0x248   : > { %v1339_v57 = vadd.f32 %v3175_v55, %v1319_v49  ;;  %v3255_v54 = vpop.f32.mrf.mxu3  ;;  %v3260_v55 = vld [vmem:[%s3523_s10] ss:$0 sm:$0xff] }
 0x24a   : > { %v1355_v51 = vmax.f32 %v1339_v57, 0.0 }
 0x24b   : > { %v3245_v15 = vpop.f32.mrf.mxu2 }
 0x24c   : > { %v1363_v53 = vpack.c.bf16 %v1355_v51, %v1354_v50 }
 0x24e   : > { %1475 = vmatmul.bf16.gmra.mxu1 %v1363_v53 }
 0x250   : > { %v3273_v8 = vpop.f32.mrf.mxu3 }
 0x253   : > { %v3251_v59 = vpop.f32.mrf.mxu2 }
 0x258   : > { %v3285_v52 = vpop.f32.mrf.mxu3 }
 0x25b   : > { %v1441_v44 = vpop.f32.mrf.mxu1  ;;  %v3262_v58 = vpop.f32.mrf.mxu2 }
 0x25c   : > { %v1442_v14 = vadd.f32 %v3260_v55, %v1441_v44 }
 0x25e   : > { %v1481_v6 = vmax.f32 %v1442_v14, 0.0 }
 0x260   : > { %v1501_v60 = vmul.f32 %v3270_v2, %v1481_v6  ;;  %v3297_v18 = vpop.f32.mrf.mxu3 }
 0x262   : > { %v1517_v61 = vsel %vm770_vm3, %v1501_v60, 0.0 }
 0x263   : > { %v1443_v13 = vpop.f32.mrf.mxu1  ;;  %v3276_v4 = vpop.f32.mrf.mxu2  ;;  %1518 = vadd.xlane.f32.xlu1 %v1517_v61 }
 0x264   : > { %v1444_v32 = vadd.f32 %v3260_v55, %v1443_v13 }
 0x266   : > { %v1482_v11 = vmax.f32 %v1444_v32, 0.0 }
 0x268   : > { %v1502_v63 = vmul.f32 %v3270_v2, %v1482_v11  ;;  %v3306_v25 = vpop.f32.mrf.mxu3 }
 0x26a   : > { %v1520_v0 = vsel %vm770_vm3, %v1502_v63, 0.0 }
 0x26b   : > { %v3283_v34 = vpop.f32.mrf.mxu2  ;;  %1521 = vadd.xlane.f32.xlu0 %v1520_v0  ;;  %v1446_v43 = vpop.f32.mrf.mxu1 }
 0x26c   : > { %v1447_v17 = vadd.f32 %v3260_v55, %v1446_v43 }
 0x26e   : > { %v1483_v41 = vmax.f32 %v1447_v17, 0.0 }
 0x270   : > { %v1503_v3 = vmul.f32 %v3270_v2, %v1483_v41  ;;  %v3316_v56 = vpop.f32.mrf.mxu3 }
 0x272   : > { %v1523_v39 = vsel %vm770_vm3, %v1503_v3, 0.0 }
 0x273   : > { %v1448_v7 = vpop.f32.mrf.mxu1  ;;  %v3292_v9 = vpop.f32.mrf.mxu2  ;;  %1524 = vadd.xlane.f32.xlu2 %v1523_v39 }
 0x274   : > { %v1449_v16 = vadd.f32 %v3260_v55, %v1448_v7 }
 0x276   : > { %v1484_v21 = vmax.f32 %v1449_v16, 0.0 }
 0x278   : > { %v1504_v40 = vmul.f32 %v3270_v2, %v1484_v21 }
 0x27a   : > { %v1526_v22 = vsel %vm770_vm3, %v1504_v40, 0.0 }
 0x27b   : > { %v3301_v48 = vpop.f32.mrf.mxu2  ;;  %1527 = vadd.xlane.f32.xlu1 %v1526_v22  ;;  %v1451_v46 = vpop.f32.mrf.mxu1 }
 0x27c   : > { %v1452_v27 = vadd.f32 %v3260_v55, %v1451_v46 }
 0x27e   : > { %v1485_v24 = vmax.f32 %v1452_v27, 0.0 }
 0x280   : > { %v1505_v28 = vmul.f32 %v3270_v2, %v1485_v24 }
 0x282   : > { %v1529_v45 = vsel %vm770_vm3, %v1505_v28, 0.0 }
 0x283   : > { %v1453_v47 = vpop.f32.mrf.mxu1  ;;  %v3310_v30 = vpop.f32.mrf.mxu2  ;;  %1530 = vadd.xlane.f32.xlu0 %v1529_v45 }
 0x284   : > { %v1454_v33 = vadd.f32 %v3260_v55, %v1453_v47 }
 0x286   : > { %v1486_v31 = vmax.f32 %v1454_v33, 0.0 }
 0x288   : > { %v1506_v37 = vmul.f32 %v3270_v2, %v1486_v31 }
 0x28a   : > { %v1532_v42 = vsel %vm770_vm3, %v1506_v37, 0.0 }
 0x28b   : > { %v3319_v35 = vpop.f32.mrf.mxu2  ;;  %1533 = vadd.xlane.f32.xlu2 %v1532_v42  ;;  %v1456_v49 = vpop.f32.mrf.mxu1 }
 0x28c   : > { %v1457_v50 = vadd.f32 %v3260_v55, %v1456_v49 }
 0x28e   : > { %v1487_v51 = vmax.f32 %v1457_v50, 0.0 }
 0x290   : > { %v1507_v53 = vmul.f32 %v3270_v2, %v1487_v51 }
 0x292   : > { %v1535_v44 = vsel %vm770_vm3, %v1507_v53, 0.0 }
 0x293   : > { %v1458_v14 = vpop.f32.mrf.mxu1  ;;  %1536 = vadd.xlane.f32.xlu1 %v1535_v44 }
 0x294   : > { %v1459_v6 = vadd.f32 %v3260_v55, %v1458_v14 }
 0x296   : > { %v1488_v60 = vmax.f32 %v1459_v6, 0.0 }
 0x298   : > { %v1508_v61 = vmul.f32 %v3270_v2, %v1488_v60 }
 0x29a   : > { %v1538_v13 = vsel %vm770_vm3, %v1508_v61, 0.0 }
 0x29b   : > { %1539 = vadd.xlane.f32.xlu0 %v1538_v13  ;;  %v1461_v32 = vpop.f32.mrf.mxu1 }
 0x29c   : > { %v1462_v11 = vadd.f32 %v3260_v55, %v1461_v32 }
 0x29e   : > { %v1489_v63 = vmax.f32 %v1462_v11, 0.0 }
 0x2a0   : > { %v1509_v0 = vmul.f32 %v3270_v2, %v1489_v63 }
 0x2a2   : > { %v1541_v43 = vsel %vm770_vm3, %v1509_v0, 0.0 }
 0x2a3   : > { %v1463_v17 = vpop.f32.mrf.mxu1  ;;  %1542 = vadd.xlane.f32.xlu2 %v1541_v43  ;;  %v3351_v43 = vpop.permute.xlu0 %1955 }
 0x2a4   : > { %v1464_v41 = vadd.f32 %v3260_v55, %v1463_v17 }
 0x2a6   : > { %v1490_v3 = vmax.f32 %v1464_v41, 0.0 }
 0x2a8   : > { %v1510_v39 = vmul.f32 %v3270_v2, %v1490_v3  ;;  %v3355_v3 = vpop.permute.xlu2 %1960 }
 0x2aa   : > { %v1544_v7 = vsel %vm770_vm3, %v1510_v39, 0.0 }
 0x2ab   : > { %1545 = vadd.xlane.f32.xlu1 %v1544_v7  ;;  %v1466_v16 = vpop.f32.mrf.mxu1  ;;  %v3357_v39 = vpop.permute.xlu0 %1950 }
 0x2ac   : > { %v1467_v21 = vadd.f32 %v3260_v55, %v1466_v16  ;;  %v3359_v7 = vpop.permute.xlu1 %1945 }
 0x2ae   : > { %v1491_v40 = vmax.f32 %v1467_v21, 0.0 }
 0x2b0   : > { %v1511_v22 = vmul.f32 %v3270_v2, %v1491_v40  ;;  %v3361_v16 = vpop.permute.xlu2 %1940 }
 0x2b2   : > { %v1547_v46 = vsel %vm770_vm3, %v1511_v22, 0.0 }
 0x2b3   : > { %v1468_v27 = vpop.f32.mrf.mxu1  ;;  %1548 = vadd.xlane.f32.xlu0 %v1547_v46  ;;  %v3363_v21 = vpop.permute.xlu0 %1935 }
 0x2b4   : > { %v1469_v24 = vadd.f32 %v3260_v55, %v1468_v27  ;;  %v3365_v40 = vpop.permute.xlu1 %1930 }
 0x2b6   : > { %v1492_v28 = vmax.f32 %v1469_v24, 0.0 }
 0x2b8   : > { %v1512_v45 = vmul.f32 %v3270_v2, %v1492_v28 }
 0x2ba   : > { %v1550_v47 = vsel %vm770_vm3, %v1512_v45, 0.0 }
 0x2bb   : > { %v1471_v33 = vpop.f32.mrf.mxu1  ;;  %1551 = vadd.xlane.f32.xlu2 %v1550_v47  ;;  %v3369_v22 = vpop.permute.xlu0 %1920  ;;  %v3377_v47 = vld [vmem:[#allocation3] ss:$0 sm:$0xff] }
 0x2bc   : > { %v1472_v31 = vadd.f32 %v3260_v55, %v1471_v33 }
 0x2be   : > { %v1493_v37 = vmax.f32 %v1472_v31, 0.0 }
 0x2c0   : > { %v1513_v42 = vmul.f32 %v3270_v2, %v1493_v37 }
 0x2c2   : > { %v1553_v49 = vsel %vm770_vm3, %v1513_v42, 0.0 }
 0x2c3   : > { %v1473_v50 = vpop.f32.mrf.mxu1  ;;  %1554 = vadd.xlane.f32.xlu2 %v1553_v49 }
 0x2c4   : > { %v1474_v51 = vadd.f32 %v3260_v55, %v1473_v50 }
 0x2c6   : > { %v1494_v53 = vmax.f32 %v1474_v51, 0.0 }
 0x2c8   : > { %v1514_v44 = vmul.f32 %v3270_v2, %v1494_v53 }
 0x2ca   : > { %v1556_v14 = vsel %vm770_vm3, %v1514_v44, 0.0 }
 0x2cb   : > { %v1476_v6 = vpop.f32.mrf.mxu1  ;;  %1557 = vadd.xlane.f32.xlu1 %v1556_v14 }
 0x2cc   : > { %v1477_v60 = vadd.f32 %v3260_v55, %v1476_v6 }
 0x2ce   : > { %v1495_v61 = vmax.f32 %v1477_v60, 0.0 }
 0x2d0   : > { %v1515_v13 = vmul.f32 %v3270_v2, %v1495_v61 }
 0x2d2   : > { %v1559_v32 = vsel %vm770_vm3, %v1515_v13, 0.0 }
 0x2d3   : > { %v1478_v11 = vpop.f32.mrf.mxu1  ;;  %1560 = vadd.xlane.f32.xlu0 %v1559_v32 }
 0x2d4   : > { %v1479_v63 = vadd.f32 %v3260_v55, %v1478_v11  ;;  %v3367_v55 = vpop.permute.xlu2 %1925  ;;  %v1823_v11 = vld [vmem:[%s2759_s30 + $0x20] sm:$0xff] }
 0x2d6   : > { %v1496_v0 = vmax.f32 %v1479_v63, 0.0  ;;  %v1839_v63 = vmax.f32 %v1823_v11, 1e-12 }
 0x2d8   : > { %v1516_v17 = vmul.f32 %v3270_v2, %v1496_v0  ;;  %v3371_v2 = vpop.permute.xlu1 %1915  ;;  %2627 = vrcp.f32 %v1839_v63 }
 0x2da   : > { %v1562_v41 = vsel %vm770_vm3, %v1516_v17, 0.0 }
 0x2db   : > { %1563 = vadd.xlane.f32.xlu2 %v1562_v41 }
 0x2dc   : > { %v3373_v46 = vpop.permute.xlu2 %1910 }
 0x2de   : > { %v1522_v27 = vpop.xlane.xlu0 %1521  ;;  %v2628_v41 = vpop.eup %2627 }
 0x2e0   : > { %v3375_v24 = vpop.xlane.xlu1 %1518 }
 0x2e6   : > { %v1525_v28 = vpop.xlane.xlu2 %1524 }
 0x2ee   : > { %v1528_v33 = vpop.xlane.xlu1 %1527 }
 0x2f6   : > { %v1531_v45 = vpop.xlane.xlu0 %1530 }
 0x2fe   : > { %v1534_v31 = vpop.xlane.xlu2 %1533 }
 0x306   : > { %v1537_v49 = vpop.xlane.xlu1 %1536 }
 0x30e   : > { %v1540_v37 = vpop.xlane.xlu0 %1539 }
 0x30f   : > { %v1576_v42 = vadd.f32 %v3377_v47, %v1540_v37 }
 0x311   : > { %2016 = vperm.xlu0 %2597, %v1576_v42  }
 0x316   : > { %v1543_v50 = vpop.xlane.xlu2 %1542 }
 0x317   : > { %v1577_v51 = vadd.f32 %v3377_v47, %v1543_v50  ;;  %v1820_v50 = vld [vmem:[%s2759_s30 + $0x8] sm:$0xff] }
 0x319   : > { %2021 = vperm.xlu2 %2599, %v1577_v51   ;;  %v1821_v51 = vld [vmem:[%s2759_s30 + $0x10] sm:$0xff] }
 0x31e   : > { %v1546_v53 = vpop.xlane.xlu1 %1545 }
 0x31f   : > { %v1578_v44 = vadd.f32 %v3377_v47, %v1546_v53  ;;  %v1836_v53 = vmax.f32 %v1820_v50, 1e-12  ;;  %v1569_v50 = vadd.f32 %v3377_v47, %v3375_v24 }
 0x321   : > { %2026 = vperm.xlu1 %2598, %v1578_v44   ;;  %v1837_v44 = vmax.f32 %v1821_v51, 1e-12  ;;  %2629 = vrcp.f32 %v1836_v53  ;;  %v1685_v51 = vpop.f32.mrf.mxu2  ;;  %v1798_v53 = vpop.f32.mrf.mxu3 }
 0x323   : > { %2631 = vrcp.f32 %v1837_v44 }
 0x326   : > { %v1549_v14 = vpop.xlane.xlu0 %1548 }
 0x327   : > { %v1579_v6 = vadd.f32 %v3377_v47, %v1549_v14  ;;  %v2630_v11 = vpop.eup %2629 }
 0x329   : > { %2031 = vperm.xlu0 %2597, %v1579_v6   ;;  %v1573_v6 = vadd.f32 %v3377_v47, %v1531_v45  ;;  %v2632_v63 = vpop.eup %2631  ;;  %v1801_v44 = vpop.f32.mrf.mxu3 }
 0x32e   : > { %v1552_v60 = vpop.xlane.xlu2 %1551 }
 0x32f   : > { %v1580_v61 = vadd.f32 %v3377_v47, %v1552_v60 }
 0x331   : > { %2036 = vperm.xlu2 %2599, %v1580_v61   ;;  %v1574_v61 = vadd.f32 %v3377_v47, %v1534_v31  ;;  %v1571_v31 = vadd.f32 %v3377_v47, %v1525_v28 }
 0x336   : > { %v1555_v13 = vpop.xlane.xlu2 %1554 }
 0x337   : > { %v1581_v32 = vadd.f32 %v3377_v47, %v1555_v13  ;;  %v1822_v13 = vld [vmem:[%s2759_s30 + $0x18] sm:$0xff] }
 0x339   : > { %2041 = vperm.xlu1 %2598, %v1581_v32   ;;  %v1838_v32 = vmax.f32 %v1822_v13, 1e-12 }
 0x33b   : > { %2633 = vrcp.f32 %v1838_v32 }
 0x33e   : > { %v1558_v0 = vpop.xlane.xlu1 %1557 }
 0x33f   : > { %v1582_v17 = vadd.f32 %v3377_v47, %v1558_v0  ;;  %v1575_v0 = vadd.f32 %v3377_v47, %v1537_v49 }
 0x341   : > { %2046 = vperm.xlu0 %2597, %v1582_v17   ;;  %v2634_v45 = vpop.eup %2633  ;;  %v1570_v17 = vadd.f32 %v3377_v47, %v1522_v27  ;;  %v1688_v27 = vpop.f32.mrf.mxu2 }
 0x342   : > { %v1877_v26 = vsub.f32 %v1688_v27, %v1801_v44  ;;  %v3539_v27 = vsub.f32 %v3251_v59, %v3241_v38 }
 0x346   : > { %v1561_v37 = vpop.xlane.xlu0 %1560 }
 0x347   : > { %v1583_v42 = vadd.f32 %v3377_v47, %v1561_v37 }
 0x349   : > { %1905 = vperm.xlu0 %2597, %v2628_v41   ;;  %2051 = vperm.xlu2 %2599, %v1583_v42   ;;  %v1819_v41 = vld [vmem:[%s2759_s30] sm:$0xff]  ;;  %v1572_v42 = vadd.f32 %v3377_v47, %v1528_v33  ;;  %v1691_v28 = vpop.f32.mrf.mxu2 }
 0x34a   : > { %v1835_v37 = vmax.f32 %v1819_v41, 1e-12 }
 0x34c   : > { %2635 = vrcp.f32 %v1835_v37 }
 0x34e   : > { %v1564_v14 = vpop.xlane.xlu2 %1563 }
 0x34f   : > { %v1584_v60 = vadd.f32 %v3377_v47, %v1564_v14  ;;  %v1804_v14 = vpop.f32.mrf.mxu3 }
 0x350   : > { %v1878_v10 = vsub.f32 %v1691_v28, %v1804_v14  ;;  %v3541_v14 = vld [vmem:[#allocation5_spill] sm:$0xff] }
 0x351   : > { %2056 = vperm.xlu1 %2598, %v1584_v60   ;;  %2001 = vperm.xlu0 %2597, %v1573_v6   ;;  %v1694_v6 = vpop.f32.mrf.mxu2 }
 0x352   : > { %2006 = vperm.xlu2 %2599, %v1574_v61   ;;  %v2636_v49 = vpop.eup %2635 }
 0x357   : > { %v1807_v60 = vpop.f32.mrf.mxu3 }
 0x358   : > { %v1879_v20 = vsub.f32 %v1694_v6, %v1807_v60  ;;  %v1974_v6 = vmul.f32 %v3361_v16, %v1878_v10 }
 0x359   : > { %2011 = vperm.xlu1 %2598, %v1575_v0   ;;  %1890 = vperm.xlu0 %2597, %v2630_v11   ;;  %v1697_v13 = vpop.f32.mrf.mxu2 }
 0x35a   : > { %1895 = vperm.xlu2 %2599, %v2632_v63  }
 0x35f   : > { %v1810_v32 = vpop.f32.mrf.mxu3 }
 0x360   : > { %v1880_v12 = vsub.f32 %v1697_v13, %v1810_v32 }
 0x361   : > { %1900 = vperm.xlu1 %2598, %v2634_v45   ;;  %1986 = vperm.xlu0 %2597, %v1570_v17   ;;  %v1700_v63 = vpop.f32.mrf.mxu2 }
 0x362   : > { %1991 = vperm.xlu2 %2599, %v1571_v31   ;;  %v1976_v29 = vmul.f32 %v3357_v39, %v1880_v12  ;;  %v1973_v12 = vmul.f32 %v3363_v21, %v1877_v26  ;;  %v3533_v26 = vsub.f32 %v3310_v30, %v3306_v25 }
 0x364   : > { %v1970_v39 = vmul.f32 %v3369_v22, %v3533_v26  ;;  %v3536_v22 = vsub.f32 %v3283_v34, %v3273_v8  ;;  %v2116_v26 = vld [vmem:[#allocation2 + $0x30] sm:$0xff] }
 0x367   : > { %v1813_v24 = vpop.f32.mrf.mxu3 }
 0x369   : > { %1996 = vperm.xlu1 %2598, %v1572_v42   ;;  %v1703_v17 = vpop.f32.mrf.mxu2 }
 0x36a   : > { %1981 = vperm.xlu2 %2599, %v1569_v50  }
 0x36f   : > { %v1816_v41 = vpop.f32.mrf.mxu3 }
 0x370   : > { %v1882_v42 = vsub.f32 %v1703_v17, %v1816_v41  ;;  %v1975_v17 = vmul.f32 %v3359_v7, %v1879_v20  ;;  %v3532_v20 = vsub.f32 %v3319_v35, %v3316_v56  ;;  %v3534_v56 = vsub.f32 %v3301_v48, %v3297_v18 }
 0x371   : > { %1885 = vperm.xlu1 %2598, %v2636_v49   ;;  %v1881_v49 = vsub.f32 %v1700_v63, %v1813_v24  ;;  %v3537_v48 = vsub.f32 %v3276_v4, %v3255_v54  ;;  %v3540_v4 = vlaneseq }
 0x372   : > { %v1978_v1 = vmul.f32 %v3355_v3, %v1882_v42  ;;  %v1876_v3 = vsub.f32 %v1685_v51, %v1798_v53  ;;  %v1969_v35 = vmul.f32 %v3371_v2, %v3534_v56 }
 0x373   : > { %v2022_v33 = vpop.permute.xlu2 %2021  ;;  %v1977_v62 = vmul.f32 %v3351_v43, %v1881_v49 }
 0x383   : > { %v2017_v61 = vpop.permute.xlu0 %2016 }
 0x384   : > { %v2066_v21 = vmul.f32 %v2017_v61, %v1970_v39  ;;  %v3542_v61 = vsub.f32 %v3245_v15, %v3541_v14 }
 0x38b   : > { %v2037_v0 = vpop.permute.xlu2 %2036 }
 0x393   : > { %v2027_v47 = vpop.permute.xlu1 %2026 }
 0x39b   : > { %v2032_v11 = vpop.permute.xlu0 %2031 }
 0x3a3   : > { %v2052_v37 = vpop.permute.xlu2 %2051 }
 0x3a4   : > { %v2073_v23 = vmul.f32 %v2052_v37, %v1977_v62  ;;  %v1972_v62 = vmul.f32 %v3365_v40, %v1876_v3  ;;  %v3535_v40 = vsub.f32 %v3292_v9, %v3285_v52 }
 0x3a6   : > { %v2068_v10 = vmul.f32 %v2027_v47, %v1972_v62 }
 0x3ab   : > { %v2042_v31 = vpop.permute.xlu1 %2041 }
 0x3ac   : > { %v2007_v57 = vpop.permute.xlu2 %2006  ;;  %v2071_v60 = vmul.f32 %v2042_v31, %v1975_v17  ;;  %v2110_v31 = vld [vmem:[#allocation2] sm:$0xff] }
 0x3b3   : > { %v2047_v45 = vpop.permute.xlu0 %2046 }
 0x3b4   : > { %v2072_v41 = vmul.f32 %v2047_v45, %v1976_v29  ;;  %v1896_v29 = vpop.permute.xlu2 %1895 }
 0x3bb   : > { %v1906_v50 = vpop.permute.xlu0 %1905 }
 0x3bc   : > { %v1967_v51 = vmul.f32 %v1906_v50, %v3536_v22  ;;  %v1992_v52 = vpop.permute.xlu2 %1991  ;;  %v2111_v50 = vld [vmem:[#allocation2 + $0x8] sm:$0xff] }
 0x3c3   : > { %v2057_v5 = vpop.permute.xlu1 %2056  ;;  %v2002_v13 = vpop.permute.xlu0 %2001 }
 0x3c4   : > { %v2074_v19 = vmul.f32 %v2057_v5, %v1978_v1  ;;  %v2070_v5 = vmul.f32 %v2037_v0, %v1974_v6  ;;  %v2063_v18 = vmul.f32 %v2002_v13, %v1967_v51  ;;  %v1982_v59 = vpop.permute.xlu2 %1981  ;;  %v2117_v6 = vld [vmem:[#allocation2 + $0x38] sm:$0xff] }
 0x3c6   : > { %2118 = vmatpush.msra.mxu0 %v2074_v19  ;;  %2569 = vmatpush.msra.mxu2 %v2074_v19  ;;  %v2069_v19 = vmul.f32 %v2032_v11, %v1973_v12 }
 0x3c8   : > { %2119 = vmatpush.msra.mxu0 %v2073_v23  ;;  %2570 = vmatpush.msra.mxu2 %v2073_v23  ;;  %v1971_v23 = vmul.f32 %v3367_v55, %v3532_v20  ;;  %v1968_v55 = vmul.f32 %v3373_v46, %v3535_v40  ;;  %v3538_v46 = vsub.f32 %v3262_v58, %v3249_v36  ;;  %v2076_v36 = vshrl.u32 %v3540_v4, 7  ;;  %v2604_v58 = vld [vmem:[%s497_s15] ss:$0 sm:$0xff] }
 0x3ca   : > { %2120 = vmatpush.msra.mxu0 %v2072_v41  ;;  %2571 = vmatpush.msra.mxu2 %v2072_v41  ;;  %v2067_v43 = vmul.f32 %v2022_v33, %v1971_v23  ;;  %v2064_v30 = vmul.f32 %v2007_v57, %v1968_v55  ;;  %v1965_v57 = vmul.f32 %v1896_v29, %v3538_v46  ;;  %v2648_v33 = vmov 1.0   ;;  %v2112_v41 = vld [vmem:[#allocation2 + $0x10] sm:$0xff] }
 0x3cb   : > { %v2012_v1 = vpop.permute.xlu1 %2011  ;;  %v1891_v7 = vpop.permute.xlu0 %1890  ;;  %vm2086_vm3 = vcmp.eq.s32.totalorder %v2076_v36, %v2604_v58  ;;  %v2077_v11 = vadd.s32 8, %v2076_v36  ;;  %v2083_v63 = vadd.s32 56, %v2076_v36  ;;  %v2078_v24 = vadd.s32 16, %v2076_v36 }
 0x3cc   : > { %2121 = vmatpush.msra.mxu0 %v2071_v60  ;;  %2572 = vmatpush.msra.mxu2 %v2071_v60  ;;  %v2065_v25 = vmul.f32 %v2012_v1, %v1969_v35  ;;  %v2061_v34 = vmul.f32 %v1992_v52, %v1965_v57  ;;  %v1964_v44 = vmul.f32 %v1891_v7, %v3539_v27  ;;  %v2079_v47 = vadd.s32 24, %v2076_v36 }
 0x3cd   : > { %vm2087_vm4 = vcmp.eq.s32.totalorder %v2077_v11, %v2604_v58  ;;  %vm2093_vm5 = vcmp.eq.s32.totalorder %v2083_v63, %v2604_v58  ;;  %vm2088_vm6 = vcmp.eq.s32.totalorder %v2078_v24, %v2604_v58  ;;  %v2080_v15 = vadd.s32 32, %v2076_v36 }
 0x3ce   : > { %2122 = vmatpush.msra.mxu0 %v2070_v5  ;;  %2573 = vmatpush.msra.mxu2 %v2070_v5  ;;  %vm2089_vm7 = vcmp.eq.s32.totalorder %v2079_v47, %v2604_v58  ;;  %v2081_v0 = vadd.s32 40, %v2076_v36  ;;  %v2082_v45 = vadd.s32 48, %v2076_v36  ;;  %v2113_v5 = vld [vmem:[#allocation2 + $0x18] sm:$0xff] }
 0x3cf   : > { %vm2090_vm8 = vcmp.eq.s32.totalorder %v2080_v15, %v2604_v58 }
 0x3d0   : > { %2123 = vmatpush.msra.mxu0 %v2069_v19  ;;  %2574 = vmatpush.msra.mxu2 %v2069_v19  ;;  %vm2091_vm9 = vcmp.eq.s32.totalorder %v2081_v0, %v2604_v58  ;;  %vm2092_vm10 = vcmp.eq.s32.totalorder %v2082_v45, %v2604_v58  ;;  %v2114_v19 = vld [vmem:[#allocation2 + $0x20] sm:$0xff] }
 0x3d2   : > { %2124 = vmatpush.msra.mxu0 %v2068_v10  ;;  %2575 = vmatpush.msra.mxu2 %v2068_v10  ;;  %v2115_v10 = vld [vmem:[#allocation2 + $0x28] sm:$0xff] }
 0x3d3   : > { %v1901_v16 = vpop.permute.xlu1 %1900  ;;  %v1987_v8 = vpop.permute.xlu0 %1986 }
 0x3d4   : > { %2125 = vmatpush.msra.mxu0 %v2067_v43  ;;  %2576 = vmatpush.msra.mxu2 %v2067_v43  ;;  %v1966_v2 = vmul.f32 %v1901_v16, %v3537_v48  ;;  %v2060_v54 = vmul.f32 %v1987_v8, %v1964_v44 }
 0x3d6   : > { %2126 = vmatpush.msra.mxu0 %v2066_v21  ;;  %2577 = vmatpush.msra.mxu2 %v2066_v21 }
 0x3d8   : > { %2127 = vmatpush.msra.mxu0 %v2065_v25  ;;  %2578 = vmatpush.msra.mxu2 %v2065_v25 }
 0x3da   : > { %2128 = vmatpush.msra.mxu0 %v2064_v30  ;;  %2579 = vmatpush.msra.mxu2 %v2064_v30 }
 0x3db   : > { %v1997_v9 = vpop.permute.xlu1 %1996 }
 0x3dc   : > { %v2062_v53 = vmul.f32 %v1997_v9, %v1966_v2  ;;  %2129 = vmatpush.msra.mxu0 %v2063_v18  ;;  %2580 = vmatpush.msra.mxu2 %v2063_v18 }
 0x3de   : > { %2130 = vmatpush.msra.mxu0 %v2062_v53  ;;  %2581 = vmatpush.msra.mxu2 %v2062_v53 }
 0x3e0   : > { %2131 = vmatpush.msra.mxu0 %v2061_v34  ;;  %2582 = vmatpush.msra.mxu2 %v2061_v34 }
 0x3e2   : > { %2132 = vmatpush.msra.mxu0 %v2060_v54  ;;  %2583 = vmatpush.msra.mxu2 %v2060_v54 }
 0x3e3   : > { %v1886_v28 = vpop.permute.xlu1 %1885 }
 0x3e4   : > { %v1963_v38 = vmul.f32 %v1886_v28, %v3542_v61 }
 0x3e6   : > { %v2059_v32 = vmul.f32 %v1982_v59, %v1963_v38 }
 0x3e8   : > { %2133 = vmatpush.msra.mxu0 %v2059_v32  ;;  %2584 = vmatpush.msra.mxu2 %v2059_v32 }
 0x3e9   : > { %2522 = vmatmul.msk.f32.vlgmr.msra.gmra.mxu0 %vm2086_vm3, %v2648_v33  ;;  %2529 = vmatmul.msk.f32.vlgmr.msra.gmra.mxu2 %vm2093_vm5, %v2648_v33 }
 0x3f1   : > { %2523 = vmatmul.msk.f32.gmra.mxu0 %vm2087_vm4, %v2648_v33 }
 0x3f9   : > { %2524 = vmatmul.msk.f32.gmra.mxu0 %vm2088_vm6, %v2648_v33 }
 0x401   : > { %2525 = vmatmul.msk.f32.gmra.mxu0 %vm2089_vm7, %v2648_v33 }
 0x409   : > { %2526 = vmatmul.msk.f32.gmra.mxu0 %vm2090_vm8, %v2648_v33 }
 0x411   : > { %2527 = vmatmul.msk.f32.gmra.mxu0 %vm2091_vm9, %v2648_v33 }
 0x419   : > { %2528 = vmatmul.msk.f32.gmra.mxu0 %vm2092_vm10, %v2648_v33 }
 0x466   : > { %v2135_v37 = vpop.f32.mrf.mxu0 }
 0x467   : > { %v2159_v42 = vadd.f32 %v2135_v37, %v2110_v31 }
 0x469   : > { %2168 = vst.msk [vmem:[#allocation2] sm:$0xff] %vm2167_vm11, %v2159_v42 }
 0x46c   : > { %v2156_v60 = vpop.f32.mrf.mxu2 }
 0x46d   : > { %v2166_v1 = vadd.f32 %v2156_v60, %v2117_v6 }
 0x46e   : > { %v2138_v49 = vpop.f32.mrf.mxu0 }
 0x46f   : > { %v2160_v17 = vadd.f32 %v2138_v49, %v2111_v50  ;;  %2175 = vst.msk [vmem:[#allocation2 + $0x38] sm:$0xff] %vm2167_vm11, %v2166_v1 }
 0x471   : > { %2169 = vst.msk [vmem:[#allocation2 + $0x8] sm:$0xff] %vm2167_vm11, %v2160_v17 }
 0x476   : > { %v2141_v13 = vpop.f32.mrf.mxu0 }
 0x477   : > { %v2161_v3 = vadd.f32 %v2141_v13, %v2112_v41 }
 0x479   : > { %2170 = vst.msk [vmem:[#allocation2 + $0x10] sm:$0xff] %vm2167_vm11, %v2161_v3 }
 0x47e   : > { %v2144_v12 = vpop.f32.mrf.mxu0 }
 0x47f   : > { %v2162_v62 = vadd.f32 %v2144_v12, %v2113_v5 }
 0x481   : > { %2171 = vst.msk [vmem:[#allocation2 + $0x18] sm:$0xff] %vm2167_vm11, %v2162_v62 }
 0x486   : > { %v2147_v20 = vpop.f32.mrf.mxu0 }
 0x487   : > { %v2163_v23 = vadd.f32 %v2147_v20, %v2114_v19 }
 0x489   : > { %2172 = vst.msk [vmem:[#allocation2 + $0x20] sm:$0xff] %vm2167_vm11, %v2163_v23 }
 0x48e   : > { %v2150_v29 = vpop.f32.mrf.mxu0 }
 0x48f   : > { %v2164_v43 = vadd.f32 %v2150_v29, %v2115_v10 }
 0x491   : > { %2173 = vst.msk [vmem:[#allocation2 + $0x28] sm:$0xff] %vm2167_vm11, %v2164_v43 }
 0x495   : > { %2179 = sbr.rel (%p2530_p6) target bundleno = 1192 (0x4a8), region = 80 }
 0x496   : > { %v2153_v39 = vpop.f32.mrf.mxu0 }
 0x497   : > { %v2165_v7 = vadd.f32 %v2153_v39, %v2116_v26 }
 0x499   : > { %2174 = vst.msk [vmem:[#allocation2 + $0x30] sm:$0xff] %vm2167_vm11, %v2165_v7 }
 0x49a   : > { %v2180_v16 = vld [vmem:[%s3518_s5] sm:$0xff]  ;;  %v2181_v56 = vld [vmem:[%s3518_s5 + $0x8] sm:$0xff]  ;;  %v2182_v55 = vld [vmem:[%s3518_s5 + $0x10] sm:$0xff] }
 0x49b   : > { %v2188_v21 = vld [vmem:[#allocation2] sm:$0xff]  ;;  %v2189_v40 = vld [vmem:[#allocation2 + $0x8] sm:$0xff]  ;;  %v2190_v25 = vld [vmem:[#allocation2 + $0x10] sm:$0xff] }
 0x49c   : > { %v2196_v35 = vmul.f32 0.01, %v2188_v21  ;;  %v2197_v30 = vmul.f32 0.01, %v2189_v40  ;;  %v2198_v22 = vmul.f32 0.01, %v2190_v25 }
 0x49d   : > { %v2183_v51 = vld [vmem:[%s3518_s5 + $0x18] sm:$0xff]  ;;  %v2184_v52 = vld [vmem:[%s3518_s5 + $0x20] sm:$0xff]  ;;  %v2185_v46 = vld [vmem:[%s3518_s5 + $0x28] sm:$0xff] }
 0x49e   : > { %v2191_v18 = vld [vmem:[#allocation2 + $0x18] sm:$0xff]  ;;  %v2204_v48 = vadd.f32 %v2196_v35, %v2180_v16  ;;  %v2192_v9 = vld [vmem:[#allocation2 + $0x20] sm:$0xff]  ;;  %v2205_v57 = vadd.f32 %v2197_v30, %v2181_v56  ;;  %v2206_v53 = vadd.f32 %v2198_v22, %v2182_v55  ;;  %v2193_v34 = vld [vmem:[#allocation2 + $0x28] sm:$0xff] }
 0x49f   : > { %v2199_v2 = vmul.f32 0.01, %v2191_v18  ;;  %v2200_v8 = vmul.f32 0.01, %v2192_v9  ;;  %v2186_v27 = vld [vmem:[%s3518_s5 + $0x30] sm:$0xff]  ;;  %v2187_v28 = vld [vmem:[%s3518_s5 + $0x38] sm:$0xff] }
 0x4a0   : > { %v2194_v44 = vld [vmem:[#allocation2 + $0x30] sm:$0xff]  ;;  %2212 = vst.msk [vmem:[%s3526_s13] sm:$0xff] %vm2167_vm11, %v2204_v48  ;;  %v2201_v4 = vmul.f32 0.01, %v2193_v34  ;;  %v2195_v14 = vld [vmem:[#allocation2 + $0x38] sm:$0xff] }
 0x4a1   : > { %v2207_v54 = vadd.f32 %v2199_v2, %v2183_v51  ;;  %v2202_v36 = vmul.f32 0.01, %v2194_v44  ;;  %2213 = vst.msk [vmem:[%s3526_s13 + $0x8] sm:$0xff] %vm2167_vm11, %v2205_v57  ;;  %v2208_v58 = vadd.f32 %v2200_v8, %v2184_v52  ;;  %v2203_v59 = vmul.f32 0.01, %v2195_v14 }
 0x4a2   : > { %2214 = vst.msk [vmem:[%s3526_s13 + $0x10] sm:$0xff] %vm2167_vm11, %v2206_v53  ;;  %v2209_v61 = vadd.f32 %v2201_v4, %v2185_v46 }
 0x4a3   : > { %v2210_v38 = vadd.f32 %v2202_v36, %v2186_v27  ;;  %2215 = vst.msk [vmem:[%s3526_s13 + $0x18] sm:$0xff] %vm2167_vm11, %v2207_v54  ;;  %v2211_v32 = vadd.f32 %v2203_v59, %v2187_v28 }
 0x4a4   : > { %2216 = vst.msk [vmem:[%s3526_s13 + $0x20] sm:$0xff] %vm2167_vm11, %v2208_v58 }
 0x4a5   : > { %2217 = vst.msk [vmem:[%s3526_s13 + $0x28] sm:$0xff] %vm2167_vm11, %v2209_v61 }
 0x4a6   : > { %2218 = vst.msk [vmem:[%s3526_s13 + $0x30] sm:$0xff] %vm2167_vm11, %v2210_v38 }
 0x4a7   : > { %2219 = vst.msk [vmem:[%s3526_s13 + $0x38] sm:$0xff] %vm2167_vm11, %v2211_v32 }
 0x4a8 PF: > { %s3543_s20 = sld [smem:[#allocation4_spill]] }
 0x4ae   : > { %s25_s27 = sadd.s32 1, %s3543_s20  }
 0x4af   : > { %p22_p7 = scmp.ge.s32.totalorder %s25_s27, 4  }
 0x4b1   :  { %24 = sbr.rel (!%p22_p7) target bundleno = 3 (0x3), region = 118 }

</bundles_post_ra>
